<compile_context>
chip_gen: v7x
topology: tpu7x:2x2x1
jax: 0.10.0
libtpu: 0.0.40
codegen_flags: <defaults>
</compile_context>

<pallas_src>
import functools

import jax
import jax.numpy as jnp
from jax.experimental import pallas as pl
from jax.experimental.pallas import tpu as pltpu


# ----------------------------------------------------------------------------
# Fused kernel: conv+relu, conv+relu, pool, conv+relu, conv+relu, pool, FC
# for one batch tile of Bt images.
# ----------------------------------------------------------------------------
def fused_cnn_kernel(x_ref,
                     w1_ref, b1_ref, w2_ref, b2_ref,
                     w3_ref, b3_ref, w4_ref, b4_ref,
                     pa1_ref, pb1_ref, pa2_ref, pb2_ref,
                     wfc_ref, bfc_ref,
                     o_ref,
                     p2, p3, p4):
    H1 = p2.shape[0] - 2            # 28
    H2 = p3.shape[0] - 2            # 14
    Hf = H2 // 2                    # 7
    Bt = x_ref.shape[1]
    L1 = p2.shape[2]                # (28+2)*C
    L2 = p3.shape[2]                # (14+2)*C
    bf16 = jnp.bfloat16

    def conv3x3_relu(p_ref, w_ref, b_ref, H):
        """3x3 'same' conv + bias + ReLU.  bf16 MXU inputs, f32 accumulation.

        p_ref: (H+2, Bt, Lin) bf16 with zero border rows.  Returns (H, Bt, Lout)
        bf16 whose left/right pad-pixel lanes are already zero (baked into w/b).
        """
        Lin = w_ref.shape[1]
        Lout = w_ref.shape[2]
        acc = None
        for di in range(3):                                   # vertical taps
            a = p_ref[pl.ds(di, H)].reshape(H * Bt, Lin)
            d = jnp.dot(a, w_ref[di], preferred_element_type=jnp.float32)
            acc = d if acc is None else acc + d
        out = jnp.maximum(acc + b_ref[...], 0.0)
        return out.astype(bf16).reshape(H, Bt, Lout)

    def maxpool2x2(act, pa_ref, pb_ref):
        """2x2 stride-2 max-pool on a (H, Bt, L) bf16 value.

        Vertical half: layout-free leading-dim pair reshape + max (no scratch
        round trip).  Horizontal half: two 0/1 selection matmuls that also
        re-pack the surviving pixels lane-densely (and re-pad for the next conv).
        Selection of bf16 values is exact, so the bf16 cast below is lossless.
        """
        H, _, L = act.shape
        Ho = H // 2
        pairs = act.reshape(Ho, 2, Bt, L)
        rmax = jnp.maximum(pairs[:, 0], pairs[:, 1]).reshape(Ho * Bt, L)
        pooled = jnp.maximum(
            jnp.dot(rmax, pa_ref[...], preferred_element_type=jnp.float32),
            jnp.dot(rmax, pb_ref[...], preferred_element_type=jnp.float32))
        return pooled.astype(bf16).reshape(Ho, Bt, pa_ref.shape[1])

    zrow1 = jnp.zeros((Bt, L1), bf16)
    zrow2 = jnp.zeros((Bt, L2), bf16)

    # ---- conv block 1 (28x28 -> 14x14) ----
    act1 = conv3x3_relu(x_ref, w1_ref, b1_ref, H1)            # (28, Bt, 240) bf16
    p2[0] = zrow1                                             # zero only border rows,
    p2[H1 + 1] = zrow1                                        # every grid step
    p2[pl.ds(1, H1)] = act1
    act2 = conv3x3_relu(p2, w2_ref, b2_ref, H1)               # (28, Bt, 240) bf16
    pooled1 = maxpool2x2(act2, pa1_ref, pb1_ref)              # (14, Bt, 128) padded

    # ---- conv block 2 (14x14 -> 7x7) ----
    p3[0] = zrow2
    p3[H2 + 1] = zrow2
    p3[pl.ds(1, H2)] = pooled1
    act3 = conv3x3_relu(p3, w3_ref, b3_ref, H2)               # (14, Bt, 128)
    p4[0] = zrow2
    p4[H2 + 1] = zrow2
    p4[pl.ds(1, H2)] = act3
    act4 = conv3x3_relu(p4, w4_ref, b4_ref, H2)               # (14, Bt, 128)
    pooled2 = maxpool2x2(act4, pa2_ref, pb2_ref)              # (7, Bt, 7*C) dense bf16

    # ---- fused classifier (output lane-padded to 128 classes -> dense stores) ----
    # TODO(synk): collapse the 7 per-row dots into one (Bt, 392) contraction; kept as a
    # short accumulating loop since it is <2% of the MXU work and avoids a row transpose.
    logits = bfc_ref[...] + jnp.dot(pooled2[0], wfc_ref[0],
                                    preferred_element_type=jnp.float32)
    for h in range(1, Hf):
        logits = logits + jnp.dot(pooled2[h], wfc_ref[h],
                                  preferred_element_type=jnp.float32)
    o_ref[...] = logits.astype(o_ref.dtype)


# ----------------------------------------------------------------------------
# Trace-time builders: fold horizontal taps / channel contraction / padding /
# pooling selection into dense lane-layout matrices.
# ----------------------------------------------------------------------------
def _round_up(x, m):
    return (x + m - 1) // m * m


def _conv_band_weights(k_hwio, W):
    """(3,3,Cin,Cout) HWIO kernel -> (3, (W+2)*Cin, (W+2)*Cout) banded matrices.

    For vertical tap di:  M[di][(w+dj)*Cin+ci, (w+1)*Cout+co] = k[di,dj,ci,co].
    Output columns of the two border pixels stay zero, so a conv result computed
    with these matrices is born with its left/right zero padding.
    """
    Wp = W + 2
    w_idx = jnp.arange(W)
    mats = []
    for di in range(3):
        acc = jnp.zeros((Wp * k_hwio.shape[2], Wp * k_hwio.shape[3]),
                        k_hwio.dtype)
        for dj in range(3):
            sel = jnp.zeros((Wp, Wp), k_hwio.dtype)
            sel = sel.at[w_idx + dj, w_idx + 1].set(1.0)
            acc = acc + jnp.kron(sel, k_hwio[di, dj])
        mats.append(acc)
    return jnp.stack(mats)


def _conv_band_bias(b, W):
    """Bias laid out on (W+2)*Cout lanes, zero on the two border pixels."""
    Wp = W + 2
    mask = jnp.zeros((Wp,), b.dtype).at[1:W + 1].set(1.0)
    flat = b.reshape(-1)
    return jnp.kron(mask, flat).reshape(1, Wp * flat.shape[0])


def _pool_select_matrices(W_in, C, dtype, pad_out):
    """0/1 matrices selecting the left / right horizontal pixel of each 2x2
    window (input lanes in padded coords), re-packed to the pooled lane layout
    (optionally re-padded for the next conv)."""
    W_out = W_in // 2
    off = 1 if pad_out else 0
    Wpo = W_out + 2 * off
    wo = jnp.arange(W_out)
    sa = jnp.zeros((W_in + 2, Wpo), dtype).at[2 * wo + 1, wo + off].set(1.0)
    sb = jnp.zeros((W_in + 2, Wpo), dtype).at[2 * wo + 2, wo + off].set(1.0)
    eye = jnp.eye(C, dtype=dtype)
    return jnp.kron(sa, eye), jnp.kron(sb, eye)


def fold_params(params, *, image_hw=(28, 28), ncls_pad=128):
    """Fold PyTorch-layout weights into lane-dense bf16 matrices.

    Run ONCE per weight update (kept out of the per-forward jit path)."""
    H, W = image_hw
    W2 = W // 2
    f32, bf16 = jnp.float32, jnp.bfloat16
    Ch = params["w1"].shape[-1]
    ncls = params["wfc"].shape[-1]
    assert ncls_pad >= ncls

    folded = {
        "w1": _conv_band_weights(params["w1"].astype(f32), W).astype(bf16),
        "w2": _conv_band_weights(params["w2"].astype(f32), W).astype(bf16),
        "w3": _conv_band_weights(params["w3"].astype(f32), W2).astype(bf16),
        "w4": _conv_band_weights(params["w4"].astype(f32), W2).astype(bf16),
        "b1": _conv_band_bias(params["b1"].astype(f32), W),     # biases stay f32
        "b2": _conv_band_bias(params["b2"].astype(f32), W),
        "b3": _conv_band_bias(params["b3"].astype(f32), W2),
        "b4": _conv_band_bias(params["b4"].astype(f32), W2),
    }
    pa1, pb1 = _pool_select_matrices(W, Ch, bf16, pad_out=True)     # (240, 128)
    pa2, pb2 = _pool_select_matrices(W2, Ch, bf16, pad_out=False)   # (128, 7*Ch)
    folded.update(pa1=pa1, pb1=pb1, pa2=pa2, pb2=pb2)

    # Classifier weight permuted so the kernel's (h, w*Ch+c) flatten matches the
    # torch.nn.Flatten-on-NCHW ordering (c*49 + h*7 + w); lane-padded to ncls_pad.
    wfc = params["wfc"].astype(f32).reshape(Ch, 7, 7, ncls)
    wfc = jnp.transpose(wfc, (1, 2, 0, 3)).reshape(7, 7 * Ch, ncls)
    folded["wfc"] = jnp.pad(wfc, ((0, 0), (0, 0), (0, ncls_pad - ncls))).astype(bf16)
    folded["bfc"] = jnp.pad(params["bfc"].astype(f32).reshape(1, ncls),
                            ((0, 0), (0, ncls_pad - ncls)))
    return jax.device_put(folded)


# ----------------------------------------------------------------------------
# Batch-tile selection (per TPU generation) + forward wrapper
# ----------------------------------------------------------------------------
def _pick_batch_tile(B, block_b):
    """Batch tile: multiple of 16 (bf16 sublane packing), large enough to amortize
    per-step overhead, capped by the generation's VMEM, and kept small enough for
    >=2 grid steps (so the 'parallel' axis feeds both v7x TensorCores)."""
    try:
        vmem_cap = pltpu.get_tpu_info().vmem_capacity_bytes
    except Exception:                                   # pragma: no cover
        vmem_cap = 64 << 20
    vmem_limit = min(int(vmem_cap) * 3 // 4, 100 << 20)  # ~96 MiB v5e/v6e, ~48 MiB v7x
    per_image = 160 << 10          # scratch + matmul temporaries per image (bf16/f32)
    bt_vmem = max(16, ((vmem_limit - (4 << 20)) // per_image) // 16 * 16)
    bt_two_steps = _round_up((B + 1) // 2, 16) if B > 16 else 16
    bt = max(16, min(_round_up(block_b, 16), bt_vmem, bt_two_steps))
    return bt, vmem_limit


@functools.partial(jax.jit, static_argnames=("num_classes", "block_b"))
def mnist_model_v2_forward(x_nchw, folded, *, num_classes, block_b=128):
    B, Cin, H, W = x_nchw.shape
    assert (H, W) == (28, 28), "classifier assumes 28x28 input (7*7 after pools)"
    W2 = W // 2
    L1 = folded["w2"].shape[1]                 # (W+2)*Ch
    L2 = folded["w3"].shape[1]                 # (W2+2)*Ch
    ncls_pad = folded["wfc"].shape[-1]
    bf16 = jnp.bfloat16

    Bt, vmem_limit = _pick_batch_tile(B, block_b)
    Bpad = _round_up(B, Bt)

    # Input relayout: (B, Cin, H, W) -> (H+2, Bpad, (W+2)*Cin), zero-padded, bf16.
    xt = jnp.transpose(x_nchw, (2, 0, 3, 1)).reshape(H, B, W * Cin)
    xp = jnp.pad(xt.astype(bf16), ((1, 1), (0, Bpad - B), (Cin, Cin)))

    def const_spec(arr):
        zeros = (0,) * arr.ndim
        return pl.BlockSpec(arr.shape, lambda i, _z=zeros: _z)

    logits = pl.pallas_call(
        fused_cnn_kernel,
        out_shape=jax.ShapeDtypeStruct((Bpad, ncls_pad), jnp.float32),
        grid_spec=pltpu.PrefetchScalarGridSpec(
            num_scalar_prefetch=0,
            grid=(Bpad // Bt,),
            in_specs=[
                pl.BlockSpec((H + 2, Bt, (W + 2) * Cin), lambda i: (0, i, 0)),
                const_spec(folded["w1"]), const_spec(folded["b1"]),
                const_spec(folded["w2"]), const_spec(folded["b2"]),
                const_spec(folded["w3"]), const_spec(folded["b3"]),
                const_spec(folded["w4"]), const_spec(folded["b4"]),
                const_spec(folded["pa1"]), const_spec(folded["pb1"]),
                const_spec(folded["pa2"]), const_spec(folded["pb2"]),
                const_spec(folded["wfc"]), const_spec(folded["bfc"]),
            ],
            out_specs=pl.BlockSpec((Bt, ncls_pad), lambda i: (i, 0)),
            scratch_shapes=[
                pltpu.VMEM((H + 2, Bt, L1), bf16),     # p2: conv2 input (row-padded)
                pltpu.VMEM((W2 + 2, Bt, L2), bf16),    # p3: conv3 input (row-padded)
                pltpu.VMEM((W2 + 2, Bt, L2), bf16),    # p4: conv4 input (row-padded)
            ],
        ),
        compiler_params=pltpu.CompilerParams(
            dimension_semantics=("parallel",),         # megacore on v7x; no-op v5e/v6e
            vmem_limit_bytes=vmem_limit),
    )(xp, folded["w1"], folded["b1"], folded["w2"], folded["b2"],
      folded["w3"], folded["b3"], folded["w4"], folded["b4"],
      folded["pa1"], folded["pb1"], folded["pa2"], folded["pb2"],
      folded["wfc"], folded["bfc"])

    return logits[:B, :num_classes]


# ----------------------------------------------------------------------------
# Pure-JAX reference (mirrors the PyTorch forward exactly) for validation.
# ----------------------------------------------------------------------------
def reference_forward(x_nchw, params):
    def conv_relu(x, w, b):   # x NCHW, w HWIO, b (1,1,C)
        y = jax.lax.conv_general_dilated(
            x, w, window_strides=(1, 1), padding=((1, 1), (1, 1)),
            dimension_numbers=('NCHW', 'HWIO', 'NCHW'))
        return jax.nn.relu(y + b.reshape(1, -1, 1, 1))

    def maxpool(x):
        return jax.lax.reduce_window(x, -jnp.inf, jax.lax.max,
                                     (1, 1, 2, 2), (1, 1, 2, 2), 'VALID')

    x = conv_relu(x_nchw, params["w1"], params["b1"])
    x = conv_relu(x, params["w2"], params["b2"])
    x = maxpool(x)
    x = conv_relu(x, params["w3"], params["b3"])
    x = conv_relu(x, params["w4"], params["b4"])
    x = maxpool(x)                                   # (B, C, 7, 7)
    flat = x.reshape(x.shape[0], -1)                 # torch Flatten on NCHW
    return flat @ params["wfc"] + params["bfc"]


def make_params(key, cin=1, hidden=8, ncls=10):
    ks = jax.random.split(key, 10)
    cw = lambda k, ci, co: 0.1 * jax.random.normal(k, (3, 3, ci, co), jnp.float32)
    cb = lambda k, c: 0.05 * jax.random.normal(k, (1, 1, c), jnp.float32)
    return {
        "w1": cw(ks[0], cin, hidden),    "b1": cb(ks[1], hidden),
        "w2": cw(ks[2], hidden, hidden), "b2": cb(ks[3], hidden),
        "w3": cw(ks[4], hidden, hidden), "b3": cb(ks[5], hidden),
        "w4": cw(ks[6], hidden, hidden), "b4": cb(ks[7], hidden),
        "wfc": 0.05 * jax.random.normal(ks[8], (hidden * 7 * 7, ncls), jnp.float32),
        "bfc": 0.05 * jax.random.normal(ks[9], (1, ncls), jnp.float32),
    }


if __name__ == "__main__":
    key = jax.random.PRNGKey(0)
    k_x, k_p = jax.random.split(key)

    # MNIST-like: 1 channel, 28x28 (required by the 7*7 classifier).  batch=24 with a
    # 16-image tile exercises a 2-step grid AND the padded/truncated last tile.
    B, Cin, hidden, ncls = 24, 1, 8, 10
    x = jax.random.normal(k_x, (B, Cin, 28, 28), jnp.float32)
    params = make_params(k_p, cin=Cin, hidden=hidden, ncls=ncls)

    folded = fold_params(params)                      # once per weight update
    logits = mnist_model_v2_forward(x, folded, num_classes=ncls, block_b=16)
    logits = jax.block_until_ready(logits)

    ref = reference_forward(x, params)
    assert logits.shape == (B, ncls)
    err = jnp.max(jnp.abs(logits - ref))
    # bf16 MXU inputs -> relaxed tolerance vs. the f32 reference.
    assert jnp.allclose(logits, ref, rtol=3e-2, atol=3e-2), (
        f"mismatch: max abs err = {err}")

    print("KERNEL_OK")
</pallas_src>

<mosaic_0001>
module attributes {stable_mosaic.version = 11 : i64} {
  func.func @fused_cnn_kernel(%arg0: i32, %arg1: memref<30x16x30xbf16, #tpu.memory_space<vmem>>, %arg2: memref<3x30x240xbf16, #tpu.memory_space<vmem>>, %arg3: memref<1x240xf32, #tpu.memory_space<vmem>>, %arg4: memref<3x240x240xbf16, #tpu.memory_space<vmem>>, %arg5: memref<1x240xf32, #tpu.memory_space<vmem>>, %arg6: memref<3x128x128xbf16, #tpu.memory_space<vmem>>, %arg7: memref<1x128xf32, #tpu.memory_space<vmem>>, %arg8: memref<3x128x128xbf16, #tpu.memory_space<vmem>>, %arg9: memref<1x128xf32, #tpu.memory_space<vmem>>, %arg10: memref<240x128xbf16, #tpu.memory_space<vmem>>, %arg11: memref<240x128xbf16, #tpu.memory_space<vmem>>, %arg12: memref<128x56xbf16, #tpu.memory_space<vmem>>, %arg13: memref<128x56xbf16, #tpu.memory_space<vmem>>, %arg14: memref<7x56x128xbf16, #tpu.memory_space<vmem>>, %arg15: memref<1x128xf32, #tpu.memory_space<vmem>>, %arg16: memref<16x128xf32, #tpu.memory_space<vmem>>, %arg17: memref<30x16x240xbf16, #tpu.memory_space<vmem>>, %arg18: memref<16x16x128xbf16, #tpu.memory_space<vmem>>, %arg19: memref<16x16x128xbf16, #tpu.memory_space<vmem>>) attributes {dimension_semantics = [#tpu.dimension_semantics<parallel>], iteration_bounds = array<i64: 2>, scalar_prefetch = 0 : i64, scratch_operands = 3 : i64, tpu.core_type = #tpu.core_type<tc>, window_params = [{transform_indices = @transform_0, window_bounds = array<i64: 30, 16, 30>}, {pipeline_mode = #tpu.pipeline_mode<synchronous>, transform_indices = @transform_1, window_bounds = array<i64: 3, 30, 240>}, {pipeline_mode = #tpu.pipeline_mode<synchronous>, transform_indices = @transform_2, window_bounds = array<i64: 1, 240>}, {pipeline_mode = #tpu.pipeline_mode<synchronous>, transform_indices = @transform_3, window_bounds = array<i64: 3, 240, 240>}, {pipeline_mode = #tpu.pipeline_mode<synchronous>, transform_indices = @transform_4, window_bounds = array<i64: 1, 240>}, {pipeline_mode = #tpu.pipeline_mode<synchronous>, transform_indices = @transform_5, window_bounds = array<i64: 3, 128, 128>}, {pipeline_mode = #tpu.pipeline_mode<synchronous>, transform_indices = @transform_6, window_bounds = array<i64: 1, 128>}, {pipeline_mode = #tpu.pipeline_mode<synchronous>, transform_indices = @transform_7, window_bounds = array<i64: 3, 128, 128>}, {pipeline_mode = #tpu.pipeline_mode<synchronous>, transform_indices = @transform_8, window_bounds = array<i64: 1, 128>}, {pipeline_mode = #tpu.pipeline_mode<synchronous>, transform_indices = @transform_9, window_bounds = array<i64: 240, 128>}, {pipeline_mode = #tpu.pipeline_mode<synchronous>, transform_indices = @transform_10, window_bounds = array<i64: 240, 128>}, {pipeline_mode = #tpu.pipeline_mode<synchronous>, transform_indices = @transform_11, window_bounds = array<i64: 128, 56>}, {pipeline_mode = #tpu.pipeline_mode<synchronous>, transform_indices = @transform_12, window_bounds = array<i64: 128, 56>}, {pipeline_mode = #tpu.pipeline_mode<synchronous>, transform_indices = @transform_13, window_bounds = array<i64: 7, 56, 128>}, {pipeline_mode = #tpu.pipeline_mode<synchronous>, transform_indices = @transform_14, window_bounds = array<i64: 1, 128>}, {transform_indices = @transform_15, window_bounds = array<i64: 16, 128>}]} {
    %cst = arith.constant 0.000000e+00 : bf16
    %0 = vector.broadcast %cst : bf16 to vector<16x240xbf16>
    %cst_0 = arith.constant 0.000000e+00 : bf16
    %1 = vector.broadcast %cst_0 : bf16 to vector<16x128xbf16>
    %c0 = arith.constant 0 : index
    %c0_1 = arith.constant 0 : index
    %c0_2 = arith.constant 0 : index
    %2 = vector.load %arg1[%c0, %c0_1, %c0_2] : memref<30x16x30xbf16, #tpu.memory_space<vmem>>, vector<28x16x30xbf16>
    %3 = vector.shape_cast %2 : vector<28x16x30xbf16> to vector<448x30xbf16>
    %c0_3 = arith.constant 0 : index
    %c0_4 = arith.constant 0 : index
    %c0_5 = arith.constant 0 : index
    %4 = vector.load %arg2[%c0_3, %c0_4, %c0_5] : memref<3x30x240xbf16, #tpu.memory_space<vmem>>, vector<1x30x240xbf16>
    %5 = vector.shape_cast %4 : vector<1x30x240xbf16> to vector<30x240xbf16>
    %cst_6 = arith.constant dense<0.000000e+00> : vector<448x240xf32>
    %6 = tpu.matmul %3, %5, %cst_6 {dimension_numbers = #tpu.dot_dimension_numbers<[1], [0], [0], [1], [0, 0, 1, 1], [], []>} : vector<448x30xbf16>, vector<30x240xbf16>, vector<448x240xf32> -> vector<448x240xf32>
    %c1 = arith.constant 1 : index
    %c0_7 = arith.constant 0 : index
    %c0_8 = arith.constant 0 : index
    %7 = vector.load %arg1[%c1, %c0_7, %c0_8] : memref<30x16x30xbf16, #tpu.memory_space<vmem>>, vector<28x16x30xbf16>
    %8 = vector.shape_cast %7 : vector<28x16x30xbf16> to vector<448x30xbf16>
    %c1_9 = arith.constant 1 : index
    %c0_10 = arith.constant 0 : index
    %c0_11 = arith.constant 0 : index
    %9 = vector.load %arg2[%c1_9, %c0_10, %c0_11] : memref<3x30x240xbf16, #tpu.memory_space<vmem>>, vector<1x30x240xbf16>
    %10 = vector.shape_cast %9 : vector<1x30x240xbf16> to vector<30x240xbf16>
    %cst_12 = arith.constant dense<0.000000e+00> : vector<448x240xf32>
    %11 = tpu.matmul %8, %10, %cst_12 {dimension_numbers = #tpu.dot_dimension_numbers<[1], [0], [0], [1], [0, 0, 1, 1], [], []>} : vector<448x30xbf16>, vector<30x240xbf16>, vector<448x240xf32> -> vector<448x240xf32>
    %12 = arith.addf %6, %11 : vector<448x240xf32>
    %c2 = arith.constant 2 : index
    %c0_13 = arith.constant 0 : index
    %c0_14 = arith.constant 0 : index
    %13 = vector.load %arg1[%c2, %c0_13, %c0_14] : memref<30x16x30xbf16, #tpu.memory_space<vmem>>, vector<28x16x30xbf16>
    %14 = vector.shape_cast %13 : vector<28x16x30xbf16> to vector<448x30xbf16>
    %c2_15 = arith.constant 2 : index
    %c0_16 = arith.constant 0 : index
    %c0_17 = arith.constant 0 : index
    %15 = vector.load %arg2[%c2_15, %c0_16, %c0_17] : memref<3x30x240xbf16, #tpu.memory_space<vmem>>, vector<1x30x240xbf16>
    %16 = vector.shape_cast %15 : vector<1x30x240xbf16> to vector<30x240xbf16>
    %cst_18 = arith.constant dense<0.000000e+00> : vector<448x240xf32>
    %17 = tpu.matmul %14, %16, %cst_18 {dimension_numbers = #tpu.dot_dimension_numbers<[1], [0], [0], [1], [0, 0, 1, 1], [], []>} : vector<448x30xbf16>, vector<30x240xbf16>, vector<448x240xf32> -> vector<448x240xf32>
    %18 = arith.addf %12, %17 : vector<448x240xf32>
    %c0_19 = arith.constant 0 : index
    %c0_20 = arith.constant 0 : index
    %19 = vector.load %arg3[%c0_19, %c0_20] : memref<1x240xf32, #tpu.memory_space<vmem>>, vector<1x240xf32>
    %20 = vector.broadcast %19 : vector<1x240xf32> to vector<448x240xf32>
    %21 = arith.addf %18, %20 : vector<448x240xf32>
    %cst_21 = arith.constant 0.000000e+00 : f32
    %22 = vector.broadcast %cst_21 : f32 to vector<448x240xf32>
    %23 = arith.maximumf %21, %22 : vector<448x240xf32>
    %24 = arith.truncf %23 : vector<448x240xf32> to vector<448x240xbf16>
    %25 = vector.shape_cast %24 : vector<448x240xbf16> to vector<28x16x240xbf16>
    %c0_22 = arith.constant 0 : index
    %c0_23 = arith.constant 0 : index
    %c0_24 = arith.constant 0 : index
    %26 = vector.load %arg17[%c0_22, %c0_23, %c0_24] : memref<30x16x240xbf16, #tpu.memory_space<vmem>>, vector<1x16x240xbf16>
    %27 = vector.shape_cast %26 : vector<1x16x240xbf16> to vector<16x240xbf16>
    %28 = vector.shape_cast %0 : vector<16x240xbf16> to vector<1x16x240xbf16>
    tpu.vector_store %arg17[%c0_22, %c0_23, %c0_24], %28 {strides = array<i32>} : memref<30x16x240xbf16, #tpu.memory_space<vmem>>, vector<1x16x240xbf16>,
    %c29 = arith.constant 29 : index
    %c0_25 = arith.constant 0 : index
    %c0_26 = arith.constant 0 : index
    %29 = vector.load %arg17[%c29, %c0_25, %c0_26] : memref<30x16x240xbf16, #tpu.memory_space<vmem>>, vector<1x16x240xbf16>
    %30 = vector.shape_cast %29 : vector<1x16x240xbf16> to vector<16x240xbf16>
    %31 = vector.shape_cast %0 : vector<16x240xbf16> to vector<1x16x240xbf16>
    tpu.vector_store %arg17[%c29, %c0_25, %c0_26], %31 {strides = array<i32>} : memref<30x16x240xbf16, #tpu.memory_space<vmem>>, vector<1x16x240xbf16>,
    %c1_27 = arith.constant 1 : index
    %c0_28 = arith.constant 0 : index
    %c0_29 = arith.constant 0 : index
    %32 = vector.load %arg17[%c1_27, %c0_28, %c0_29] : memref<30x16x240xbf16, #tpu.memory_space<vmem>>, vector<28x16x240xbf16>
    tpu.vector_store %arg17[%c1_27, %c0_28, %c0_29], %25 {strides = array<i32>} : memref<30x16x240xbf16, #tpu.memory_space<vmem>>, vector<28x16x240xbf16>,
    %c0_30 = arith.constant 0 : index
    %c0_31 = arith.constant 0 : index
    %c0_32 = arith.constant 0 : index
    %33 = vector.load %arg17[%c0_30, %c0_31, %c0_32] : memref<30x16x240xbf16, #tpu.memory_space<vmem>>, vector<28x16x240xbf16>
    %34 = vector.shape_cast %33 : vector<28x16x240xbf16> to vector<448x240xbf16>
    %c0_33 = arith.constant 0 : index
    %c0_34 = arith.constant 0 : index
    %c0_35 = arith.constant 0 : index
    %35 = vector.load %arg4[%c0_33, %c0_34, %c0_35] : memref<3x240x240xbf16, #tpu.memory_space<vmem>>, vector<1x240x240xbf16>
    %36 = vector.shape_cast %35 : vector<1x240x240xbf16> to vector<240x240xbf16>
    %cst_36 = arith.constant dense<0.000000e+00> : vector<448x240xf32>
    %37 = tpu.matmul %34, %36, %cst_36 {dimension_numbers = #tpu.dot_dimension_numbers<[1], [0], [0], [1], [0, 0, 1, 1], [], []>} : vector<448x240xbf16>, vector<240x240xbf16>, vector<448x240xf32> -> vector<448x240xf32>
    %c1_37 = arith.constant 1 : index
    %c0_38 = arith.constant 0 : index
    %c0_39 = arith.constant 0 : index
    %38 = vector.load %arg17[%c1_37, %c0_38, %c0_39] : memref<30x16x240xbf16, #tpu.memory_space<vmem>>, vector<28x16x240xbf16>
    %39 = vector.shape_cast %38 : vector<28x16x240xbf16> to vector<448x240xbf16>
    %c1_40 = arith.constant 1 : index
    %c0_41 = arith.constant 0 : index
    %c0_42 = arith.constant 0 : index
    %40 = vector.load %arg4[%c1_40, %c0_41, %c0_42] : memref<3x240x240xbf16, #tpu.memory_space<vmem>>, vector<1x240x240xbf16>
    %41 = vector.shape_cast %40 : vector<1x240x240xbf16> to vector<240x240xbf16>
    %cst_43 = arith.constant dense<0.000000e+00> : vector<448x240xf32>
    %42 = tpu.matmul %39, %41, %cst_43 {dimension_numbers = #tpu.dot_dimension_numbers<[1], [0], [0], [1], [0, 0, 1, 1], [], []>} : vector<448x240xbf16>, vector<240x240xbf16>, vector<448x240xf32> -> vector<448x240xf32>
    %43 = arith.addf %37, %42 : vector<448x240xf32>
    %c2_44 = arith.constant 2 : index
    %c0_45 = arith.constant 0 : index
    %c0_46 = arith.constant 0 : index
    %44 = vector.load %arg17[%c2_44, %c0_45, %c0_46] : memref<30x16x240xbf16, #tpu.memory_space<vmem>>, vector<28x16x240xbf16>
    %45 = vector.shape_cast %44 : vector<28x16x240xbf16> to vector<448x240xbf16>
    %c2_47 = arith.constant 2 : index
    %c0_48 = arith.constant 0 : index
    %c0_49 = arith.constant 0 : index
    %46 = vector.load %arg4[%c2_47, %c0_48, %c0_49] : memref<3x240x240xbf16, #tpu.memory_space<vmem>>, vector<1x240x240xbf16>
    %47 = vector.shape_cast %46 : vector<1x240x240xbf16> to vector<240x240xbf16>
    %cst_50 = arith.constant dense<0.000000e+00> : vector<448x240xf32>
    %48 = tpu.matmul %45, %47, %cst_50 {dimension_numbers = #tpu.dot_dimension_numbers<[1], [0], [0], [1], [0, 0, 1, 1], [], []>} : vector<448x240xbf16>, vector<240x240xbf16>, vector<448x240xf32> -> vector<448x240xf32>
    %49 = arith.addf %43, %48 : vector<448x240xf32>
    %c0_51 = arith.constant 0 : index
    %c0_52 = arith.constant 0 : index
    %50 = vector.load %arg5[%c0_51, %c0_52] : memref<1x240xf32, #tpu.memory_space<vmem>>, vector<1x240xf32>
    %51 = vector.broadcast %50 : vector<1x240xf32> to vector<448x240xf32>
    %52 = arith.addf %49, %51 : vector<448x240xf32>
    %cst_53 = arith.constant 0.000000e+00 : f32
    %53 = vector.broadcast %cst_53 : f32 to vector<448x240xf32>
    %54 = arith.maximumf %52, %53 : vector<448x240xf32>
    %55 = arith.truncf %54 : vector<448x240xf32> to vector<448x240xbf16>
    %56 = vector.shape_cast %55 : vector<448x240xbf16> to vector<28x16x240xbf16>
    %57 = vector.shape_cast %56 : vector<28x16x240xbf16> to vector<14x2x16x240xbf16>
    %58 = vector.extract_strided_slice %57 {offsets = [0, 0, 0, 0], sizes = [14, 1, 16, 240], strides = [1, 1, 1, 1]} : vector<14x2x16x240xbf16> to vector<14x1x16x240xbf16>
    %59 = vector.shape_cast %58 : vector<14x1x16x240xbf16> to vector<14x16x240xbf16>
    %60 = vector.extract_strided_slice %57 {offsets = [0, 1, 0, 0], sizes = [14, 1, 16, 240], strides = [1, 1, 1, 1]} : vector<14x2x16x240xbf16> to vector<14x1x16x240xbf16>
    %61 = vector.shape_cast %60 : vector<14x1x16x240xbf16> to vector<14x16x240xbf16>
    %62 = arith.maximumf %59, %61 : vector<14x16x240xbf16>
    %63 = vector.shape_cast %62 : vector<14x16x240xbf16> to vector<224x240xbf16>
    %c0_54 = arith.constant 0 : index
    %c0_55 = arith.constant 0 : index
    %64 = vector.load %arg10[%c0_54, %c0_55] : memref<240x128xbf16, #tpu.memory_space<vmem>>, vector<240x128xbf16>
    %cst_56 = arith.constant dense<0.000000e+00> : vector<224x128xf32>
    %65 = tpu.matmul %63, %64, %cst_56 {dimension_numbers = #tpu.dot_dimension_numbers<[1], [0], [0], [1], [0, 0, 1, 1], [], []>} : vector<224x240xbf16>, vector<240x128xbf16>, vector<224x128xf32> -> vector<224x128xf32>
    %c0_57 = arith.constant 0 : index
    %c0_58 = arith.constant 0 : index
    %66 = vector.load %arg11[%c0_57, %c0_58] : memref<240x128xbf16, #tpu.memory_space<vmem>>, vector<240x128xbf16>
    %cst_59 = arith.constant dense<0.000000e+00> : vector<224x128xf32>
    %67 = tpu.matmul %63, %66, %cst_59 {dimension_numbers = #tpu.dot_dimension_numbers<[1], [0], [0], [1], [0, 0, 1, 1], [], []>} : vector<224x240xbf16>, vector<240x128xbf16>, vector<224x128xf32> -> vector<224x128xf32>
    %68 = arith.maximumf %65, %67 : vector<224x128xf32>
    %69 = arith.truncf %68 : vector<224x128xf32> to vector<224x128xbf16>
    %70 = vector.shape_cast %69 : vector<224x128xbf16> to vector<14x16x128xbf16>
    %c0_60 = arith.constant 0 : index
    %c0_61 = arith.constant 0 : index
    %c0_62 = arith.constant 0 : index
    %71 = vector.load %arg18[%c0_60, %c0_61, %c0_62] : memref<16x16x128xbf16, #tpu.memory_space<vmem>>, vector<1x16x128xbf16>
    %72 = vector.shape_cast %71 : vector<1x16x128xbf16> to vector<16x128xbf16>
    %73 = vector.shape_cast %1 : vector<16x128xbf16> to vector<1x16x128xbf16>
    tpu.vector_store %arg18[%c0_60, %c0_61, %c0_62], %73 {strides = array<i32>} : memref<16x16x128xbf16, #tpu.memory_space<vmem>>, vector<1x16x128xbf16>,
    %c15 = arith.constant 15 : index
    %c0_63 = arith.constant 0 : index
    %c0_64 = arith.constant 0 : index
    %74 = vector.load %arg18[%c15, %c0_63, %c0_64] : memref<16x16x128xbf16, #tpu.memory_space<vmem>>, vector<1x16x128xbf16>
    %75 = vector.shape_cast %74 : vector<1x16x128xbf16> to vector<16x128xbf16>
    %76 = vector.shape_cast %1 : vector<16x128xbf16> to vector<1x16x128xbf16>
    tpu.vector_store %arg18[%c15, %c0_63, %c0_64], %76 {strides = array<i32>} : memref<16x16x128xbf16, #tpu.memory_space<vmem>>, vector<1x16x128xbf16>,
    %c1_65 = arith.constant 1 : index
    %c0_66 = arith.constant 0 : index
    %c0_67 = arith.constant 0 : index
    %77 = vector.load %arg18[%c1_65, %c0_66, %c0_67] : memref<16x16x128xbf16, #tpu.memory_space<vmem>>, vector<14x16x128xbf16>
    tpu.vector_store %arg18[%c1_65, %c0_66, %c0_67], %70 {strides = array<i32>} : memref<16x16x128xbf16, #tpu.memory_space<vmem>>, vector<14x16x128xbf16>,
    %c0_68 = arith.constant 0 : index
    %c0_69 = arith.constant 0 : index
    %c0_70 = arith.constant 0 : index
    %78 = vector.load %arg18[%c0_68, %c0_69, %c0_70] : memref<16x16x128xbf16, #tpu.memory_space<vmem>>, vector<14x16x128xbf16>
    %79 = vector.shape_cast %78 : vector<14x16x128xbf16> to vector<224x128xbf16>
    %c0_71 = arith.constant 0 : index
    %c0_72 = arith.constant 0 : index
    %c0_73 = arith.constant 0 : index
    %80 = vector.load %arg6[%c0_71, %c0_72, %c0_73] : memref<3x128x128xbf16, #tpu.memory_space<vmem>>, vector<1x128x128xbf16>
    %81 = vector.shape_cast %80 : vector<1x128x128xbf16> to vector<128x128xbf16>
    %cst_74 = arith.constant dense<0.000000e+00> : vector<224x128xf32>
    %82 = tpu.matmul %79, %81, %cst_74 {dimension_numbers = #tpu.dot_dimension_numbers<[1], [0], [0], [1], [0, 0, 1, 1], [], []>} : vector<224x128xbf16>, vector<128x128xbf16>, vector<224x128xf32> -> vector<224x128xf32>
    %c1_75 = arith.constant 1 : index
    %c0_76 = arith.constant 0 : index
    %c0_77 = arith.constant 0 : index
    %83 = vector.load %arg18[%c1_75, %c0_76, %c0_77] : memref<16x16x128xbf16, #tpu.memory_space<vmem>>, vector<14x16x128xbf16>
    %84 = vector.shape_cast %83 : vector<14x16x128xbf16> to vector<224x128xbf16>
    %c1_78 = arith.constant 1 : index
    %c0_79 = arith.constant 0 : index
    %c0_80 = arith.constant 0 : index
    %85 = vector.load %arg6[%c1_78, %c0_79, %c0_80] : memref<3x128x128xbf16, #tpu.memory_space<vmem>>, vector<1x128x128xbf16>
    %86 = vector.shape_cast %85 : vector<1x128x128xbf16> to vector<128x128xbf16>
    %cst_81 = arith.constant dense<0.000000e+00> : vector<224x128xf32>
    %87 = tpu.matmul %84, %86, %cst_81 {dimension_numbers = #tpu.dot_dimension_numbers<[1], [0], [0], [1], [0, 0, 1, 1], [], []>} : vector<224x128xbf16>, vector<128x128xbf16>, vector<224x128xf32> -> vector<224x128xf32>
    %88 = arith.addf %82, %87 : vector<224x128xf32>
    %c2_82 = arith.constant 2 : index
    %c0_83 = arith.constant 0 : index
    %c0_84 = arith.constant 0 : index
    %89 = vector.load %arg18[%c2_82, %c0_83, %c0_84] : memref<16x16x128xbf16, #tpu.memory_space<vmem>>, vector<14x16x128xbf16>
    %90 = vector.shape_cast %89 : vector<14x16x128xbf16> to vector<224x128xbf16>
    %c2_85 = arith.constant 2 : index
    %c0_86 = arith.constant 0 : index
    %c0_87 = arith.constant 0 : index
    %91 = vector.load %arg6[%c2_85, %c0_86, %c0_87] : memref<3x128x128xbf16, #tpu.memory_space<vmem>>, vector<1x128x128xbf16>
    %92 = vector.shape_cast %91 : vector<1x128x128xbf16> to vector<128x128xbf16>
    %cst_88 = arith.constant dense<0.000000e+00> : vector<224x128xf32>
    %93 = tpu.matmul %90, %92, %cst_88 {dimension_numbers = #tpu.dot_dimension_numbers<[1], [0], [0], [1], [0, 0, 1, 1], [], []>} : vector<224x128xbf16>, vector<128x128xbf16>, vector<224x128xf32> -> vector<224x128xf32>
    %94 = arith.addf %88, %93 : vector<224x128xf32>
    %c0_89 = arith.constant 0 : index
    %c0_90 = arith.constant 0 : index
    %95 = vector.load %arg7[%c0_89, %c0_90] : memref<1x128xf32, #tpu.memory_space<vmem>>, vector<1x128xf32>
    %96 = vector.broadcast %95 : vector<1x128xf32> to vector<224x128xf32>
    %97 = arith.addf %94, %96 : vector<224x128xf32>
    %cst_91 = arith.constant 0.000000e+00 : f32
    %98 = vector.broadcast %cst_91 : f32 to vector<224x128xf32>
    %99 = arith.maximumf %97, %98 : vector<224x128xf32>
    %100 = arith.truncf %99 : vector<224x128xf32> to vector<224x128xbf16>
    %101 = vector.shape_cast %100 : vector<224x128xbf16> to vector<14x16x128xbf16>
    %c0_92 = arith.constant 0 : index
    %c0_93 = arith.constant 0 : index
    %c0_94 = arith.constant 0 : index
    %102 = vector.load %arg19[%c0_92, %c0_93, %c0_94] : memref<16x16x128xbf16, #tpu.memory_space<vmem>>, vector<1x16x128xbf16>
    %103 = vector.shape_cast %102 : vector<1x16x128xbf16> to vector<16x128xbf16>
    %104 = vector.shape_cast %1 : vector<16x128xbf16> to vector<1x16x128xbf16>
    tpu.vector_store %arg19[%c0_92, %c0_93, %c0_94], %104 {strides = array<i32>} : memref<16x16x128xbf16, #tpu.memory_space<vmem>>, vector<1x16x128xbf16>,
    %c15_95 = arith.constant 15 : index
    %c0_96 = arith.constant 0 : index
    %c0_97 = arith.constant 0 : index
    %105 = vector.load %arg19[%c15_95, %c0_96, %c0_97] : memref<16x16x128xbf16, #tpu.memory_space<vmem>>, vector<1x16x128xbf16>
    %106 = vector.shape_cast %105 : vector<1x16x128xbf16> to vector<16x128xbf16>
    %107 = vector.shape_cast %1 : vector<16x128xbf16> to vector<1x16x128xbf16>
    tpu.vector_store %arg19[%c15_95, %c0_96, %c0_97], %107 {strides = array<i32>} : memref<16x16x128xbf16, #tpu.memory_space<vmem>>, vector<1x16x128xbf16>,
    %c1_98 = arith.constant 1 : index
    %c0_99 = arith.constant 0 : index
    %c0_100 = arith.constant 0 : index
    %108 = vector.load %arg19[%c1_98, %c0_99, %c0_100] : memref<16x16x128xbf16, #tpu.memory_space<vmem>>, vector<14x16x128xbf16>
    tpu.vector_store %arg19[%c1_98, %c0_99, %c0_100], %101 {strides = array<i32>} : memref<16x16x128xbf16, #tpu.memory_space<vmem>>, vector<14x16x128xbf16>,
    %c0_101 = arith.constant 0 : index
    %c0_102 = arith.constant 0 : index
    %c0_103 = arith.constant 0 : index
    %109 = vector.load %arg19[%c0_101, %c0_102, %c0_103] : memref<16x16x128xbf16, #tpu.memory_space<vmem>>, vector<14x16x128xbf16>
    %110 = vector.shape_cast %109 : vector<14x16x128xbf16> to vector<224x128xbf16>
    %c0_104 = arith.constant 0 : index
    %c0_105 = arith.constant 0 : index
    %c0_106 = arith.constant 0 : index
    %111 = vector.load %arg8[%c0_104, %c0_105, %c0_106] : memref<3x128x128xbf16, #tpu.memory_space<vmem>>, vector<1x128x128xbf16>
    %112 = vector.shape_cast %111 : vector<1x128x128xbf16> to vector<128x128xbf16>
    %cst_107 = arith.constant dense<0.000000e+00> : vector<224x128xf32>
    %113 = tpu.matmul %110, %112, %cst_107 {dimension_numbers = #tpu.dot_dimension_numbers<[1], [0], [0], [1], [0, 0, 1, 1], [], []>} : vector<224x128xbf16>, vector<128x128xbf16>, vector<224x128xf32> -> vector<224x128xf32>
    %c1_108 = arith.constant 1 : index
    %c0_109 = arith.constant 0 : index
    %c0_110 = arith.constant 0 : index
    %114 = vector.load %arg19[%c1_108, %c0_109, %c0_110] : memref<16x16x128xbf16, #tpu.memory_space<vmem>>, vector<14x16x128xbf16>
    %115 = vector.shape_cast %114 : vector<14x16x128xbf16> to vector<224x128xbf16>
    %c1_111 = arith.constant 1 : index
    %c0_112 = arith.constant 0 : index
    %c0_113 = arith.constant 0 : index
    %116 = vector.load %arg8[%c1_111, %c0_112, %c0_113] : memref<3x128x128xbf16, #tpu.memory_space<vmem>>, vector<1x128x128xbf16>
    %117 = vector.shape_cast %116 : vector<1x128x128xbf16> to vector<128x128xbf16>
    %cst_114 = arith.constant dense<0.000000e+00> : vector<224x128xf32>
    %118 = tpu.matmul %115, %117, %cst_114 {dimension_numbers = #tpu.dot_dimension_numbers<[1], [0], [0], [1], [0, 0, 1, 1], [], []>} : vector<224x128xbf16>, vector<128x128xbf16>, vector<224x128xf32> -> vector<224x128xf32>
    %119 = arith.addf %113, %118 : vector<224x128xf32>
    %c2_115 = arith.constant 2 : index
    %c0_116 = arith.constant 0 : index
    %c0_117 = arith.constant 0 : index
    %120 = vector.load %arg19[%c2_115, %c0_116, %c0_117] : memref<16x16x128xbf16, #tpu.memory_space<vmem>>, vector<14x16x128xbf16>
    %121 = vector.shape_cast %120 : vector<14x16x128xbf16> to vector<224x128xbf16>
    %c2_118 = arith.constant 2 : index
    %c0_119 = arith.constant 0 : index
    %c0_120 = arith.constant 0 : index
    %122 = vector.load %arg8[%c2_118, %c0_119, %c0_120] : memref<3x128x128xbf16, #tpu.memory_space<vmem>>, vector<1x128x128xbf16>
    %123 = vector.shape_cast %122 : vector<1x128x128xbf16> to vector<128x128xbf16>
    %cst_121 = arith.constant dense<0.000000e+00> : vector<224x128xf32>
    %124 = tpu.matmul %121, %123, %cst_121 {dimension_numbers = #tpu.dot_dimension_numbers<[1], [0], [0], [1], [0, 0, 1, 1], [], []>} : vector<224x128xbf16>, vector<128x128xbf16>, vector<224x128xf32> -> vector<224x128xf32>
    %125 = arith.addf %119, %124 : vector<224x128xf32>
    %c0_122 = arith.constant 0 : index
    %c0_123 = arith.constant 0 : index
    %126 = vector.load %arg9[%c0_122, %c0_123] : memref<1x128xf32, #tpu.memory_space<vmem>>, vector<1x128xf32>
    %127 = vector.broadcast %126 : vector<1x128xf32> to vector<224x128xf32>
    %128 = arith.addf %125, %127 : vector<224x128xf32>
    %cst_124 = arith.constant 0.000000e+00 : f32
    %129 = vector.broadcast %cst_124 : f32 to vector<224x128xf32>
    %130 = arith.maximumf %128, %129 : vector<224x128xf32>
    %131 = arith.truncf %130 : vector<224x128xf32> to vector<224x128xbf16>
    %132 = vector.shape_cast %131 : vector<224x128xbf16> to vector<14x16x128xbf16>
    %133 = vector.shape_cast %132 : vector<14x16x128xbf16> to vector<7x2x16x128xbf16>
    %134 = vector.extract_strided_slice %133 {offsets = [0, 0, 0, 0], sizes = [7, 1, 16, 128], strides = [1, 1, 1, 1]} : vector<7x2x16x128xbf16> to vector<7x1x16x128xbf16>
    %135 = vector.shape_cast %134 : vector<7x1x16x128xbf16> to vector<7x16x128xbf16>
    %136 = vector.extract_strided_slice %133 {offsets = [0, 1, 0, 0], sizes = [7, 1, 16, 128], strides = [1, 1, 1, 1]} : vector<7x2x16x128xbf16> to vector<7x1x16x128xbf16>
    %137 = vector.shape_cast %136 : vector<7x1x16x128xbf16> to vector<7x16x128xbf16>
    %138 = arith.maximumf %135, %137 : vector<7x16x128xbf16>
    %139 = vector.shape_cast %138 : vector<7x16x128xbf16> to vector<112x128xbf16>
    %c0_125 = arith.constant 0 : index
    %c0_126 = arith.constant 0 : index
    %140 = vector.load %arg12[%c0_125, %c0_126] : memref<128x56xbf16, #tpu.memory_space<vmem>>, vector<128x56xbf16>
    %cst_127 = arith.constant dense<0.000000e+00> : vector<112x56xf32>
    %141 = tpu.matmul %139, %140, %cst_127 {dimension_numbers = #tpu.dot_dimension_numbers<[1], [0], [0], [1], [0, 0, 1, 1], [], []>} : vector<112x128xbf16>, vector<128x56xbf16>, vector<112x56xf32> -> vector<112x56xf32>
    %c0_128 = arith.constant 0 : index
    %c0_129 = arith.constant 0 : index
    %142 = vector.load %arg13[%c0_128, %c0_129] : memref<128x56xbf16, #tpu.memory_space<vmem>>, vector<128x56xbf16>
    %cst_130 = arith.constant dense<0.000000e+00> : vector<112x56xf32>
    %143 = tpu.matmul %139, %142, %cst_130 {dimension_numbers = #tpu.dot_dimension_numbers<[1], [0], [0], [1], [0, 0, 1, 1], [], []>} : vector<112x128xbf16>, vector<128x56xbf16>, vector<112x56xf32> -> vector<112x56xf32>
    %144 = arith.maximumf %141, %143 : vector<112x56xf32>
    %145 = arith.truncf %144 : vector<112x56xf32> to vector<112x56xbf16>
    %146 = vector.shape_cast %145 : vector<112x56xbf16> to vector<7x16x56xbf16>
    %c0_131 = arith.constant 0 : index
    %c0_132 = arith.constant 0 : index
    %147 = vector.load %arg15[%c0_131, %c0_132] : memref<1x128xf32, #tpu.memory_space<vmem>>, vector<1x128xf32>
    %148 = vector.extract_strided_slice %146 {offsets = [0, 0, 0], sizes = [1, 16, 56], strides = [1, 1, 1]} : vector<7x16x56xbf16> to vector<1x16x56xbf16>
    %149 = vector.shape_cast %148 : vector<1x16x56xbf16> to vector<16x56xbf16>
    %c0_133 = arith.constant 0 : index
    %c0_134 = arith.constant 0 : index
    %c0_135 = arith.constant 0 : index
    %150 = vector.load %arg14[%c0_133, %c0_134, %c0_135] : memref<7x56x128xbf16, #tpu.memory_space<vmem>>, vector<1x56x128xbf16>
    %151 = vector.shape_cast %150 : vector<1x56x128xbf16> to vector<56x128xbf16>
    %cst_136 = arith.constant dense<0.000000e+00> : vector<16x128xf32>
    %152 = tpu.matmul %149, %151, %cst_136 {dimension_numbers = #tpu.dot_dimension_numbers<[1], [0], [0], [1], [0, 0, 1, 1], [], []>} : vector<16x56xbf16>, vector<56x128xbf16>, vector<16x128xf32> -> vector<16x128xf32>
    %153 = vector.broadcast %147 : vector<1x128xf32> to vector<16x128xf32>
    %154 = arith.addf %153, %152 : vector<16x128xf32>
    %155 = vector.extract_strided_slice %146 {offsets = [1, 0, 0], sizes = [1, 16, 56], strides = [1, 1, 1]} : vector<7x16x56xbf16> to vector<1x16x56xbf16>
    %156 = vector.shape_cast %155 : vector<1x16x56xbf16> to vector<16x56xbf16>
    %c1_137 = arith.constant 1 : index
    %c0_138 = arith.constant 0 : index
    %c0_139 = arith.constant 0 : index
    %157 = vector.load %arg14[%c1_137, %c0_138, %c0_139] : memref<7x56x128xbf16, #tpu.memory_space<vmem>>, vector<1x56x128xbf16>
    %158 = vector.shape_cast %157 : vector<1x56x128xbf16> to vector<56x128xbf16>
    %cst_140 = arith.constant dense<0.000000e+00> : vector<16x128xf32>
    %159 = tpu.matmul %156, %158, %cst_140 {dimension_numbers = #tpu.dot_dimension_numbers<[1], [0], [0], [1], [0, 0, 1, 1], [], []>} : vector<16x56xbf16>, vector<56x128xbf16>, vector<16x128xf32> -> vector<16x128xf32>
    %160 = arith.addf %154, %159 : vector<16x128xf32>
    %161 = vector.extract_strided_slice %146 {offsets = [2, 0, 0], sizes = [1, 16, 56], strides = [1, 1, 1]} : vector<7x16x56xbf16> to vector<1x16x56xbf16>
    %162 = vector.shape_cast %161 : vector<1x16x56xbf16> to vector<16x56xbf16>
    %c2_141 = arith.constant 2 : index
    %c0_142 = arith.constant 0 : index
    %c0_143 = arith.constant 0 : index
    %163 = vector.load %arg14[%c2_141, %c0_142, %c0_143] : memref<7x56x128xbf16, #tpu.memory_space<vmem>>, vector<1x56x128xbf16>
    %164 = vector.shape_cast %163 : vector<1x56x128xbf16> to vector<56x128xbf16>
    %cst_144 = arith.constant dense<0.000000e+00> : vector<16x128xf32>
    %165 = tpu.matmul %162, %164, %cst_144 {dimension_numbers = #tpu.dot_dimension_numbers<[1], [0], [0], [1], [0, 0, 1, 1], [], []>} : vector<16x56xbf16>, vector<56x128xbf16>, vector<16x128xf32> -> vector<16x128xf32>
    %166 = arith.addf %160, %165 : vector<16x128xf32>
    %167 = vector.extract_strided_slice %146 {offsets = [3, 0, 0], sizes = [1, 16, 56], strides = [1, 1, 1]} : vector<7x16x56xbf16> to vector<1x16x56xbf16>
    %168 = vector.shape_cast %167 : vector<1x16x56xbf16> to vector<16x56xbf16>
    %c3 = arith.constant 3 : index
    %c0_145 = arith.constant 0 : index
    %c0_146 = arith.constant 0 : index
    %169 = vector.load %arg14[%c3, %c0_145, %c0_146] : memref<7x56x128xbf16, #tpu.memory_space<vmem>>, vector<1x56x128xbf16>
    %170 = vector.shape_cast %169 : vector<1x56x128xbf16> to vector<56x128xbf16>
    %cst_147 = arith.constant dense<0.000000e+00> : vector<16x128xf32>
    %171 = tpu.matmul %168, %170, %cst_147 {dimension_numbers = #tpu.dot_dimension_numbers<[1], [0], [0], [1], [0, 0, 1, 1], [], []>} : vector<16x56xbf16>, vector<56x128xbf16>, vector<16x128xf32> -> vector<16x128xf32>
    %172 = arith.addf %166, %171 : vector<16x128xf32>
    %173 = vector.extract_strided_slice %146 {offsets = [4, 0, 0], sizes = [1, 16, 56], strides = [1, 1, 1]} : vector<7x16x56xbf16> to vector<1x16x56xbf16>
    %174 = vector.shape_cast %173 : vector<1x16x56xbf16> to vector<16x56xbf16>
    %c4 = arith.constant 4 : index
    %c0_148 = arith.constant 0 : index
    %c0_149 = arith.constant 0 : index
    %175 = vector.load %arg14[%c4, %c0_148, %c0_149] : memref<7x56x128xbf16, #tpu.memory_space<vmem>>, vector<1x56x128xbf16>
    %176 = vector.shape_cast %175 : vector<1x56x128xbf16> to vector<56x128xbf16>
    %cst_150 = arith.constant dense<0.000000e+00> : vector<16x128xf32>
    %177 = tpu.matmul %174, %176, %cst_150 {dimension_numbers = #tpu.dot_dimension_numbers<[1], [0], [0], [1], [0, 0, 1, 1], [], []>} : vector<16x56xbf16>, vector<56x128xbf16>, vector<16x128xf32> -> vector<16x128xf32>
    %178 = arith.addf %172, %177 : vector<16x128xf32>
    %179 = vector.extract_strided_slice %146 {offsets = [5, 0, 0], sizes = [1, 16, 56], strides = [1, 1, 1]} : vector<7x16x56xbf16> to vector<1x16x56xbf16>
    %180 = vector.shape_cast %179 : vector<1x16x56xbf16> to vector<16x56xbf16>
    %c5 = arith.constant 5 : index
    %c0_151 = arith.constant 0 : index
    %c0_152 = arith.constant 0 : index
    %181 = vector.load %arg14[%c5, %c0_151, %c0_152] : memref<7x56x128xbf16, #tpu.memory_space<vmem>>, vector<1x56x128xbf16>
    %182 = vector.shape_cast %181 : vector<1x56x128xbf16> to vector<56x128xbf16>
    %cst_153 = arith.constant dense<0.000000e+00> : vector<16x128xf32>
    %183 = tpu.matmul %180, %182, %cst_153 {dimension_numbers = #tpu.dot_dimension_numbers<[1], [0], [0], [1], [0, 0, 1, 1], [], []>} : vector<16x56xbf16>, vector<56x128xbf16>, vector<16x128xf32> -> vector<16x128xf32>
    %184 = arith.addf %178, %183 : vector<16x128xf32>
    %185 = vector.extract_strided_slice %146 {offsets = [6, 0, 0], sizes = [1, 16, 56], strides = [1, 1, 1]} : vector<7x16x56xbf16> to vector<1x16x56xbf16>
    %186 = vector.shape_cast %185 : vector<1x16x56xbf16> to vector<16x56xbf16>
    %c6 = arith.constant 6 : index
    %c0_154 = arith.constant 0 : index
    %c0_155 = arith.constant 0 : index
    %187 = vector.load %arg14[%c6, %c0_154, %c0_155] : memref<7x56x128xbf16, #tpu.memory_space<vmem>>, vector<1x56x128xbf16>
    %188 = vector.shape_cast %187 : vector<1x56x128xbf16> to vector<56x128xbf16>
    %cst_156 = arith.constant dense<0.000000e+00> : vector<16x128xf32>
    %189 = tpu.matmul %186, %188, %cst_156 {dimension_numbers = #tpu.dot_dimension_numbers<[1], [0], [0], [1], [0, 0, 1, 1], [], []>} : vector<16x56xbf16>, vector<56x128xbf16>, vector<16x128xf32> -> vector<16x128xf32>
    %190 = arith.addf %184, %189 : vector<16x128xf32>
    %c0_157 = arith.constant 0 : index
    %c0_158 = arith.constant 0 : index
    %191 = vector.load %arg16[%c0_157, %c0_158] : memref<16x128xf32, #tpu.memory_space<vmem>>, vector<16x128xf32>
    tpu.vector_store %arg16[%c0_157, %c0_158], %190 {strides = array<i32>} : memref<16x128xf32, #tpu.memory_space<vmem>>, vector<16x128xf32>,
    return
  }
  func.func @transform_0(%arg0: i32) -> (i32, i32, i32) {
    %c0_i32 = arith.constant 0 : i32
    %c0_i32_0 = arith.constant 0 : i32
    %c0_i32_1 = arith.constant 0 : i32
    return %c0_i32, %arg0, %c0_i32_0 : i32, i32, i32
  }
  func.func @transform_1(%arg0: i32) -> (i32, i32, i32) {
    %c0_i32 = arith.constant 0 : i32
    %c0_i32_0 = arith.constant 0 : i32
    %c0_i32_1 = arith.constant 0 : i32
    %c0_i32_2 = arith.constant 0 : i32
    return %c0_i32, %c0_i32_0, %c0_i32_1 : i32, i32, i32
  }
  func.func @transform_2(%arg0: i32) -> (i32, i32) {
    %c0_i32 = arith.constant 0 : i32
    %c0_i32_0 = arith.constant 0 : i32
    %c0_i32_1 = arith.constant 0 : i32
    return %c0_i32, %c0_i32_0 : i32, i32
  }
  func.func @transform_3(%arg0: i32) -> (i32, i32, i32) {
    %c0_i32 = arith.constant 0 : i32
    %c0_i32_0 = arith.constant 0 : i32
    %c0_i32_1 = arith.constant 0 : i32
    %c0_i32_2 = arith.constant 0 : i32
    return %c0_i32, %c0_i32_0, %c0_i32_1 : i32, i32, i32
  }
  func.func @transform_4(%arg0: i32) -> (i32, i32) {
    %c0_i32 = arith.constant 0 : i32
    %c0_i32_0 = arith.constant 0 : i32
    %c0_i32_1 = arith.constant 0 : i32
    return %c0_i32, %c0_i32_0 : i32, i32
  }
  func.func @transform_5(%arg0: i32) -> (i32, i32, i32) {
    %c0_i32 = arith.constant 0 : i32
    %c0_i32_0 = arith.constant 0 : i32
    %c0_i32_1 = arith.constant 0 : i32
    %c0_i32_2 = arith.constant 0 : i32
    return %c0_i32, %c0_i32_0, %c0_i32_1 : i32, i32, i32
  }
  func.func @transform_6(%arg0: i32) -> (i32, i32) {
    %c0_i32 = arith.constant 0 : i32
    %c0_i32_0 = arith.constant 0 : i32
    %c0_i32_1 = arith.constant 0 : i32
    return %c0_i32, %c0_i32_0 : i32, i32
  }
  func.func @transform_7(%arg0: i32) -> (i32, i32, i32) {
    %c0_i32 = arith.constant 0 : i32
    %c0_i32_0 = arith.constant 0 : i32
    %c0_i32_1 = arith.constant 0 : i32
    %c0_i32_2 = arith.constant 0 : i32
    return %c0_i32, %c0_i32_0, %c0_i32_1 : i32, i32, i32
  }
  func.func @transform_8(%arg0: i32) -> (i32, i32) {
    %c0_i32 = arith.constant 0 : i32
    %c0_i32_0 = arith.constant 0 : i32
    %c0_i32_1 = arith.constant 0 : i32
    return %c0_i32, %c0_i32_0 : i32, i32
  }
  func.func @transform_9(%arg0: i32) -> (i32, i32) {
    %c0_i32 = arith.constant 0 : i32
    %c0_i32_0 = arith.constant 0 : i32
    %c0_i32_1 = arith.constant 0 : i32
    return %c0_i32, %c0_i32_0 : i32, i32
  }
  func.func @transform_10(%arg0: i32) -> (i32, i32) {
    %c0_i32 = arith.constant 0 : i32
    %c0_i32_0 = arith.constant 0 : i32
    %c0_i32_1 = arith.constant 0 : i32
    return %c0_i32, %c0_i32_0 : i32, i32
  }
  func.func @transform_11(%arg0: i32) -> (i32, i32) {
    %c0_i32 = arith.constant 0 : i32
    %c0_i32_0 = arith.constant 0 : i32
    %c0_i32_1 = arith.constant 0 : i32
    return %c0_i32, %c0_i32_0 : i32, i32
  }
  func.func @transform_12(%arg0: i32) -> (i32, i32) {
    %c0_i32 = arith.constant 0 : i32
    %c0_i32_0 = arith.constant 0 : i32
    %c0_i32_1 = arith.constant 0 : i32
    return %c0_i32, %c0_i32_0 : i32, i32
  }
  func.func @transform_13(%arg0: i32) -> (i32, i32, i32) {
    %c0_i32 = arith.constant 0 : i32
    %c0_i32_0 = arith.constant 0 : i32
    %c0_i32_1 = arith.constant 0 : i32
    %c0_i32_2 = arith.constant 0 : i32
    return %c0_i32, %c0_i32_0, %c0_i32_1 : i32, i32, i32
  }
  func.func @transform_14(%arg0: i32) -> (i32, i32) {
    %c0_i32 = arith.constant 0 : i32
    %c0_i32_0 = arith.constant 0 : i32
    %c0_i32_1 = arith.constant 0 : i32
    return %c0_i32, %c0_i32_0 : i32, i32
  }
  func.func @transform_15(%arg0: i32) -> (i32, i32) {
    %c0_i32 = arith.constant 0 : i32
    %c0_i32_0 = arith.constant 0 : i32
    return %arg0, %c0_i32 : i32, i32
  }
}

</mosaic_0001>

<bundles_post_ra>
// kernel: mnist_model_v2_forward.1
= control target key start
LH: loop header
LB: loop body
LE: loop exit
PB: predicated region body
PF: predicated region fallthrough
CT: control target
= control target key end

     0   :  { %s11150_s18 = smov 0   ;;  %s11152_s19 = smov 0   ;;  %s13212_s0 = inlined_call_operand.vmem [shape: bf16[30,32,30], index: 0, kind: input, shape index: {}]   ;;  %s13213_s1 = inlined_call_operand.vmem [shape: bf16[3,30,240], index: 1, kind: input, shape index: {}]   ;;  %s13214_s2 = inlined_call_operand.vmem [shape: f32[1,240], index: 2, kind: input, shape index: {}]   ;;  %s13215_s3 = inlined_call_operand.vmem [shape: bf16[3,240,240], index: 3, kind: input, shape index: {}]   ;;  %s13216_s4 = inlined_call_operand.vmem [shape: f32[1,240], index: 4, kind: input, shape index: {}]   ;;  %s13217_s5 = inlined_call_operand.vmem [shape: bf16[3,128,128], index: 5, kind: input, shape index: {}]   ;;  %s13218_s6 = inlined_call_operand.vmem [shape: f32[1,128], index: 6, kind: input, shape index: {}]   ;;  %s13219_s7 = inlined_call_operand.vmem [shape: bf16[3,128,128], index: 7, kind: input, shape index: {}]   ;;  %s13220_s8 = inlined_call_operand.vmem [shape: f32[1,128], index: 8, kind: input, shape index: {}]   ;;  %s13221_s9 = inlined_call_operand.vmem [shape: bf16[240,128], index: 9, kind: input, shape index: {}]   ;;  %s13222_s10 = inlined_call_operand.vmem [shape: bf16[240,128], index: 10, kind: input, shape index: {}]   ;;  %s13223_s11 = inlined_call_operand.vmem [shape: bf16[128,56], index: 11, kind: input, shape index: {}]   ;;  %s13224_s12 = inlined_call_operand.vmem [shape: bf16[128,56], index: 12, kind: input, shape index: {}]   ;;  %s13225_s13 = inlined_call_operand.vmem [shape: bf16[7,56,128], index: 13, kind: input, shape index: {}]   ;;  %s13226_s14 = inlined_call_operand.vmem [shape: f32[1,128], index: 14, kind: input, shape index: {}]   ;;  %s13227_s15 = inlined_call_operand.vmem [shape: f32[32,128], index: 15, kind: output, shape index: {}]  }
   0x1   :  { %s11154_s20 = smov 0  }
   0x2 LB: > { %s8602_s21 = sadd.s32 4294967295, %s11065_s20   ;;  %s11167_s22 = sadd.s32 1, %s11065_s20   ;;  %s11065_s20 = sphi %s11154_s20, %s13230_s20   ;;  %s11061_s19 = sphi %s11152_s19, %s13229_s19   ;;  %s11057_s18 = sphi %s11150_s18, %s13228_s18  }
   0x3   : > { %s29_s23 = ssub.s32 %s11065_s20, %s11167_s22  ;;  %s32_s24 = sadd.s32 1, %s11061_s19 }
   0x4   : > { %p30_p0 = scmp.eq.s32.totalorder %s29_s23, 0  ;;  %p39_p1 = scmp.ne.s32.totalorder %s11061_s19, %s11057_s18 }
   0x5   : > { %p40_p2 = scmp.eq.s32.totalorder %s11065_s20, 0  ;;  %p8605_p4 = scmp.ge.s32.totalorder %s11065_s20, 2 }
   0x6   : > { %s11176_s25 = scalar_select %p30_p0, %s11061_s19, %s32_s24  }
   0x7   : > { %p41_p3 = por %p40_p2, %p39_p1  ;;  %427 = sbr.rel (%p8605_p4) target bundleno = 33 (0x21), region = 72 }
   0xe   : > { %430 = sbr.rel (!%p41_p3) target bundleno = 33 (0x21), region = 76  ;;  %s432_s26 = sand.u32 (%p41_p3), 1, %s11061_s19  }
   0xf   : > { %s9416_s27 = sshll.u32 (%p41_p3), %s11065_s20, 3  ;;  %s10652_s28 = smul.u32 (%p41_p3), 240, %s432_s26 }
  0x10   : > { %s11184_s16 = scalar_lea.vmem (%p41_p3), %s13212_s0, %s9416_s27 }
  0x11   : > { %v453_v0 = vld [vmem:[%s11184_s16] sm:$0xff] (%p41_p3)   ;;  %v457_v1 = vld [vmem:[%s11184_s16 + $0x10] sm:$0xff] (%p41_p3)   ;;  %s11192_s17 = scalar_lea.vmem (%p41_p3), [#allocation5], %s10652_s28 }
  0x12   : > { %v461_v2 = vld [vmem:[%s11184_s16 + $0x20] sm:$0xff] (%p41_p3)   ;;  %v465_v3 = vld [vmem:[%s11184_s16 + $0x30] sm:$0xff] (%p41_p3)   ;;  %454 = vst [vmem:[%s11192_s17] sm:$0xff] (%p41_p3), %v453_v0   ;;  %458 = vst [vmem:[%s11192_s17 + $0x8] sm:$0xff] (%p41_p3), %v457_v1  }
  0x13   : > { %v469_v4 = vld [vmem:[%s11184_s16 + $0x40] sm:$0xff] (%p41_p3)   ;;  %v473_v5 = vld [vmem:[%s11184_s16 + $0x50] sm:$0xff] (%p41_p3)   ;;  %462 = vst [vmem:[%s11192_s17 + $0x10] sm:$0xff] (%p41_p3), %v461_v2   ;;  %466 = vst [vmem:[%s11192_s17 + $0x18] sm:$0xff] (%p41_p3), %v465_v3  }
  0x14   : > { %470 = vst [vmem:[%s11192_s17 + $0x20] sm:$0xff] (%p41_p3), %v469_v4   ;;  %474 = vst [vmem:[%s11192_s17 + $0x28] sm:$0xff] (%p41_p3), %v473_v5   ;;  %v477_v6 = vld [vmem:[%s11184_s16 + $0x60] sm:$0xff] (%p41_p3)   ;;  %v481_v7 = vld [vmem:[%s11184_s16 + $0x70] sm:$0xff] (%p41_p3)  }
  0x15   : > { %v485_v8 = vld [vmem:[%s11184_s16 + $0x80] sm:$0xff]   ;;  %478 = vst [vmem:[%s11192_s17 + $0x30] sm:$0xff] %v477_v6   ;;  %482 = vst [vmem:[%s11192_s17 + $0x38] sm:$0xff] %v481_v7   ;;  %v489_v9 = vld [vmem:[%s11184_s16 + $0x90] sm:$0xff]  }
  0x16   : > { %486 = vst [vmem:[%s11192_s17 + $0x40] sm:$0xff] %v485_v8   ;;  %v493_v10 = vld [vmem:[%s11184_s16 + $0xa0] sm:$0xff]   ;;  %v497_v11 = vld [vmem:[%s11184_s16 + $0xb0] sm:$0xff]   ;;  %490 = vst [vmem:[%s11192_s17 + $0x48] sm:$0xff] %v489_v9  }
  0x17   : > { %494 = vst [vmem:[%s11192_s17 + $0x50] sm:$0xff] %v493_v10   ;;  %498 = vst [vmem:[%s11192_s17 + $0x58] sm:$0xff] %v497_v11   ;;  %v501_v12 = vld [vmem:[%s11184_s16 + $0xc0] sm:$0xff]   ;;  %v505_v13 = vld [vmem:[%s11184_s16 + $0xd0] sm:$0xff]  }
  0x18   : > { %v509_v14 = vld [vmem:[%s11184_s16 + $0xe0] sm:$0xff]   ;;  %502 = vst [vmem:[%s11192_s17 + $0x60] sm:$0xff] %v501_v12   ;;  %506 = vst [vmem:[%s11192_s17 + $0x68] sm:$0xff] %v505_v13   ;;  %v513_v15 = vld [vmem:[%s11184_s16 + $0xf0] sm:$0xff]  }
  0x19   : > { %510 = vst [vmem:[%s11192_s17 + $0x70] sm:$0xff] %v509_v14   ;;  %v517_v16 = vld [vmem:[%s11184_s16 + $0x100] sm:$0xff]   ;;  %v521_v17 = vld [vmem:[%s11184_s16 + $0x110] sm:$0xff]   ;;  %514 = vst [vmem:[%s11192_s17 + $0x78] sm:$0xff] %v513_v15  }
  0x1a   : > { %518 = vst [vmem:[%s11192_s17 + $0x80] sm:$0xff] %v517_v16   ;;  %522 = vst [vmem:[%s11192_s17 + $0x88] sm:$0xff] %v521_v17   ;;  %v525_v18 = vld [vmem:[%s11184_s16 + $0x120] sm:$0xff]   ;;  %v529_v19 = vld [vmem:[%s11184_s16 + $0x130] sm:$0xff]  }
  0x1b   : > { %v533_v20 = vld [vmem:[%s11184_s16 + $0x140] sm:$0xff]   ;;  %526 = vst [vmem:[%s11192_s17 + $0x90] sm:$0xff] %v525_v18   ;;  %530 = vst [vmem:[%s11192_s17 + $0x98] sm:$0xff] %v529_v19   ;;  %v537_v21 = vld [vmem:[%s11184_s16 + $0x150] sm:$0xff]  }
  0x1c   : > { %534 = vst [vmem:[%s11192_s17 + $0xa0] sm:$0xff] %v533_v20   ;;  %v541_v22 = vld [vmem:[%s11184_s16 + $0x160] sm:$0xff]   ;;  %v545_v23 = vld [vmem:[%s11184_s16 + $0x170] sm:$0xff]   ;;  %538 = vst [vmem:[%s11192_s17 + $0xa8] sm:$0xff] %v537_v21  }
  0x1d   : > { %542 = vst [vmem:[%s11192_s17 + $0xb0] sm:$0xff] %v541_v22   ;;  %546 = vst [vmem:[%s11192_s17 + $0xb8] sm:$0xff] %v545_v23   ;;  %v549_v24 = vld [vmem:[%s11184_s16 + $0x180] sm:$0xff]   ;;  %v553_v25 = vld [vmem:[%s11184_s16 + $0x190] sm:$0xff]  }
  0x1e   : > { %v557_v26 = vld [vmem:[%s11184_s16 + $0x1a0] sm:$0xff]   ;;  %550 = vst [vmem:[%s11192_s17 + $0xc0] sm:$0xff] %v549_v24   ;;  %554 = vst [vmem:[%s11192_s17 + $0xc8] sm:$0xff] %v553_v25   ;;  %v561_v27 = vld [vmem:[%s11184_s16 + $0x1b0] sm:$0xff]  }
  0x1f   : > { %558 = vst [vmem:[%s11192_s17 + $0xd0] sm:$0xff] %v557_v26   ;;  %v565_v28 = vld [vmem:[%s11184_s16 + $0x1c0] sm:$0xff]   ;;  %v569_v29 = vld [vmem:[%s11184_s16 + $0x1d0] sm:$0xff]   ;;  %562 = vst [vmem:[%s11192_s17 + $0xd8] sm:$0xff] %v561_v27  }
  0x20   : > { %566 = vst [vmem:[%s11192_s17 + $0xe0] sm:$0xff] %v565_v28   ;;  %570 = vst [vmem:[%s11192_s17 + $0xe8] sm:$0xff] %v569_v29  }
  0x21 PF: > { %p8608_p5 = scmp.ge.s32.totalorder %s11065_s20, 1  ;;  %p714_p6 = scmp.lt.s32.totalorder %s11065_s20, 3 }
  0x23   : > { %p715_p7 = pnand %p8608_p5, %p714_p6 }
  0x24   : > { %v10681_v30 = vld [vmem:[%s13213_s1 + $0x24] ss:$8 sps:$4 sm:$0xff] (!%p715_p7)   ;;  %vm1141_vm0 = vcmask (!%p715_p7), 1046528   ;;  %v10683_v31 = vld [vmem:[%s13213_s1 + $0x20] ss:$8 sps:$4 sm:$0xff] (!%p715_p7)   ;;  %v11067_v32 = vmov (!%p715_p7), 0  }
  0x25   : > { %718 = sbr.rel (%p715_p7) target bundleno = 2911 (0xb5f), region = 117  ;;  %1180 = vmatprep.mubr.bf16.mxu0 (!%p715_p7), %v11067_v32  ;;  %3049 = vst [vmem:[#allocation2] sm:$0xff] (!%p715_p7), %v11067_v32  ;;  %s721_s28 = sand.u32 (!%p715_p7), 1, %s11057_s18   ;;  %1148 = vmatprep.subr.bf16.mxu0 (!%p715_p7), %v10681_v30  ;;  %v10684_v33 = vld [vmem:[%s13213_s1 + $0x34] ss:$8 sps:$4 sm:$0x7f] (!%p715_p7)  }
  0x26   : > { %v10686_v34 = vld [vmem:[%s13213_s1 + $0x30] ss:$8 sps:$4 sm:$0x7f] (!%p715_p7)   ;;  %1149 = vmatpush1.bf16.msra.mxu0 (!%p715_p7), %v10683_v31  ;;  %s10653_s23 = smul.u32 (!%p715_p7), 240, %s721_s28  ;;  %v10690_v36 = vld [vmem:[%s13213_s1 + $0x4] ss:$8 sps:$4 sm:$0xff] (!%p715_p7)  }
  0x27   : > { %8703 = vmatprep.subr.msk.bf16.mxu0 (!%p715_p7), %vm1141_vm0, %v10684_v33  ;;  %v1143_v35 = vsel (!%p715_p7), %vm1141_vm0, %v10686_v34, 0  ;;  %vm1056_vm1 = vcmask (!%p715_p7), 244736   ;;  %v10705_v38 = vld [vmem:[%s13213_s1 + $0x14] ss:$8 sps:$4 sm:$0x7f] (!%p715_p7)   ;;  %vm3050_vm2 = vcmask (!%p715_p7), 916480  }
  0x28   : > { %s11270_s18 = scalar_lea.vmem (!%p715_p7), [#allocation5], %s10653_s23  ;;  %v10688_v39 = vld [vmem:[%s13213_s1] ss:$8 sps:$4 sm:$0xff] (!%p715_p7)   ;;  %v10707_v42 = vld [vmem:[%s13213_s1 + $0x10] ss:$8 sps:$4 sm:$0x7f] (!%p715_p7)  }
  0x29   : > { %v10687_v37 = vld [vmem:[%s11270_s18 + $0x8] sm:$0xff] (!%p715_p7)   ;;  %v10691_v40 = vld [vmem:[%s11270_s18 + $0x10] sm:$0xff] (!%p715_p7)   ;;  %v10692_v41 = vld [vmem:[%s11270_s18 + $0x18] sm:$0xff] (!%p715_p7)   ;;  %v1704_v43 = vsel (!%p715_p7), %vm1141_vm0, %v10707_v42, 0  ;;  %vm11069_vm3 = vmmov (!%p715_p7), 0   ;;  %vm8017_vm4 = vcmask (!%p715_p7), 1043456  }
  0x2a   : > { %1151 = vmatpush1.bf16.msra.mxu0 (!%p715_p7), %v1143_v35  ;;  %v10693_v44 = vld [vmem:[%s11270_s18 + $0x20] sm:$0xff] (!%p715_p7)   ;;  %v10694_v45 = vld [vmem:[%s11270_s18 + $0x28] sm:$0xff] (!%p715_p7)   ;;  %v10695_v46 = vld [vmem:[%s11270_s18 + $0x30] sm:$0xff] (!%p715_p7)   ;;  %vm8013_vm5 = vcmask (!%p715_p7), 457728   ;;  %s8609_s16 = sshll.u32 (!%p715_p7), %s8602_s21, 1 }
  0x2b   : > { %1709 = vmatprep.subr.bf16.mxu0 (!%p715_p7), %v10690_v36  ;;  %v10696_v47 = vld [vmem:[%s11270_s18 + $0x38] sm:$0xff] (!%p715_p7)   ;;  %v10697_v48 = vld [vmem:[%s11270_s18 + $0x40] sm:$0xff] (!%p715_p7)   ;;  %v10698_v49 = vld [vmem:[%s11270_s18 + $0x48] sm:$0xff] (!%p715_p7)   ;;  %p770_p8 = scmp.lt.s32.totalorder (!%p715_p7), %s8609_s16, 3 }
  0x2c   : > { %v10699_v50 = vld [vmem:[%s11270_s18 + $0x50] sm:$0xff]   ;;  %v10700_v51 = vld [vmem:[%s11270_s18 + $0x58] sm:$0xff]   ;;  %v10701_v52 = vld [vmem:[%s11270_s18 + $0x60] sm:$0xff]  }
  0x2d   : > { %8704 = vmatmul.mubr.msk.bf16.vlgmr.msra.gmra.mrb[0].mxu0 %vm1056_vm1, %v10687_v37  ;;  %v10702_v53 = vld [vmem:[%s11270_s18 + $0x68] sm:$0xff]   ;;  %v10703_v55 = vld [vmem:[%s11270_s18 + $0x70] sm:$0xff]   ;;  %v10704_v56 = vld [vmem:[%s11270_s18 + $0x78] sm:$0xff]   ;;  %s13232_s16 = smov (!%p770_p8, %s8609_s16), 3 }
  0x2e   : > { %1710 = vmatpush1.bf16.msra.mxu0 %v10688_v39  ;;  %1190 = vmatprep.mubr.bf16.mxu0 %v11067_v32  ;;  %v10724_v54 = vld [vmem:[%s13213_s1 + $0x44] ss:$8 sps:$4 sm:$0xff]   ;;  %v10722_v8 = vld [vmem:[%s13213_s1 + $0x40] ss:$8 sps:$4 sm:$0xff]   ;;  %s8610_s17 = sshll.u32 %s13232_s16, 3 }
  0x2f   : > { %8764 = vmatprep.subr.msk.bf16.mxu0 %vm1141_vm0, %v10705_v38  ;;  %v10708_v57 = vld [vmem:[%s11270_s18 + $0x80] sm:$0xff]   ;;  %v10709_v58 = vld [vmem:[%s11270_s18 + $0x88] sm:$0xff]   ;;  %v10710_v59 = vld [vmem:[%s11270_s18 + $0x90] sm:$0xff]   ;;  %s773_s27 = scalar_lea.vmem %s13227_s15, %s8610_s17 }
  0x30   : > { %v10711_v60 = vld [vmem:[%s11270_s18 + $0x98] sm:$0xff]   ;;  %v10712_v61 = vld [vmem:[%s11270_s18 + $0xa0] sm:$0xff]   ;;  %v10713_v63 = vld [vmem:[%s11270_s18 + $0xa8] sm:$0xff]  }
  0x31   : > { %v11345_v62 = vld [vmem:[#allocation2] sm:$0xff]  ;;  %v10715_v1 = vld [vmem:[%s11270_s18 + $0xb8] sm:$0xff]   ;;  %v10717_v3 = vld [vmem:[%s11270_s18 + $0xc8] sm:$0xff]  }
  0x32   : > { %1712 = vmatpush1.bf16.msra.mxu0 %v1704_v43  ;;  %v10714_v0 = vld [vmem:[%s11270_s18 + $0xb0] sm:$0xff]   ;;  %v10716_v2 = vld [vmem:[%s11270_s18 + $0xc0] sm:$0xff]   ;;  %v10719_v5 = vld [vmem:[%s11270_s18 + $0xd8] sm:$0xff]   ;;  %3051 = vst.msk [vmem:[#allocation2 + $0x8] sm:$0xff] %vm3050_vm2, %v11345_v62 }
  0x33   : > { %2332 = vmatprep.subr.bf16.mxu0 %v10724_v54  ;;  %v10718_v4 = vld [vmem:[%s11270_s18 + $0xd0] sm:$0xff]   ;;  %v10720_v6 = vld [vmem:[%s11270_s18 + $0xe0] sm:$0xff]   ;;  %v10725_v12 = vld [vmem:[%s11270_s18 + $0x8] sm:$0xff]   ;;  %3054 = vst.msk [vmem:[#allocation2 + $0x1d8] sm:$0xff] %vm3050_vm2, %v11345_v62 }
  0x34   : > { %v10721_v7 = vld [vmem:[%s11270_s18] sm:$0xff]   ;;  %v10726_v13 = vld [vmem:[%s11270_s18 + $0x10] sm:$0xff]   ;;  %v10727_v14 = vld [vmem:[%s11270_s18 + $0x18] sm:$0xff]  }
  0x35   : > { %8705 = vmatmul.mubr.msk.bf16.gmra.mrb[4].mxu0 %vm1056_vm1, %v10691_v40  ;;  %v10739_v9 = vld [vmem:[%s13213_s1 + $0x54] ss:$8 sps:$4 sm:$0x7f]   ;;  %v10741_v10 = vld [vmem:[%s13213_s1 + $0x50] ss:$8 sps:$4 sm:$0x7f]  }
  0x36   : > { %1200 = vmatprep.mubr.bf16.mxu0 %v11067_v32  ;;  %v2327_v11 = vsel %vm1141_vm0, %v10741_v10, 0  ;;  %v10728_v15 = vld [vmem:[%s11270_s18 + $0x20] sm:$0xff]   ;;  %v10729_v16 = vld [vmem:[%s11270_s18 + $0x28] sm:$0xff]   ;;  %v10730_v17 = vld [vmem:[%s11270_s18 + $0x30] sm:$0xff]  }
  0x37   : > { %v10731_v18 = vld [vmem:[%s11270_s18 + $0x38] sm:$0xff]   ;;  %v10732_v19 = vld [vmem:[%s11270_s18 + $0x40] sm:$0xff]   ;;  %v10733_v20 = vld [vmem:[%s11270_s18 + $0x48] sm:$0xff]  }
  0x38   : > { %v10734_v21 = vld [vmem:[%s11270_s18 + $0x50] sm:$0xff]   ;;  %v10735_v22 = vld [vmem:[%s11270_s18 + $0x58] sm:$0xff]   ;;  %v10736_v23 = vld [vmem:[%s11270_s18 + $0x60] sm:$0xff]  }
  0x39   : > { %v10737_v24 = vld [vmem:[%s11270_s18 + $0x68] sm:$0xff]   ;;  %v10738_v25 = vld [vmem:[%s11270_s18 + $0x70] sm:$0xff]   ;;  %v10742_v26 = vld [vmem:[%s11270_s18 + $0x78] sm:$0xff]  }
  0x3a   : > { %v10743_v27 = vld [vmem:[%s11270_s18 + $0x80] sm:$0xff]   ;;  %v10744_v28 = vld [vmem:[%s11270_s18 + $0x88] sm:$0xff]   ;;  %v10745_v29 = vld [vmem:[%s11270_s18 + $0x90] sm:$0xff]  }
  0x3b   : > { %v10746_v30 = vld [vmem:[%s11270_s18 + $0x98] sm:$0xff]   ;;  %v10747_v31 = vld [vmem:[%s11270_s18 + $0xa0] sm:$0xff]   ;;  %v10749_v33 = vld [vmem:[%s11270_s18 + $0xb0] sm:$0xff]  }
  0x3c   : > { %v10750_v34 = vld [vmem:[%s11270_s18 + $0xb8] sm:$0xff]   ;;  %v10751_v35 = vld [vmem:[%s11270_s18 + $0xc0] sm:$0xff]   ;;  %v10752_v36 = vld [vmem:[%s11270_s18 + $0xc8] sm:$0xff]  }
  0x3d   : > { %8706 = vmatmul.mubr.msk.bf16.gmra.mrb[8].mxu0 %vm1056_vm1, %v10692_v41  ;;  %v10753_v37 = vld [vmem:[%s11270_s18 + $0xd0] sm:$0xff]   ;;  %v10754_v38 = vld [vmem:[%s11270_s18 + $0xd8] sm:$0xff]   ;;  %v10757_v41 = vld [vmem:[%s11270_s18 + $0x20] sm:$0xff]  }
  0x3e   : > { %1210 = vmatprep.mubr.bf16.mxu0 %v11067_v32  ;;  %v10755_v39 = vld [vmem:[%s11270_s18 + $0x10] sm:$0xff]   ;;  %v10756_v40 = vld [vmem:[%s11270_s18 + $0x18] sm:$0xff]   ;;  %v10758_v42 = vld [vmem:[%s11270_s18 + $0x28] sm:$0xff]  }
  0x3f   : > { %v10759_v43 = vld [vmem:[%s11270_s18 + $0x30] sm:$0xff]   ;;  %v10762_v54 = vld [vmem:[%s11270_s18 + $0x48] sm:$0xff]  }
  0x40   : > { %v10815_v10 = vld [vmem:[%s13215_s3 + $0x1a4] ss:$8 sps:$4 sm:$0xff]  }
  0x45   : > { %8707 = vmatmul.mubr.msk.bf16.gmra.mrb[12].mxu0 %vm1056_vm1, %v10693_v44  ;;  %v10760_v44 = vld [vmem:[%s11270_s18 + $0x38] sm:$0xff]  }
  0x46   : > { %1220 = vmatprep.mubr.bf16.mxu0 %v11067_v32 }
  0x4d   : > { %8708 = vmatmul.mubr.msk.bf16.gmra.mrb[16].mxu0 %vm1056_vm1, %v10694_v45  ;;  %v10777_v45 = vld [vmem:[%s13215_s3 + $0xf4] ss:$8 sps:$4 sm:$0xff]  }
  0x4e   : > { %1230 = vmatprep.mubr.bf16.mxu0 %v11067_v32  ;;  %3519 = vmatprep.subr.bf16.mxu1 %v10777_v45 }
  0x55   : > { %8709 = vmatmul.mubr.msk.bf16.gmra.mrb[20].mxu0 %vm1056_vm1, %v10695_v46  ;;  %v10779_v46 = vld [vmem:[%s13215_s3 + $0xf0] ss:$8 sps:$4 sm:$0xff]  }
  0x56   : > { %1240 = vmatprep.mubr.bf16.mxu0 %v11067_v32  ;;  %3520 = vmatpush1.bf16.msra.mxu1 %v10779_v46 }
  0x5d   : > { %8710 = vmatmul.mubr.msk.bf16.gmra.mrb[24].mxu0 %vm1056_vm1, %v10696_v47  ;;  %v10780_v47 = vld [vmem:[%s13215_s3 + $0x104] ss:$8 sps:$4 sm:$0xff]  }
  0x5e   : > { %1250 = vmatprep.mubr.bf16.mxu0 %v11067_v32  ;;  %3521 = vmatprep.subr.bf16.mxu1 %v10780_v47 }
  0x65   : > { %8711 = vmatmul.mubr.msk.bf16.gmra.mrb[28].mxu0 %vm1056_vm1, %v10697_v48  ;;  %v10782_v48 = vld [vmem:[%s13215_s3 + $0x100] ss:$8 sps:$4 sm:$0xff]  }
  0x66   : > { %1260 = vmatprep.mubr.bf16.mxu0 %v11067_v32  ;;  %3522 = vmatpush1.bf16.msra.mxu1 %v10782_v48 }
  0x6d   : > { %8712 = vmatmul.mubr.msk.bf16.gmra.mrb[32].mxu0 %vm1056_vm1, %v10698_v49  ;;  %v10761_v49 = vld [vmem:[%s11270_s18 + $0x40] sm:$0xff]  }
  0x6e   : > { %1270 = vmatprep.mubr.bf16.mxu0 %v11067_v32 }
  0x75   : > { %8713 = vmatmul.mubr.msk.bf16.gmra.mrb[36].mxu0 %vm1056_vm1, %v10699_v50  ;;  %v10784_v50 = vld [vmem:[%s13215_s3 + $0x114] ss:$8 sps:$4 sm:$0xff]  }
  0x76   : > { %1280 = vmatprep.mubr.bf16.mxu0 %v11067_v32  ;;  %3523 = vmatprep.subr.bf16.mxu1 %v10784_v50 }
  0x7d   : > { %8714 = vmatmul.mubr.msk.bf16.gmra.mrb[40].mxu0 %vm1056_vm1, %v10700_v51  ;;  %v10786_v51 = vld [vmem:[%s13215_s3 + $0x110] ss:$8 sps:$4 sm:$0xff]  }
  0x7e   : > { %1290 = vmatprep.mubr.bf16.mxu0 %v11067_v32  ;;  %3524 = vmatpush1.bf16.msra.mxu1 %v10786_v51 }
  0x85   : > { %8715 = vmatmul.mubr.msk.bf16.gmra.mrb[44].mxu0 %vm1056_vm1, %v10701_v52  ;;  %v10787_v52 = vld [vmem:[%s13215_s3 + $0x124] ss:$8 sps:$4 sm:$0xff]  }
  0x86   : > { %1300 = vmatprep.mubr.bf16.mxu0 %v11067_v32  ;;  %3525 = vmatprep.subr.bf16.mxu1 %v10787_v52 }
  0x8d   : > { %8716 = vmatmul.mubr.msk.bf16.gmra.mrb[48].mxu0 %vm1056_vm1, %v10702_v53  ;;  %v10789_v53 = vld [vmem:[%s13215_s3 + $0x120] ss:$8 sps:$4 sm:$0xff]  }
  0x8e   : > { %1310 = vmatprep.mubr.bf16.mxu0 %v11067_v32  ;;  %3526 = vmatpush1.bf16.msra.mxu1 %v10789_v53 }
  0x95   : > { %8717 = vmatmul.mubr.msk.bf16.gmra.mrb[52].mxu0 %vm1056_vm1, %v10703_v55  ;;  %v10791_v55 = vld [vmem:[%s13215_s3 + $0x134] ss:$8 sps:$4 sm:$0xff]  }
  0x96   : > { %1320 = vmatprep.mubr.bf16.mxu0 %v11067_v32  ;;  %3527 = vmatprep.subr.bf16.mxu1 %v10791_v55 }
  0x9d   : > { %8718 = vmatmul.mubr.msk.bf16.gmra.mrb[56].mxu0 %vm1056_vm1, %v10704_v56  ;;  %v10793_v56 = vld [vmem:[%s13215_s3 + $0x130] ss:$8 sps:$4 sm:$0xff]  }
  0x9e   : > { %1330 = vmatprep.mubr.bf16.mxu0 %v11067_v32  ;;  %3528 = vmatpush1.bf16.msra.mxu1 %v10793_v56 }
  0xa5   : > { %8719 = vmatmul.mubr.msk.bf16.gmra.mrb[60].mxu0 %vm1056_vm1, %v10708_v57  ;;  %v10794_v57 = vld [vmem:[%s13215_s3 + $0x144] ss:$8 sps:$4 sm:$0xff]  }
  0xa6   : > { %1340 = vmatprep.mubr.bf16.mxu0 %v11067_v32  ;;  %3529 = vmatprep.subr.bf16.mxu1 %v10794_v57 }
  0xad   : > { %8720 = vmatmul.mubr.msk.bf16.gmra.mrb[64].mxu0 %vm1056_vm1, %v10709_v58  ;;  %v10796_v58 = vld [vmem:[%s13215_s3 + $0x140] ss:$8 sps:$4 sm:$0xff]  }
  0xae   : > { %1350 = vmatprep.mubr.bf16.mxu0 %v11067_v32  ;;  %3530 = vmatpush1.bf16.msra.mxu1 %v10796_v58 }
  0xb5   : > { %8721 = vmatmul.mubr.msk.bf16.gmra.mrb[68].mxu0 %vm1056_vm1, %v10710_v59  ;;  %v10763_v59 = vld [vmem:[%s11270_s18 + $0x50] sm:$0xff]  }
  0xb6   : > { %1360 = vmatprep.mubr.bf16.mxu0 %v11067_v32 }
  0xbd   : > { %8722 = vmatmul.mubr.msk.bf16.gmra.mrb[72].mxu0 %vm1056_vm1, %v10711_v60  ;;  %v10798_v60 = vld [vmem:[%s13215_s3 + $0x154] ss:$8 sps:$4 sm:$0xff]  }
  0xbe   : > { %1370 = vmatprep.mubr.bf16.mxu0 %v11067_v32  ;;  %v10748_v32 = vld [vmem:[%s11270_s18 + $0xa8] sm:$0xff]   ;;  %3531 = vmatprep.subr.bf16.mxu1 %v10798_v60 }
  0xc5   : > { %8723 = vmatmul.mubr.msk.bf16.gmra.mrb[76].mxu0 %vm1056_vm1, %v10712_v61  ;;  %v10800_v61 = vld [vmem:[%s13215_s3 + $0x150] ss:$8 sps:$4 sm:$0xff]  }
  0xc6   : > { %1380 = vmatprep.mubr.bf16.mxu0 %v11345_v62  ;;  %3532 = vmatpush1.bf16.msra.mxu1 %v10800_v61 }
  0xcd   : > { %8724 = vmatmul.mubr.msk.bf16.gmra.mrb[80].mxu0 %vm1056_vm1, %v10713_v63  ;;  %v10801_v63 = vld [vmem:[%s13215_s3 + $0x164] ss:$8 sps:$4 sm:$0xff]  }
  0xce   : > { %1390 = vmatprep.mubr.bf16.mxu0 %v11345_v62  ;;  %3533 = vmatprep.subr.bf16.mxu1 %v10801_v63 }
  0xd5   : > { %8725 = vmatmul.mubr.msk.bf16.gmra.mrb[84].mxu0 %vm1056_vm1, %v10714_v0  ;;  %v10803_v0 = vld [vmem:[%s13215_s3 + $0x160] ss:$8 sps:$4 sm:$0xff]  }
  0xd6   : > { %1400 = vmatprep.mubr.bf16.mxu0 %v11345_v62  ;;  %3534 = vmatpush1.bf16.msra.mxu1 %v10803_v0 }
  0xdd   : > { %8726 = vmatmul.mubr.msk.bf16.gmra.mrb[88].mxu0 %vm1056_vm1, %v10715_v1  ;;  %v10764_v1 = vld [vmem:[%s11270_s18 + $0x58] sm:$0xff]  }
  0xde   : > { %1410 = vmatprep.mubr.bf16.mxu0 %v11345_v62 }
  0xe5   : > { %8727 = vmatmul.mubr.msk.bf16.gmra.mrb[92].mxu0 %vm1056_vm1, %v10716_v2  ;;  %v10805_v2 = vld [vmem:[%s13215_s3 + $0x174] ss:$8 sps:$4 sm:$0xff]  }
  0xe6   : > { %1420 = vmatprep.mubr.bf16.mxu0 %v11345_v62  ;;  %3535 = vmatprep.subr.bf16.mxu1 %v10805_v2 }
  0xed   : > { %8728 = vmatmul.mubr.msk.bf16.gmra.mrb[96].mxu0 %vm1056_vm1, %v10717_v3  ;;  %v10807_v3 = vld [vmem:[%s13215_s3 + $0x170] ss:$8 sps:$4 sm:$0xff]  }
  0xee   : > { %1430 = vmatprep.mubr.bf16.mxu0 %v11345_v62  ;;  %3536 = vmatpush1.bf16.msra.mxu1 %v10807_v3 }
  0xf5   : > { %8729 = vmatmul.mubr.msk.bf16.gmra.mrb[100].mxu0 %vm1056_vm1, %v10718_v4  ;;  %v10808_v4 = vld [vmem:[%s13215_s3 + $0x184] ss:$8 sps:$4 sm:$0xff]  }
  0xf6   : > { %1440 = vmatprep.mubr.bf16.mxu0 %v11345_v62  ;;  %3537 = vmatprep.subr.bf16.mxu1 %v10808_v4 }
  0xfd   : > { %8730 = vmatmul.mubr.msk.bf16.gmra.mrb[104].mxu0 %vm1056_vm1, %v10719_v5  ;;  %v10810_v5 = vld [vmem:[%s13215_s3 + $0x180] ss:$8 sps:$4 sm:$0xff]  }
  0xfe   : > { %1450 = vmatprep.mubr.bf16.mxu0 %v11345_v62  ;;  %3538 = vmatpush1.bf16.msra.mxu1 %v10810_v5 }
 0x105   : > { %8731 = vmatmul.mubr.msk.bf16.gmra.mrb[108].mxu0 %vm1056_vm1, %v10720_v6  ;;  %v10765_v6 = vld [vmem:[%s11270_s18 + $0x60] sm:$0xff]  }
 0x106   : > { %1741 = vmatprep.mubr.bf16.mxu0 %v11345_v62 }
 0x10d   : > { %8765 = vmatmul.mubr.msk.bf16.vlgmr.msra.gmra.mrb[0].mxu0 %vm1056_vm1, %v10721_v7  ;;  %v10812_v7 = vld [vmem:[%s13215_s3 + $0x194] ss:$8 sps:$4 sm:$0xff]  }
 0x10e   : > { %2333 = vmatpush1.bf16.msra.mxu0 %v10722_v8  ;;  %1751 = vmatprep.mubr.bf16.mxu0 %v11345_v62  ;;  %v10814_v8 = vld [vmem:[%s13215_s3 + $0x190] ss:$8 sps:$4 sm:$0xff]  }
 0x10f   : > { %8885 = vmatprep.subr.msk.bf16.mxu0 %vm1141_vm0, %v10739_v9  ;;  %3539 = vmatprep.subr.bf16.mxu1 %v10812_v7  ;;  %v10766_v9 = vld [vmem:[%s11270_s18 + $0x68] sm:$0xff]  }
 0x110   : > { %3540 = vmatpush1.bf16.msra.mxu1 %v10814_v8  ;;  %v10828_v7 = vld [vmem:[%s13215_s3] ss:$8 sps:$4 sm:$0xff]  }
 0x111   : > { %3541 = vmatprep.subr.bf16.mxu1 %v10815_v10 }
 0x112   : > { %2335 = vmatpush1.bf16.msra.mxu0 %v2327_v11  ;;  %v10817_v11 = vld [vmem:[%s13215_s3 + $0x1a0] ss:$8 sps:$4 sm:$0xff]  }
 0x113   : > { %5608 = vmatprep.subr.bf16.mxu0 %v11345_v62 }
 0x114   : > { %3542 = vmatpush1.bf16.msra.mxu1 %v10817_v11  ;;  %v10833_v11 = vld [vmem:[%s13215_s3 + $0x14] ss:$8 sps:$4 sm:$0xff]  }
 0x115   : > { %8766 = vmatmul.mubr.msk.bf16.gmra.mrb[4].mxu0 %vm1056_vm1, %v10725_v12  ;;  %v10819_v12 = vld [vmem:[%s13215_s3 + $0x1b4] ss:$8 sps:$4 sm:$0xff]  }
 0x116   : > { %1761 = vmatprep.mubr.bf16.mxu0 %v11345_v62  ;;  %3543 = vmatprep.subr.bf16.mxu1 %v10819_v12 }
 0x11d   : > { %8767 = vmatmul.mubr.msk.bf16.gmra.mrb[8].mxu0 %vm1056_vm1, %v10726_v13  ;;  %v10821_v13 = vld [vmem:[%s13215_s3 + $0x1b0] ss:$8 sps:$4 sm:$0xff]  }
 0x11e   : > { %1771 = vmatprep.mubr.bf16.mxu0 %v11345_v62  ;;  %3544 = vmatpush1.bf16.msra.mxu1 %v10821_v13 }
 0x125   : > { %8768 = vmatmul.mubr.msk.bf16.gmra.mrb[12].mxu0 %vm1056_vm1, %v10727_v14  ;;  %v10767_v14 = vld [vmem:[%s11270_s18 + $0x70] sm:$0xff]  }
 0x126   : > { %1781 = vmatprep.mubr.bf16.mxu0 %v11345_v62 }
 0x12d   : > { %8769 = vmatmul.mubr.msk.bf16.gmra.mrb[16].mxu0 %vm1056_vm1, %v10728_v15  ;;  %v10822_v15 = vld [vmem:[%s13215_s3 + $0x1c4] ss:$8 sps:$4 sm:$0xff]  }
 0x12e   : > { %1791 = vmatprep.mubr.bf16.mxu0 %v11345_v62  ;;  %3545 = vmatprep.subr.bf16.mxu1 %v10822_v15 }
 0x135   : > { %8770 = vmatmul.mubr.msk.bf16.gmra.mrb[20].mxu0 %vm1056_vm1, %v10729_v16  ;;  %v10824_v16 = vld [vmem:[%s13215_s3 + $0x1c0] ss:$8 sps:$4 sm:$0xff]  }
 0x136   : > { %1801 = vmatprep.mubr.bf16.mxu0 %v11345_v62  ;;  %3546 = vmatpush1.bf16.msra.mxu1 %v10824_v16 }
 0x13d   : > { %8771 = vmatmul.mubr.msk.bf16.gmra.mrb[24].mxu0 %vm1056_vm1, %v10730_v17  ;;  %v10825_v17 = vld [vmem:[%s13215_s3 + $0x1d4] ss:$8 sps:$4 sm:$0xff]  }
 0x13e   : > { %1811 = vmatprep.mubr.bf16.mxu0 %v11345_v62  ;;  %3547 = vmatprep.subr.bf16.mxu1 %v10825_v17  ;;  %v10831_v17 = vld [vmem:[%s13215_s3 + $0x10] ss:$8 sps:$4 sm:$0xff]  }
 0x145   : > { %8772 = vmatmul.mubr.msk.bf16.gmra.mrb[28].mxu0 %vm1056_vm1, %v10731_v18  ;;  %v10827_v18 = vld [vmem:[%s13215_s3 + $0x1d0] ss:$8 sps:$4 sm:$0xff]  }
 0x146   : > { %1821 = vmatprep.mubr.bf16.mxu0 %v11345_v62  ;;  %3548 = vmatpush1.bf16.msra.mxu1 %v10827_v18 }
 0x14d   : > { %8773 = vmatmul.mubr.msk.bf16.gmra.mrb[32].mxu0 %vm1056_vm1, %v10732_v19  ;;  %v10768_v19 = vld [vmem:[%s11270_s18 + $0x78] sm:$0xff]  }
 0x14e   : > { %1831 = vmatprep.mubr.bf16.mxu0 %v11345_v62 }
 0x155   : > { %8774 = vmatmul.mubr.msk.bf16.gmra.mrb[36].mxu0 %vm1056_vm1, %v10733_v20  ;;  %v10769_v20 = vld [vmem:[%s11270_s18 + $0x80] sm:$0xff]  }
 0x156   : > { %1841 = vmatprep.mubr.bf16.mxu0 %v11345_v62 }
 0x15d   : > { %8775 = vmatmul.mubr.msk.bf16.gmra.mrb[40].mxu0 %vm1056_vm1, %v10734_v21  ;;  %v10830_v21 = vld [vmem:[%s13215_s3 + $0x4] ss:$8 sps:$4 sm:$0xff]  }
 0x15e   : > { %1851 = vmatprep.mubr.bf16.mxu0 %v11345_v62  ;;  %4066 = vmatprep.subr.bf16.mxu1 %v10830_v21 }
 0x165   : > { %8776 = vmatmul.mubr.msk.bf16.gmra.mrb[44].mxu0 %vm1056_vm1, %v10735_v22  ;;  %v10770_v22 = vld [vmem:[%s11270_s18 + $0x88] sm:$0xff]  }
 0x166   : > { %1861 = vmatprep.mubr.bf16.mxu0 %v11345_v62 }
 0x16d   : > { %8777 = vmatmul.mubr.msk.bf16.gmra.mrb[48].mxu0 %vm1056_vm1, %v10736_v23  ;;  %v10771_v23 = vld [vmem:[%s11270_s18 + $0x90] sm:$0xff]  }
 0x16e   : > { %1871 = vmatprep.mubr.bf16.mxu0 %v11345_v62 }
 0x175   : > { %8778 = vmatmul.mubr.msk.bf16.gmra.mrb[52].mxu0 %vm1056_vm1, %v10737_v24  ;;  %v10772_v24 = vld [vmem:[%s11270_s18 + $0x98] sm:$0xff]  }
 0x176   : > { %1881 = vmatprep.mubr.bf16.mxu0 %v11345_v62 }
 0x17d   : > { %8779 = vmatmul.mubr.msk.bf16.gmra.mrb[56].mxu0 %vm1056_vm1, %v10738_v25  ;;  %v10773_v25 = vld [vmem:[%s11270_s18 + $0xa0] sm:$0xff]  }
 0x17e   : > { %1891 = vmatprep.mubr.bf16.mxu0 %v11345_v62 }
 0x185   : > { %8780 = vmatmul.mubr.msk.bf16.gmra.mrb[60].mxu0 %vm1056_vm1, %v10742_v26  ;;  %v10774_v26 = vld [vmem:[%s11270_s18 + $0xa8] sm:$0xff]  }
 0x186   : > { %1901 = vmatprep.mubr.bf16.mxu0 %v11345_v62 }
 0x18d   : > { %8781 = vmatmul.mubr.msk.bf16.gmra.mrb[64].mxu0 %vm1056_vm1, %v10743_v27  ;;  %v10775_v27 = vld [vmem:[%s11270_s18 + $0xb0] sm:$0xff]  }
 0x18e   : > { %1911 = vmatprep.mubr.bf16.mxu0 %v11345_v62 }
 0x195   : > { %8782 = vmatmul.mubr.msk.bf16.gmra.mrb[68].mxu0 %vm1056_vm1, %v10744_v28  ;;  %v10776_v28 = vld [vmem:[%s11270_s18 + $0xb8] sm:$0xff]  }
 0x196   : > { %1921 = vmatprep.mubr.bf16.mxu0 %v11345_v62 }
 0x19d   : > { %8783 = vmatmul.mubr.msk.bf16.gmra.mrb[72].mxu0 %vm1056_vm1, %v10745_v29  ;;  %v10783_v29 = vld [vmem:[%s11270_s18 + $0xc0] sm:$0xff]  }
 0x19e   : > { %1931 = vmatprep.mubr.bf16.mxu0 %v11345_v62 }
 0x1a5   : > { %8784 = vmatmul.mubr.msk.bf16.gmra.mrb[76].mxu0 %vm1056_vm1, %v10746_v30  ;;  %v10790_v30 = vld [vmem:[%s11270_s18 + $0xc8] sm:$0xff]  }
 0x1a6   : > { %1941 = vmatprep.mubr.bf16.mxu0 %v11345_v62 }
 0x1ad   : > { %8785 = vmatmul.mubr.msk.bf16.gmra.mrb[80].mxu0 %vm1056_vm1, %v10747_v31  ;;  %v10797_v31 = vld [vmem:[%s11270_s18 + $0xd0] sm:$0xff]  }
 0x1ae   : > { %1951 = vmatprep.mubr.bf16.mxu0 %v11345_v62 }
 0x1b5   : > { %8786 = vmatmul.mubr.msk.bf16.gmra.mrb[84].mxu0 %vm1056_vm1, %v10748_v32  ;;  %v10804_v32 = vld [vmem:[%s11270_s18 + $0xd8] sm:$0xff]  }
 0x1b6   : > { %1961 = vmatprep.mubr.bf16.mxu0 %v11345_v62 }
 0x1bd   : > { %8787 = vmatmul.mubr.msk.bf16.gmra.mrb[88].mxu0 %vm1056_vm1, %v10749_v33  ;;  %v2759_v33 = vlaneseq }
 0x1be   : > { %1971 = vmatprep.mubr.bf16.mxu0 %v11345_v62 }
 0x1c5   : > { %8788 = vmatmul.mubr.msk.bf16.gmra.mrb[92].mxu0 %vm1056_vm1, %v10750_v34  ;;  %v11642_v34 = vshrl.u32 %v2759_v33, 7 }
 0x1c6   : > { %1981 = vmatprep.mubr.bf16.mxu0 %v11345_v62 }
 0x1cd   : > { %8789 = vmatmul.mubr.msk.bf16.gmra.mrb[96].mxu0 %vm1056_vm1, %v10751_v35  ;;  %v10811_v35 = vld [vmem:[%s11270_s18 + $0xe0] sm:$0xff]  }
 0x1ce   : > { %1991 = vmatprep.mubr.bf16.mxu0 %v11345_v62 }
 0x1d5   : > { %8790 = vmatmul.mubr.msk.bf16.gmra.mrb[100].mxu0 %vm1056_vm1, %v10752_v36  ;;  %v2761_v36 = vsub.s32 0, %v11642_v34 }
 0x1d6   : > { %2001 = vmatprep.mubr.bf16.mxu0 %v11345_v62 }
 0x1dd   : > { %8791 = vmatmul.mubr.msk.bf16.gmra.mrb[104].mxu0 %vm1056_vm1, %v10753_v37  ;;  %v2757_v37 = vld [vmem:[%s13214_s2] sm:$0x3] }
 0x1de   : > { %2011 = vmatprep.mubr.bf16.mxu0 %v11345_v62 }
 0x1e5   : > { %8792 = vmatmul.mubr.msk.bf16.gmra.mrb[108].mxu0 %vm1056_vm1, %v10754_v38  ;;  %v2765_v38 = vsub.s32 1, %v11642_v34 }
 0x1e6   : > { %2364 = vmatprep.mubr.bf16.mxu0 %v11345_v62 }
 0x1ed   : > { %8886 = vmatmul.mubr.msk.bf16.vlgmr.msra.gmra.mrb[0].mxu0 %vm1056_vm1, %v10755_v39  ;;  %v11654_v39 = vrot.slane %v2757_v37, %v2761_v36 }
 0x1ee   : > { %2374 = vmatprep.mubr.bf16.mxu0 %v11345_v62 }
 0x1f5   : > { %8887 = vmatmul.mubr.msk.bf16.gmra.mrb[4].mxu0 %vm1056_vm1, %v10756_v40  ;;  %v11658_v40 = vrot.slane %v2757_v37, %v2765_v38 }
 0x1f6   : > { %2384 = vmatprep.mubr.bf16.mxu0 %v11345_v62 }
 0x1fd   : > { %8888 = vmatmul.mubr.msk.bf16.gmra.mrb[8].mxu0 %vm1056_vm1, %v10757_v41 }
 0x1fe   : > { %2394 = vmatprep.mubr.bf16.mxu0 %v11345_v62 }
 0x205   : > { %8889 = vmatmul.mubr.msk.bf16.gmra.mrb[12].mxu0 %vm1056_vm1, %v10758_v42 }
 0x206   : > { %2404 = vmatprep.mubr.bf16.mxu0 %v11345_v62 }
 0x20d   : > { %8890 = vmatmul.mubr.msk.bf16.gmra.mrb[16].mxu0 %vm1056_vm1, %v10759_v43 }
 0x20e   : > { %2414 = vmatprep.mubr.bf16.mxu0 %v11345_v62 }
 0x215   : > { %8891 = vmatmul.mubr.msk.bf16.gmra.mrb[20].mxu0 %vm1056_vm1, %v10760_v44  ;;  %v10818_v44 = vld [vmem:[%s11270_s18 + $0xe8] sm:$0xff]  }
 0x216   : > { %2424 = vmatprep.mubr.bf16.mxu0 %v11345_v62 }
 0x21d   : > { %8892 = vmatmul.mubr.msk.bf16.gmra.mrb[24].mxu0 %vm1056_vm1, %v10761_v49 }
 0x21e   : > { %2434 = vmatprep.mubr.bf16.mxu0 %v11345_v62 }
 0x225   : > { %8893 = vmatmul.mubr.msk.bf16.gmra.mrb[28].mxu0 %vm1056_vm1, %v10762_v54 }
 0x226   : > { %2444 = vmatprep.mubr.bf16.mxu0 %v11345_v62 }
 0x22d   : > { %8894 = vmatmul.mubr.msk.bf16.gmra.mrb[32].mxu0 %vm1056_vm1, %v10763_v59 }
 0x22e   : > { %2454 = vmatprep.mubr.bf16.mxu0 %v11345_v62 }
 0x235   : > { %8895 = vmatmul.mubr.msk.bf16.gmra.mrb[36].mxu0 %vm1056_vm1, %v10764_v1 }
 0x236   : > { %2464 = vmatprep.mubr.bf16.mxu0 %v11345_v62 }
 0x23d   : > { %8896 = vmatmul.mubr.msk.bf16.gmra.mrb[40].mxu0 %vm1056_vm1, %v10765_v6 }
 0x23e   : > { %2474 = vmatprep.mubr.bf16.mxu0 %v11345_v62 }
 0x245   : > { %8897 = vmatmul.mubr.msk.bf16.gmra.mrb[44].mxu0 %vm1056_vm1, %v10766_v9 }
 0x246   : > { %2484 = vmatprep.mubr.bf16.mxu0 %v11345_v62 }
 0x24d   : > { %8898 = vmatmul.mubr.msk.bf16.gmra.mrb[48].mxu0 %vm1056_vm1, %v10767_v14 }
 0x24e   : > { %2494 = vmatprep.mubr.bf16.mxu0 %v11345_v62 }
 0x255   : > { %8899 = vmatmul.mubr.msk.bf16.gmra.mrb[52].mxu0 %vm1056_vm1, %v10768_v19 }
 0x256   : > { %2504 = vmatprep.mubr.bf16.mxu0 %v11345_v62 }
 0x25d   : > { %8900 = vmatmul.mubr.msk.bf16.gmra.mrb[56].mxu0 %vm1056_vm1, %v10769_v20  ;;  %v10836_v20 = vld [vmem:[%s13215_s3 + $0x24] ss:$8 sps:$4 sm:$0xff]  }
 0x25e   : > { %2514 = vmatprep.mubr.bf16.mxu0 %v11345_v62 }
 0x265   : > { %8901 = vmatmul.mubr.msk.bf16.gmra.mrb[60].mxu0 %vm1056_vm1, %v10770_v22 }
 0x266   : > { %2524 = vmatprep.mubr.bf16.mxu0 %v11345_v62 }
 0x26d   : > { %8902 = vmatmul.mubr.msk.bf16.gmra.mrb[64].mxu0 %vm1056_vm1, %v10771_v23 }
 0x26e   : > { %2534 = vmatprep.mubr.bf16.mxu0 %v11345_v62 }
 0x275   : > { %8903 = vmatmul.mubr.msk.bf16.gmra.mrb[68].mxu0 %vm1056_vm1, %v10772_v24 }
 0x276   : > { %2544 = vmatprep.mubr.bf16.mxu0 %v11345_v62 }
 0x27d   : > { %8904 = vmatmul.mubr.msk.bf16.gmra.mrb[72].mxu0 %vm1056_vm1, %v10773_v25 }
 0x27e   : > { %2554 = vmatprep.mubr.bf16.mxu0 %v11345_v62 }
 0x285   : > { %8905 = vmatmul.mubr.msk.bf16.gmra.mrb[76].mxu0 %vm1056_vm1, %v10774_v26  ;;  %v10834_v26 = vld [vmem:[%s13215_s3 + $0x20] ss:$8 sps:$4 sm:$0xff]  }
 0x286   : > { %2564 = vmatprep.mubr.bf16.mxu0 %v11345_v62 }
 0x28d   : > { %8906 = vmatmul.mubr.msk.bf16.gmra.mrb[80].mxu0 %vm1056_vm1, %v10775_v27 }
 0x28e   : > { %2574 = vmatprep.mubr.bf16.mxu0 %v11345_v62 }
 0x295   : > { %8907 = vmatmul.mubr.msk.bf16.gmra.mrb[84].mxu0 %vm1056_vm1, %v10776_v28 }
 0x296   : > { %2584 = vmatprep.mubr.bf16.mxu0 %v11345_v62 }
 0x29d   : > { %8908 = vmatmul.mubr.msk.bf16.gmra.mrb[88].mxu0 %vm1056_vm1, %v10783_v29 }
 0x29e   : > { %2594 = vmatprep.mubr.bf16.mxu0 %v11345_v62 }
 0x2a5   : > { %8909 = vmatmul.mubr.msk.bf16.gmra.mrb[92].mxu0 %vm1056_vm1, %v10790_v30  ;;  %v10839_v30 = vld [vmem:[%s13215_s3 + $0x34] ss:$8 sps:$4 sm:$0xff]  }
 0x2a6   : > { %2604 = vmatprep.mubr.bf16.mxu0 %v11345_v62 }
 0x2ad   : > { %8910 = vmatmul.mubr.msk.bf16.gmra.mrb[96].mxu0 %vm1056_vm1, %v10797_v31 }
 0x2ae   : > { %2614 = vmatprep.mubr.bf16.mxu0 %v11345_v62 }
 0x2b5   : > { %8911 = vmatmul.mubr.msk.bf16.gmra.mrb[100].mxu0 %vm1056_vm1, %v10804_v32 }
 0x2b6   : > { %2624 = vmatprep.mubr.bf16.mxu0 %v11345_v62 }
 0x2bd   : > { %8912 = vmatmul.mubr.msk.bf16.gmra.mrb[104].mxu0 %vm1056_vm1, %v10811_v35 }
 0x2be   : > { %2634 = vmatprep.mubr.bf16.mxu0 %v11345_v62 }
 0x2c0   : > { %v2366_v41 = vpop.f32.mrb[0].mxu0 }
 0x2c1   : > { %v2769_v42 = vadd.f32 %v11654_v39, %v2366_v41  ;;  %v2368_v43 = vpop.f32.mrb[1].mxu0  ;;  %v10837_v41 = vld [vmem:[%s13215_s3 + $0x30] ss:$8 sps:$4 sm:$0xff]  }
 0x2c2   : > { %v2770_v45 = vadd.f32 %v11658_v40, %v2368_v43  ;;  %v2370_v46 = vpop.f32.mrb[2].mxu0 }
 0x2c3   : > { %v2771_v47 = vadd.f32 %v11654_v39, %v2370_v46  ;;  %v2372_v48 = vpop.f32.mrb[3].mxu0  ;;  %v2881_v50 = vmax.f32 %v2769_v42, 0.0 }
 0x2c4   : > { %v2772_v49 = vadd.f32 %v11658_v40, %v2372_v48  ;;  %v2882_v52 = vmax.f32 %v2770_v45, 0.0 }
 0x2c5   : > { %v2883_v51 = vmax.f32 %v2771_v47, 0.0  ;;  %8913 = vmatmul.mubr.msk.bf16.gmra.mrb[108].mxu0 %vm1056_vm1, %v10818_v44  ;;  %v10842_v44 = vld [vmem:[%s13215_s3 + $0x44] ss:$8 sps:$4 sm:$0xff]  }
 0x2c6   : > { %v2884_v53 = vmax.f32 %v2772_v49, 0.0 }
 0x2c7   : > { %v2993_v62 = vpack.c.bf16 %v2883_v51, %v2881_v50  ;;  %v10840_v50 = vld [vmem:[%s13215_s3 + $0x40] ss:$8 sps:$4 sm:$0xff]  }
 0x2c8   : > { %v2994_v54 = vpack.c.bf16 %v2884_v53, %v2882_v52  ;;  %v2376_v55 = vpop.f32.mrb[4].mxu0 }
 0x2c9   : > { %3056 = vst [vmem:[#allocation2 + $0x10] sm:$0xff] %v2993_v62  ;;  %v2773_v56 = vadd.f32 %v11654_v39, %v2376_v55  ;;  %v2378_v57 = vpop.f32.mrb[5].mxu0 }
 0x2ca   : > { %3057 = vst.msk [vmem:[#allocation2 + $0x18] sm:$0xff] %vm3050_vm2, %v2994_v54  ;;  %v2774_v58 = vadd.f32 %v11658_v40, %v2378_v57  ;;  %v2380_v59 = vpop.f32.mrb[6].mxu0 }
 0x2cb   : > { %v2775_v60 = vadd.f32 %v11654_v39, %v2380_v59  ;;  %v2382_v61 = vpop.f32.mrb[7].mxu0  ;;  %v2885_v0 = vmax.f32 %v2773_v56, 0.0  ;;  %v10843_v59 = vld [vmem:[%s13215_s3 + $0x50] ss:$8 sps:$4 sm:$0xff]  }
 0x2cc   : > { %v2776_v63 = vadd.f32 %v11658_v40, %v2382_v61  ;;  %v2886_v2 = vmax.f32 %v2774_v58, 0.0 }
 0x2cd   : > { %v2887_v1 = vmax.f32 %v2775_v60, 0.0 }
 0x2ce   : > { %v2888_v3 = vmax.f32 %v2776_v63, 0.0  ;;  %v10848_v63 = vld [vmem:[%s13215_s3 + $0x64] ss:$8 sps:$4 sm:$0xff]  }
 0x2cf   : > { %v2995_v4 = vpack.c.bf16 %v2887_v1, %v2885_v0 }
 0x2d0   : > { %v2996_v5 = vpack.c.bf16 %v2888_v3, %v2886_v2  ;;  %v2386_v6 = vpop.f32.mrb[8].mxu0 }
 0x2d1   : > { %3058 = vst [vmem:[#allocation2 + $0x20] sm:$0xff] %v2995_v4  ;;  %v2777_v8 = vadd.f32 %v11654_v39, %v2386_v6  ;;  %v2388_v9 = vpop.f32.mrb[9].mxu0  ;;  %v3199_v10 = vld [vmem:[#allocation2 + $0x18] sm:$0xff] }
 0x2d2   : > { %3059 = vst.msk [vmem:[#allocation2 + $0x28] sm:$0xff] %vm3050_vm2, %v2996_v5  ;;  %v2778_v12 = vadd.f32 %v11658_v40, %v2388_v9  ;;  %v2390_v13 = vpop.f32.mrb[10].mxu0  ;;  %8974 = vmatprep.mubr.msk.bf16.mxu1 %vm3050_vm2, %v3199_v10  ;;  %v10846_v5 = vld [vmem:[%s13215_s3 + $0x60] ss:$8 sps:$4 sm:$0xff]   ;;  %v10851_v9 = vld [vmem:[%s13215_s3 + $0x74] ss:$8 sps:$4 sm:$0xff]  }
 0x2d3   : > { %v2779_v14 = vadd.f32 %v11654_v39, %v2390_v13  ;;  %v2392_v15 = vpop.f32.mrb[11].mxu0  ;;  %3552 = vmatmul.mubr.bf16.vlgmr.msra.gmra.mrb[0].mxu1 %v2993_v62  ;;  %v2889_v18 = vmax.f32 %v2777_v8, 0.0  ;;  %v10845_v62 = vld [vmem:[%s13215_s3 + $0x54] ss:$8 sps:$4 sm:$0xff]  }
 0x2d4   : > { %v2780_v16 = vadd.f32 %v11658_v40, %v2392_v15  ;;  %4067 = vmatpush1.bf16.msra.mxu1 %v10828_v7  ;;  %v2890_v21 = vmax.f32 %v2778_v12, 0.0  ;;  %v10849_v15 = vld [vmem:[%s13215_s3 + $0x70] ss:$8 sps:$4 sm:$0xff]  }
 0x2d5   : > { %v2891_v19 = vmax.f32 %v2779_v14, 0.0  ;;  %4068 = vmatprep.subr.bf16.mxu1 %v10833_v11 }
 0x2d6   : > { %v2892_v22 = vmax.f32 %v2780_v16, 0.0 }
 0x2d7   : > { %v2997_v23 = vpack.c.bf16 %v2891_v19, %v2889_v18  ;;  %v10854_v18 = vld [vmem:[%s13215_s3 + $0x84] ss:$8 sps:$4 sm:$0xff]  }
 0x2d8   : > { %v2998_v24 = vpack.c.bf16 %v2892_v22, %v2890_v21  ;;  %v2396_v25 = vpop.f32.mrb[12].mxu0  ;;  %4069 = vmatpush1.bf16.msra.mxu1 %v10831_v17 }
 0x2d9   : > { %3060 = vst [vmem:[#allocation2 + $0x30] sm:$0xff] %v2997_v23  ;;  %v2781_v27 = vadd.f32 %v11654_v39, %v2396_v25  ;;  %v2398_v28 = vpop.f32.mrb[13].mxu0  ;;  %v3201_v29 = vld [vmem:[#allocation2 + $0x28] sm:$0xff]  ;;  %4070 = vmatprep.subr.bf16.mxu1 %v10836_v20 }
 0x2da   : > { %3061 = vst.msk [vmem:[#allocation2 + $0x38] sm:$0xff] %vm3050_vm2, %v2998_v24  ;;  %v2782_v31 = vadd.f32 %v11658_v40, %v2398_v28  ;;  %v2400_v32 = vpop.f32.mrb[14].mxu0  ;;  %8975 = vmatprep.mubr.msk.bf16.mxu1 %vm3050_vm2, %v3201_v29  ;;  %v10852_v24 = vld [vmem:[%s13215_s3 + $0x80] ss:$8 sps:$4 sm:$0xff]   ;;  %v10857_v28 = vld [vmem:[%s13215_s3 + $0x94] ss:$8 sps:$4 sm:$0xff]  }
 0x2db   : > { %v2783_v33 = vadd.f32 %v11654_v39, %v2400_v32  ;;  %v2402_v35 = vpop.f32.mrb[15].mxu0  ;;  %3562 = vmatmul.mubr.bf16.gmra.mrb[4].mxu1 %v2995_v4  ;;  %v2893_v42 = vmax.f32 %v2781_v27, 0.0 }
 0x2dc   : > { %v2784_v37 = vadd.f32 %v11658_v40, %v2402_v35  ;;  %4071 = vmatpush1.bf16.msra.mxu1 %v10834_v26  ;;  %v2894_v45 = vmax.f32 %v2782_v31, 0.0  ;;  %v10855_v35 = vld [vmem:[%s13215_s3 + $0x90] ss:$8 sps:$4 sm:$0xff]  }
 0x2dd   : > { %v2895_v43 = vmax.f32 %v2783_v33, 0.0  ;;  %4072 = vmatprep.subr.bf16.mxu1 %v10839_v30 }
 0x2de   : > { %v2896_v46 = vmax.f32 %v2784_v37, 0.0 }
 0x2df   : > { %v2999_v47 = vpack.c.bf16 %v2895_v43, %v2893_v42  ;;  %v10860_v42 = vld [vmem:[%s13215_s3 + $0xa4] ss:$8 sps:$4 sm:$0xff]  }
 0x2e0   : > { %v3000_v48 = vpack.c.bf16 %v2896_v46, %v2894_v45  ;;  %v2406_v49 = vpop.f32.mrb[16].mxu0  ;;  %4073 = vmatpush1.bf16.msra.mxu1 %v10837_v41 }
 0x2e1   : > { %3062 = vst [vmem:[#allocation2 + $0x40] sm:$0xff] %v2999_v47  ;;  %v2785_v51 = vadd.f32 %v11654_v39, %v2406_v49  ;;  %v2408_v52 = vpop.f32.mrb[17].mxu0  ;;  %v3203_v53 = vld [vmem:[#allocation2 + $0x38] sm:$0xff]  ;;  %4074 = vmatprep.subr.bf16.mxu1 %v10842_v44 }
 0x2e2   : > { %3063 = vst.msk [vmem:[#allocation2 + $0x48] sm:$0xff] %vm3050_vm2, %v3000_v48  ;;  %v2786_v54 = vadd.f32 %v11658_v40, %v2408_v52  ;;  %v2410_v55 = vpop.f32.mrb[18].mxu0  ;;  %8976 = vmatprep.mubr.msk.bf16.mxu1 %vm3050_vm2, %v3203_v53  ;;  %v10858_v48 = vld [vmem:[%s13215_s3 + $0xa0] ss:$8 sps:$4 sm:$0xff]  }
 0x2e3   : > { %v2787_v56 = vadd.f32 %v11654_v39, %v2410_v55  ;;  %v2412_v57 = vpop.f32.mrb[19].mxu0  ;;  %3572 = vmatmul.mubr.bf16.gmra.mrb[8].mxu1 %v2997_v23  ;;  %v2897_v60 = vmax.f32 %v2785_v51, 0.0  ;;  %v10863_v55 = vld [vmem:[%s13215_s3 + $0xb4] ss:$8 sps:$4 sm:$0xff]  }
 0x2e4   : > { %v2788_v58 = vadd.f32 %v11658_v40, %v2412_v57  ;;  %4075 = vmatpush1.bf16.msra.mxu1 %v10840_v50  ;;  %v2898_v0 = vmax.f32 %v2786_v54, 0.0  ;;  %v10861_v57 = vld [vmem:[%s13215_s3 + $0xb0] ss:$8 sps:$4 sm:$0xff]  }
 0x2e5   : > { %v2899_v61 = vmax.f32 %v2787_v56, 0.0  ;;  %4076 = vmatprep.subr.bf16.mxu1 %v10845_v62 }
 0x2e6   : > { %v2900_v1 = vmax.f32 %v2788_v58, 0.0 }
 0x2e7   : > { %v3001_v2 = vpack.c.bf16 %v2899_v61, %v2897_v60 }
 0x2e8   : > { %v3002_v3 = vpack.c.bf16 %v2900_v1, %v2898_v0  ;;  %v2416_v4 = vpop.f32.mrb[20].mxu0  ;;  %4077 = vmatpush1.bf16.msra.mxu1 %v10843_v59 }
 0x2e9   : > { %3064 = vst [vmem:[#allocation2 + $0x50] sm:$0xff] %v3001_v2  ;;  %v2789_v6 = vadd.f32 %v11654_v39, %v2416_v4  ;;  %v2418_v7 = vpop.f32.mrb[21].mxu0  ;;  %v3205_v8 = vld [vmem:[#allocation2 + $0x48] sm:$0xff]  ;;  %4078 = vmatprep.subr.bf16.mxu1 %v10848_v63 }
 0x2ea   : > { %3065 = vst.msk [vmem:[#allocation2 + $0x58] sm:$0xff] %vm3050_vm2, %v3002_v3  ;;  %v2790_v10 = vadd.f32 %v11658_v40, %v2418_v7  ;;  %v2420_v11 = vpop.f32.mrb[22].mxu0  ;;  %8977 = vmatprep.mubr.msk.bf16.mxu1 %vm3050_vm2, %v3205_v8 }
 0x2eb   : > { %v2791_v12 = vadd.f32 %v11654_v39, %v2420_v11  ;;  %v2422_v13 = vpop.f32.mrb[23].mxu0  ;;  %3582 = vmatmul.mubr.bf16.gmra.mrb[12].mxu1 %v2999_v47  ;;  %v2901_v16 = vmax.f32 %v2789_v6, 0.0 }
 0x2ec   : > { %v2792_v14 = vadd.f32 %v11658_v40, %v2422_v13  ;;  %4079 = vmatpush1.bf16.msra.mxu1 %v10846_v5  ;;  %v2902_v19 = vmax.f32 %v2790_v10, 0.0 }
 0x2ed   : > { %v2903_v17 = vmax.f32 %v2791_v12, 0.0  ;;  %4080 = vmatprep.subr.bf16.mxu1 %v10851_v9 }
 0x2ee   : > { %v2904_v20 = vmax.f32 %v2792_v14, 0.0 }
 0x2ef   : > { %v3003_v21 = vpack.c.bf16 %v2903_v17, %v2901_v16 }
 0x2f0   : > { %v3004_v22 = vpack.c.bf16 %v2904_v20, %v2902_v19  ;;  %v2426_v23 = vpop.f32.mrb[24].mxu0  ;;  %4081 = vmatpush1.bf16.msra.mxu1 %v10849_v15 }
 0x2f1   : > { %3066 = vst [vmem:[#allocation2 + $0x60] sm:$0xff] %v3003_v21  ;;  %v2793_v25 = vadd.f32 %v11654_v39, %v2426_v23  ;;  %v2428_v26 = vpop.f32.mrb[25].mxu0  ;;  %v3207_v27 = vld [vmem:[#allocation2 + $0x58] sm:$0xff]  ;;  %4082 = vmatprep.subr.bf16.mxu1 %v10854_v18  ;;  %v10866_v23 = vld [vmem:[%s13215_s3 + $0xc4] ss:$8 sps:$4 sm:$0xff]  }
 0x2f2   : > { %3067 = vst.msk [vmem:[#allocation2 + $0x68] sm:$0xff] %vm3050_vm2, %v3004_v22  ;;  %v2794_v29 = vadd.f32 %v11658_v40, %v2428_v26  ;;  %v2430_v30 = vpop.f32.mrb[26].mxu0  ;;  %8978 = vmatprep.mubr.msk.bf16.mxu1 %vm3050_vm2, %v3207_v27  ;;  %v10864_v22 = vld [vmem:[%s13215_s3 + $0xc0] ss:$8 sps:$4 sm:$0xff]  }
 0x2f3   : > { %v2795_v31 = vadd.f32 %v11654_v39, %v2430_v30  ;;  %v2432_v32 = vpop.f32.mrb[27].mxu0  ;;  %3592 = vmatmul.mubr.bf16.gmra.mrb[16].mxu1 %v3001_v2  ;;  %v2905_v37 = vmax.f32 %v2793_v25, 0.0 }
 0x2f4   : > { %v2796_v33 = vadd.f32 %v11658_v40, %v2432_v32  ;;  %4083 = vmatpush1.bf16.msra.mxu1 %v10852_v24  ;;  %v2906_v43 = vmax.f32 %v2794_v29, 0.0 }
 0x2f5   : > { %v2907_v41 = vmax.f32 %v2795_v31, 0.0  ;;  %4084 = vmatprep.subr.bf16.mxu1 %v10857_v28 }
 0x2f6   : > { %v2908_v44 = vmax.f32 %v2796_v33, 0.0 }
 0x2f7   : > { %v3005_v45 = vpack.c.bf16 %v2907_v41, %v2905_v37 }
 0x2f8   : > { %v3006_v46 = vpack.c.bf16 %v2908_v44, %v2906_v43  ;;  %v2436_v47 = vpop.f32.mrb[28].mxu0  ;;  %4085 = vmatpush1.bf16.msra.mxu1 %v10855_v35 }
 0x2f9   : > { %3068 = vst [vmem:[#allocation2 + $0x70] sm:$0xff] %v3005_v45  ;;  %v2797_v49 = vadd.f32 %v11654_v39, %v2436_v47  ;;  %v2438_v50 = vpop.f32.mrb[29].mxu0  ;;  %v3209_v51 = vld [vmem:[#allocation2 + $0x68] sm:$0xff]  ;;  %4086 = vmatprep.subr.bf16.mxu1 %v10860_v42 }
 0x2fa   : > { %3069 = vst.msk [vmem:[#allocation2 + $0x78] sm:$0xff] %vm3050_vm2, %v3006_v46  ;;  %v2798_v52 = vadd.f32 %v11658_v40, %v2438_v50  ;;  %v2440_v53 = vpop.f32.mrb[30].mxu0  ;;  %8979 = vmatprep.mubr.msk.bf16.mxu1 %vm3050_vm2, %v3209_v51 }
 0x2fb   : > { %v2799_v62 = vadd.f32 %v11654_v39, %v2440_v53  ;;  %v2442_v54 = vpop.f32.mrb[31].mxu0  ;;  %3602 = vmatmul.mubr.bf16.gmra.mrb[20].mxu1 %v3003_v21  ;;  %v2909_v58 = vmax.f32 %v2797_v49, 0.0 }
 0x2fc   : > { %v2800_v56 = vadd.f32 %v11658_v40, %v2442_v54  ;;  %4087 = vmatpush1.bf16.msra.mxu1 %v10858_v48  ;;  %v2910_v60 = vmax.f32 %v2798_v52, 0.0 }
 0x2fd   : > { %v2911_v59 = vmax.f32 %v2799_v62, 0.0  ;;  %4088 = vmatprep.subr.bf16.mxu1 %v10863_v55 }
 0x2fe   : > { %v2912_v61 = vmax.f32 %v2800_v56, 0.0 }
 0x2ff   : > { %v3007_v63 = vpack.c.bf16 %v2911_v59, %v2909_v58  ;;  %v10867_v58 = vld [vmem:[%s13215_s3 + $0xd0] ss:$8 sps:$4 sm:$0xff]   ;;  %v10869_v59 = vld [vmem:[%s13215_s3 + $0xd4] ss:$8 sps:$4 sm:$0xff]  }
 0x300   : > { %v3008_v0 = vpack.c.bf16 %v2912_v61, %v2910_v60  ;;  %v2446_v1 = vpop.f32.mrb[32].mxu0  ;;  %4089 = vmatpush1.bf16.msra.mxu1 %v10861_v57 }
 0x301   : > { %3070 = vst [vmem:[#allocation2 + $0x80] sm:$0xff] %v3007_v63  ;;  %v2801_v2 = vadd.f32 %v11654_v39, %v2446_v1  ;;  %v2448_v3 = vpop.f32.mrb[33].mxu0  ;;  %v3211_v4 = vld [vmem:[#allocation2 + $0x78] sm:$0xff]  ;;  %4090 = vmatprep.subr.bf16.mxu1 %v10866_v23 }
 0x302   : > { %3071 = vst.msk [vmem:[#allocation2 + $0x88] sm:$0xff] %vm3050_vm2, %v3008_v0  ;;  %v2802_v5 = vadd.f32 %v11658_v40, %v2448_v3  ;;  %v2450_v6 = vpop.f32.mrb[34].mxu0  ;;  %8980 = vmatprep.mubr.msk.bf16.mxu1 %vm3050_vm2, %v3211_v4 }
 0x303   : > { %v2803_v7 = vadd.f32 %v11654_v39, %v2450_v6  ;;  %v2452_v8 = vpop.f32.mrb[35].mxu0  ;;  %3612 = vmatmul.mubr.bf16.gmra.mrb[24].mxu1 %v3005_v45  ;;  %v2913_v10 = vmax.f32 %v2801_v2, 0.0 }
 0x304   : > { %v2804_v9 = vadd.f32 %v11658_v40, %v2452_v8  ;;  %v2914_v12 = vmax.f32 %v2802_v5, 0.0  ;;  %4091 = vmatpush1.bf16.msra.mxu1 %v10864_v22 }
 0x305   : > { %v2915_v11 = vmax.f32 %v2803_v7, 0.0  ;;  %4092 = vmatprep.subr.bf16.mxu1 %v10869_v59 }
 0x306   : > { %v2916_v13 = vmax.f32 %v2804_v9, 0.0 }
 0x307   : > { %v3009_v14 = vpack.c.bf16 %v2915_v11, %v2913_v10 }
 0x308   : > { %v3010_v15 = vpack.c.bf16 %v2916_v13, %v2914_v12  ;;  %v2456_v16 = vpop.f32.mrb[36].mxu0  ;;  %4093 = vmatpush1.bf16.msra.mxu1 %v10867_v58 }
 0x309   : > { %3072 = vst [vmem:[#allocation2 + $0x90] sm:$0xff] %v3009_v14  ;;  %v2805_v17 = vadd.f32 %v11654_v39, %v2456_v16  ;;  %v2458_v18 = vpop.f32.mrb[37].mxu0  ;;  %v11784_v19 = vld [vmem:[#allocation2 + $0x88] sm:$0xff] }
 0x30a   : > { %3073 = vst.msk [vmem:[#allocation2 + $0x98] sm:$0xff] %vm3050_vm2, %v3010_v15  ;;  %v2806_v20 = vadd.f32 %v11658_v40, %v2458_v18  ;;  %v2460_v21 = vpop.f32.mrb[38].mxu0  ;;  %8981 = vmatprep.mubr.msk.bf16.mxu1 %vm3050_vm2, %v11784_v19  ;;  %v10872_v15 = vld [vmem:[%s13215_s3 + $0xe4] ss:$8 sps:$4 sm:$0xff]  }
 0x30b   : > { %v2807_v24 = vadd.f32 %v11654_v39, %v2460_v21  ;;  %v2462_v25 = vpop.f32.mrb[39].mxu0  ;;  %3622 = vmatmul.mubr.bf16.gmra.mrb[28].mxu1 %v3007_v63  ;;  %v2917_v27 = vmax.f32 %v2805_v17, 0.0  ;;  %4094 = vmatprep.subr.bf16.mxu1 %v10872_v15 }
 0x30c   : > { %v2808_v26 = vadd.f32 %v11658_v40, %v2462_v25  ;;  %v2918_v29 = vmax.f32 %v2806_v20, 0.0 }
 0x30d   : > { %v2919_v28 = vmax.f32 %v2807_v24, 0.0 }
 0x30e   : > { %v2920_v30 = vmax.f32 %v2808_v26, 0.0 }
 0x30f   : > { %v3011_v31 = vpack.c.bf16 %v2919_v28, %v2917_v27 }
 0x310   : > { %v3012_v32 = vpack.c.bf16 %v2920_v30, %v2918_v29  ;;  %v2466_v33 = vpop.f32.mrb[40].mxu0 }
 0x311   : > { %3074 = vst [vmem:[#allocation2 + $0xa0] sm:$0xff] %v3011_v31  ;;  %v2809_v35 = vadd.f32 %v11654_v39, %v2466_v33  ;;  %v2468_v37 = vpop.f32.mrb[41].mxu0  ;;  %v11799_v41 = vld [vmem:[#allocation2 + $0x98] sm:$0xff] }
 0x312   : > { %3075 = vst.msk [vmem:[#allocation2 + $0xa8] sm:$0xff] %vm3050_vm2, %v3012_v32  ;;  %v2810_v42 = vadd.f32 %v11658_v40, %v2468_v37  ;;  %v2470_v43 = vpop.f32.mrb[42].mxu0  ;;  %8982 = vmatprep.mubr.msk.bf16.mxu1 %vm3050_vm2, %v11799_v41 }
 0x313   : > { %v2811_v44 = vadd.f32 %v11654_v39, %v2470_v43  ;;  %v2472_v45 = vpop.f32.mrb[43].mxu0  ;;  %3632 = vmatmul.mubr.bf16.gmra.mrb[32].mxu1 %v3009_v14  ;;  %v2921_v47 = vmax.f32 %v2809_v35, 0.0  ;;  %v10870_v14 = vld [vmem:[%s13215_s3 + $0xe0] ss:$8 sps:$4 sm:$0xff]  }
 0x314   : > { %v2812_v46 = vadd.f32 %v11658_v40, %v2472_v45  ;;  %v2922_v49 = vmax.f32 %v2810_v42, 0.0  ;;  %4095 = vmatpush1.bf16.msra.mxu1 %v10870_v14 }
 0x315   : > { %v2923_v48 = vmax.f32 %v2811_v44, 0.0 }
 0x316   : > { %v2924_v50 = vmax.f32 %v2812_v46, 0.0 }
 0x317   : > { %v11807_v51 = vpack.c.bf16 %v2923_v48, %v2921_v47 }
 0x318   : > { %v3014_v52 = vpack.c.bf16 %v2924_v50, %v2922_v49  ;;  %v2476_v53 = vpop.f32.mrb[44].mxu0 }
 0x319   : > { %3076 = vst [vmem:[#allocation2 + $0xb0] sm:$0xff] %v11807_v51  ;;  %v2813_v62 = vadd.f32 %v11654_v39, %v2476_v53  ;;  %v2478_v54 = vpop.f32.mrb[45].mxu0  ;;  %v11811_v55 = vld [vmem:[#allocation2 + $0xa8] sm:$0xff] }
 0x31a   : > { %3077 = vst.msk [vmem:[#allocation2 + $0xb8] sm:$0xff] %vm3050_vm2, %v3014_v52  ;;  %v2814_v56 = vadd.f32 %v11658_v40, %v2478_v54  ;;  %v2480_v57 = vpop.f32.mrb[46].mxu0  ;;  %8983 = vmatprep.mubr.msk.bf16.mxu1 %vm3050_vm2, %v11811_v55 }
 0x31b   : > { %v2815_v60 = vadd.f32 %v11654_v39, %v2480_v57  ;;  %v2482_v61 = vpop.f32.mrb[47].mxu0  ;;  %3642 = vmatmul.mubr.bf16.gmra.mrb[36].mxu1 %v3011_v31  ;;  %v2925_v0 = vmax.f32 %v2813_v62, 0.0  ;;  %v10875_v62 = vld [vmem:[%s13215_s3 + $0x1e4] ss:$8 sps:$4 sm:$0xff]  }
 0x31c   : > { %v2816_v63 = vadd.f32 %v11658_v40, %v2482_v61  ;;  %v2926_v2 = vmax.f32 %v2814_v56, 0.0  ;;  %4701 = vmatprep.subr.bf16.mxu1 %v10875_v62 }
 0x31d   : > { %v2927_v1 = vmax.f32 %v2815_v60, 0.0 }
 0x31e   : > { %v2928_v3 = vmax.f32 %v2816_v63, 0.0 }
 0x31f   : > { %v11825_v4 = vpack.c.bf16 %v2927_v1, %v2925_v0 }
 0x320   : > { %v3016_v5 = vpack.c.bf16 %v2928_v3, %v2926_v2  ;;  %v2486_v6 = vpop.f32.mrb[48].mxu0 }
 0x321   : > { %3078 = vst [vmem:[#allocation2 + $0xc0] sm:$0xff] %v11825_v4  ;;  %v2817_v7 = vadd.f32 %v11654_v39, %v2486_v6  ;;  %v2488_v8 = vpop.f32.mrb[49].mxu0  ;;  %v11829_v9 = vld [vmem:[#allocation2 + $0xb8] sm:$0xff] }
 0x322   : > { %3079 = vst.msk [vmem:[#allocation2 + $0xc8] sm:$0xff] %vm3050_vm2, %v3016_v5  ;;  %v2818_v10 = vadd.f32 %v11658_v40, %v2488_v8  ;;  %v2490_v11 = vpop.f32.mrb[50].mxu0  ;;  %8984 = vmatprep.mubr.msk.bf16.mxu1 %vm3050_vm2, %v11829_v9 }
 0x323   : > { %v2819_v12 = vadd.f32 %v11654_v39, %v2490_v11  ;;  %v2492_v13 = vpop.f32.mrb[51].mxu0  ;;  %3652 = vmatmul.mubr.bf16.gmra.mrb[40].mxu1 %v11807_v51  ;;  %v2929_v17 = vmax.f32 %v2817_v7, 0.0 }
 0x324   : > { %v2820_v16 = vadd.f32 %v11658_v40, %v2492_v13  ;;  %v2930_v20 = vmax.f32 %v2818_v10, 0.0 }
 0x325   : > { %v2931_v18 = vmax.f32 %v2819_v12, 0.0 }
 0x326   : > { %v2932_v21 = vmax.f32 %v2820_v16, 0.0 }
 0x327   : > { %v11844_v22 = vpack.c.bf16 %v2931_v18, %v2929_v17 }
 0x328   : > { %v3018_v23 = vpack.c.bf16 %v2932_v21, %v2930_v20  ;;  %v2496_v24 = vpop.f32.mrb[52].mxu0 }
 0x329   : > { %3080 = vst [vmem:[#allocation2 + $0xd0] sm:$0xff] %v11844_v22  ;;  %v2821_v25 = vadd.f32 %v11654_v39, %v2496_v24  ;;  %v2498_v26 = vpop.f32.mrb[53].mxu0  ;;  %v11848_v27 = vld [vmem:[#allocation2 + $0xc8] sm:$0xff] }
 0x32a   : > { %3081 = vst.msk [vmem:[#allocation2 + $0xd8] sm:$0xff] %vm3050_vm2, %v3018_v23  ;;  %v2822_v28 = vadd.f32 %v11658_v40, %v2498_v26  ;;  %v2500_v29 = vpop.f32.mrb[54].mxu0  ;;  %8985 = vmatprep.mubr.msk.bf16.mxu1 %vm3050_vm2, %v11848_v27 }
 0x32b   : > { %v2823_v30 = vadd.f32 %v11654_v39, %v2500_v29  ;;  %v2502_v31 = vpop.f32.mrb[55].mxu0  ;;  %3662 = vmatmul.mubr.bf16.gmra.mrb[44].mxu1 %v11825_v4  ;;  %v2933_v33 = vmax.f32 %v2821_v25, 0.0 }
 0x32c   : > { %v2824_v32 = vadd.f32 %v11658_v40, %v2502_v31  ;;  %v2934_v37 = vmax.f32 %v2822_v28, 0.0 }
 0x32d   : > { %v2935_v35 = vmax.f32 %v2823_v30, 0.0 }
 0x32e   : > { %v2936_v42 = vmax.f32 %v2824_v32, 0.0 }
 0x32f   : > { %v11857_v43 = vpack.c.bf16 %v2935_v35, %v2933_v33 }
 0x330   : > { %v3020_v44 = vpack.c.bf16 %v2936_v42, %v2934_v37  ;;  %v2506_v45 = vpop.f32.mrb[56].mxu0 }
 0x331   : > { %3082 = vst [vmem:[#allocation2 + $0xe0] sm:$0xff] %v11857_v43  ;;  %v2825_v46 = vadd.f32 %v11654_v39, %v2506_v45  ;;  %v2508_v47 = vpop.f32.mrb[57].mxu0  ;;  %v11861_v48 = vld [vmem:[#allocation2 + $0xd8] sm:$0xff] }
 0x332   : > { %3083 = vst.msk [vmem:[#allocation2 + $0xe8] sm:$0xff] %vm3050_vm2, %v3020_v44  ;;  %v2826_v49 = vadd.f32 %v11658_v40, %v2508_v47  ;;  %v2510_v50 = vpop.f32.mrb[58].mxu0  ;;  %8986 = vmatprep.mubr.msk.bf16.mxu1 %vm3050_vm2, %v11861_v48 }
 0x333   : > { %v2827_v52 = vadd.f32 %v11654_v39, %v2510_v50  ;;  %v2512_v53 = vpop.f32.mrb[59].mxu0  ;;  %3672 = vmatmul.mubr.bf16.gmra.mrb[48].mxu1 %v11844_v22  ;;  %v2937_v56 = vmax.f32 %v2825_v46, 0.0 }
 0x334   : > { %v2828_v54 = vadd.f32 %v11658_v40, %v2512_v53  ;;  %v2938_v58 = vmax.f32 %v2826_v49, 0.0 }
 0x335   : > { %v2939_v57 = vmax.f32 %v2827_v52, 0.0 }
 0x336   : > { %v2940_v59 = vmax.f32 %v2828_v54, 0.0 }
 0x337   : > { %v11873_v60 = vpack.c.bf16 %v2939_v57, %v2937_v56 }
 0x338   : > { %v3022_v61 = vpack.c.bf16 %v2940_v59, %v2938_v58  ;;  %v2516_v63 = vpop.f32.mrb[60].mxu0 }
 0x339   : > { %3084 = vst [vmem:[#allocation2 + $0xf0] sm:$0xff] %v11873_v60  ;;  %v2829_v0 = vadd.f32 %v11654_v39, %v2516_v63  ;;  %v2518_v1 = vpop.f32.mrb[61].mxu0  ;;  %v11877_v2 = vld [vmem:[#allocation2 + $0xe8] sm:$0xff] }
 0x33a   : > { %3085 = vst.msk [vmem:[#allocation2 + $0xf8] sm:$0xff] %vm3050_vm2, %v3022_v61  ;;  %v2830_v3 = vadd.f32 %v11658_v40, %v2518_v1  ;;  %v2520_v5 = vpop.f32.mrb[62].mxu0  ;;  %8987 = vmatprep.mubr.msk.bf16.mxu1 %vm3050_vm2, %v11877_v2 }
 0x33b   : > { %v2831_v6 = vadd.f32 %v11654_v39, %v2520_v5  ;;  %v2522_v7 = vpop.f32.mrb[63].mxu0  ;;  %3682 = vmatmul.mubr.bf16.gmra.mrb[52].mxu1 %v11857_v43  ;;  %v2941_v10 = vmax.f32 %v2829_v0, 0.0 }
 0x33c   : > { %v2832_v8 = vadd.f32 %v11658_v40, %v2522_v7  ;;  %v2942_v12 = vmax.f32 %v2830_v3, 0.0 }
 0x33d   : > { %v2943_v11 = vmax.f32 %v2831_v6, 0.0 }
 0x33e   : > { %v2944_v13 = vmax.f32 %v2832_v8, 0.0 }
 0x33f   : > { %v11886_v14 = vpack.c.bf16 %v2943_v11, %v2941_v10 }
 0x340   : > { %v3024_v15 = vpack.c.bf16 %v2944_v13, %v2942_v12  ;;  %v2526_v16 = vpop.f32.mrb[64].mxu0 }
 0x341   : > { %3086 = vst [vmem:[#allocation2 + $0x100] sm:$0xff] %v11886_v14  ;;  %v2833_v17 = vadd.f32 %v11654_v39, %v2526_v16  ;;  %v2528_v18 = vpop.f32.mrb[65].mxu0  ;;  %v11890_v20 = vld [vmem:[#allocation2 + $0xf8] sm:$0xff] }
 0x342   : > { %3087 = vst.msk [vmem:[#allocation2 + $0x108] sm:$0xff] %vm3050_vm2, %v3024_v15  ;;  %v2834_v21 = vadd.f32 %v11658_v40, %v2528_v18  ;;  %v2530_v23 = vpop.f32.mrb[66].mxu0  ;;  %8988 = vmatprep.mubr.msk.bf16.mxu1 %vm3050_vm2, %v11890_v20 }
 0x343   : > { %v2835_v24 = vadd.f32 %v11654_v39, %v2530_v23  ;;  %v2532_v25 = vpop.f32.mrb[67].mxu0  ;;  %3692 = vmatmul.mubr.bf16.gmra.mrb[56].mxu1 %v11873_v60  ;;  %v2945_v28 = vmax.f32 %v2833_v17, 0.0 }
 0x344   : > { %v2836_v26 = vadd.f32 %v11658_v40, %v2532_v25  ;;  %v2946_v30 = vmax.f32 %v2834_v21, 0.0 }
 0x345   : > { %v2947_v29 = vmax.f32 %v2835_v24, 0.0 }
 0x346   : > { %v2948_v31 = vmax.f32 %v2836_v26, 0.0 }
 0x347   : > { %v11899_v32 = vpack.c.bf16 %v2947_v29, %v2945_v28 }
 0x348   : > { %v3026_v33 = vpack.c.bf16 %v2948_v31, %v2946_v30  ;;  %v2536_v35 = vpop.f32.mrb[68].mxu0 }
 0x349   : > { %3088 = vst [vmem:[#allocation2 + $0x110] sm:$0xff] %v11899_v32  ;;  %v2837_v37 = vadd.f32 %v11654_v39, %v2536_v35  ;;  %v2538_v42 = vpop.f32.mrb[69].mxu0  ;;  %v11903_v44 = vld [vmem:[#allocation2 + $0x108] sm:$0xff] }
 0x34a   : > { %3089 = vst.msk [vmem:[#allocation2 + $0x118] sm:$0xff] %vm3050_vm2, %v3026_v33  ;;  %v2838_v45 = vadd.f32 %v11658_v40, %v2538_v42  ;;  %v2540_v46 = vpop.f32.mrb[70].mxu0  ;;  %8989 = vmatprep.mubr.msk.bf16.mxu1 %vm3050_vm2, %v11903_v44 }
 0x34b   : > { %v2839_v47 = vadd.f32 %v11654_v39, %v2540_v46  ;;  %v2542_v49 = vpop.f32.mrb[71].mxu0  ;;  %3702 = vmatmul.mubr.bf16.gmra.mrb[60].mxu1 %v11886_v14  ;;  %v2949_v52 = vmax.f32 %v2837_v37, 0.0 }
 0x34c   : > { %v2840_v50 = vadd.f32 %v11658_v40, %v2542_v49  ;;  %v2950_v62 = vmax.f32 %v2838_v45, 0.0 }
 0x34d   : > { %v2951_v53 = vmax.f32 %v2839_v47, 0.0 }
 0x34e   : > { %v2952_v54 = vmax.f32 %v2840_v50, 0.0 }
 0x34f   : > { %v11912_v56 = vpack.c.bf16 %v2951_v53, %v2949_v52 }
 0x350   : > { %v3028_v57 = vpack.c.bf16 %v2952_v54, %v2950_v62  ;;  %v2546_v58 = vpop.f32.mrb[72].mxu0 }
 0x351   : > { %3090 = vst [vmem:[#allocation2 + $0x120] sm:$0xff] %v11912_v56  ;;  %v2841_v59 = vadd.f32 %v11654_v39, %v2546_v58  ;;  %v2548_v61 = vpop.f32.mrb[73].mxu0  ;;  %v11916_v63 = vld [vmem:[#allocation2 + $0x118] sm:$0xff] }
 0x352   : > { %3091 = vst.msk [vmem:[#allocation2 + $0x128] sm:$0xff] %vm3050_vm2, %v3028_v57  ;;  %v2842_v0 = vadd.f32 %v11658_v40, %v2548_v61  ;;  %v2550_v1 = vpop.f32.mrb[74].mxu0  ;;  %8990 = vmatprep.mubr.msk.bf16.mxu1 %vm3050_vm2, %v11916_v63 }
 0x353   : > { %v2843_v3 = vadd.f32 %v11654_v39, %v2550_v1  ;;  %v2552_v5 = vpop.f32.mrb[75].mxu0  ;;  %3712 = vmatmul.mubr.bf16.gmra.mrb[64].mxu1 %v11899_v32  ;;  %v2953_v7 = vmax.f32 %v2841_v59, 0.0 }
 0x354   : > { %v2844_v6 = vadd.f32 %v11658_v40, %v2552_v5  ;;  %v2954_v10 = vmax.f32 %v2842_v0, 0.0 }
 0x355   : > { %v2955_v8 = vmax.f32 %v2843_v3, 0.0 }
 0x356   : > { %v2956_v11 = vmax.f32 %v2844_v6, 0.0 }
 0x357   : > { %v11925_v12 = vpack.c.bf16 %v2955_v8, %v2953_v7 }
 0x358   : > { %v3030_v13 = vpack.c.bf16 %v2956_v11, %v2954_v10  ;;  %v2556_v15 = vpop.f32.mrb[76].mxu0 }
 0x359   : > { %3092 = vst [vmem:[#allocation2 + $0x130] sm:$0xff] %v11925_v12  ;;  %v2845_v16 = vadd.f32 %v11654_v39, %v2556_v15  ;;  %v2558_v17 = vpop.f32.mrb[77].mxu0  ;;  %v11929_v18 = vld [vmem:[#allocation2 + $0x128] sm:$0xff] }
 0x35a   : > { %3093 = vst.msk [vmem:[#allocation2 + $0x138] sm:$0xff] %vm3050_vm2, %v3030_v13  ;;  %v2846_v21 = vadd.f32 %v11658_v40, %v2558_v17  ;;  %v2560_v23 = vpop.f32.mrb[78].mxu0  ;;  %8991 = vmatprep.mubr.msk.bf16.mxu1 %vm3050_vm2, %v11929_v18 }
 0x35b   : > { %v2847_v24 = vadd.f32 %v11654_v39, %v2560_v23  ;;  %v2562_v25 = vpop.f32.mrb[79].mxu0  ;;  %3722 = vmatmul.mubr.bf16.gmra.mrb[68].mxu1 %v11912_v56  ;;  %v2957_v28 = vmax.f32 %v2845_v16, 0.0 }
 0x35c   : > { %v2848_v26 = vadd.f32 %v11658_v40, %v2562_v25  ;;  %v2958_v30 = vmax.f32 %v2846_v21, 0.0 }
 0x35d   : > { %v2959_v29 = vmax.f32 %v2847_v24, 0.0 }
 0x35e   : > { %v2960_v31 = vmax.f32 %v2848_v26, 0.0 }
 0x35f   : > { %v11938_v33 = vpack.c.bf16 %v2959_v29, %v2957_v28 }
 0x360   : > { %v3032_v35 = vpack.c.bf16 %v2960_v31, %v2958_v30  ;;  %v2566_v37 = vpop.f32.mrb[80].mxu0 }
 0x361   : > { %3094 = vst [vmem:[#allocation2 + $0x140] sm:$0xff] %v11938_v33  ;;  %v2849_v42 = vadd.f32 %v11654_v39, %v2566_v37  ;;  %v2568_v45 = vpop.f32.mrb[81].mxu0  ;;  %v11942_v46 = vld [vmem:[#allocation2 + $0x138] sm:$0xff] }
 0x362   : > { %3095 = vst.msk [vmem:[#allocation2 + $0x148] sm:$0xff] %vm3050_vm2, %v3032_v35  ;;  %v2850_v47 = vadd.f32 %v11658_v40, %v2568_v45  ;;  %v2570_v49 = vpop.f32.mrb[82].mxu0  ;;  %8992 = vmatprep.mubr.msk.bf16.mxu1 %vm3050_vm2, %v11942_v46 }
 0x363   : > { %v2851_v50 = vadd.f32 %v11654_v39, %v2570_v49  ;;  %v2572_v52 = vpop.f32.mrb[83].mxu0  ;;  %3732 = vmatmul.mubr.bf16.gmra.mrb[72].mxu1 %v11925_v12  ;;  %v2961_v62 = vmax.f32 %v2849_v42, 0.0 }
 0x364   : > { %v2852_v53 = vadd.f32 %v11658_v40, %v2572_v52  ;;  %v2962_v57 = vmax.f32 %v2850_v47, 0.0 }
 0x365   : > { %v2963_v54 = vmax.f32 %v2851_v50, 0.0 }
 0x366   : > { %v2964_v58 = vmax.f32 %v2852_v53, 0.0 }
 0x367   : > { %v11951_v59 = vpack.c.bf16 %v2963_v54, %v2961_v62 }
 0x368   : > { %v3034_v61 = vpack.c.bf16 %v2964_v58, %v2962_v57  ;;  %v2576_v0 = vpop.f32.mrb[84].mxu0 }
 0x369   : > { %3096 = vst [vmem:[#allocation2 + $0x150] sm:$0xff] %v11951_v59  ;;  %v2853_v1 = vadd.f32 %v11654_v39, %v2576_v0  ;;  %v2578_v3 = vpop.f32.mrb[85].mxu0  ;;  %v11955_v5 = vld [vmem:[#allocation2 + $0x148] sm:$0xff] }
 0x36a   : > { %3097 = vst.msk [vmem:[#allocation2 + $0x158] sm:$0xff] %vm3050_vm2, %v3034_v61  ;;  %v2854_v6 = vadd.f32 %v11658_v40, %v2578_v3  ;;  %v2580_v7 = vpop.f32.mrb[86].mxu0  ;;  %8993 = vmatprep.mubr.msk.bf16.mxu1 %vm3050_vm2, %v11955_v5 }
 0x36b   : > { %v2855_v8 = vadd.f32 %v11654_v39, %v2580_v7  ;;  %v2582_v10 = vpop.f32.mrb[87].mxu0  ;;  %3742 = vmatmul.mubr.bf16.gmra.mrb[76].mxu1 %v11938_v33  ;;  %v2965_v13 = vmax.f32 %v2853_v1, 0.0 }
 0x36c   : > { %v2856_v11 = vadd.f32 %v11658_v40, %v2582_v10  ;;  %v2966_v16 = vmax.f32 %v2854_v6, 0.0 }
 0x36d   : > { %v2967_v15 = vmax.f32 %v2855_v8, 0.0 }
 0x36e   : > { %v2968_v17 = vmax.f32 %v2856_v11, 0.0 }
 0x36f   : > { %v11964_v21 = vpack.c.bf16 %v2967_v15, %v2965_v13 }
 0x370   : > { %v3036_v23 = vpack.c.bf16 %v2968_v17, %v2966_v16  ;;  %v2586_v24 = vpop.f32.mrb[88].mxu0 }
 0x371   : > { %v2857_v25 = vadd.f32 %v11654_v39, %v2586_v24  ;;  %v2588_v26 = vpop.f32.mrb[89].mxu0  ;;  %v11967_v28 = vld [vmem:[#allocation2 + $0x158] sm:$0xff] }
 0x372   : > { %3099 = vst.msk [vmem:[#allocation2 + $0x168] sm:$0xff] %vm3050_vm2, %v3036_v23  ;;  %v2858_v29 = vadd.f32 %v11658_v40, %v2588_v26  ;;  %v2590_v30 = vpop.f32.mrb[90].mxu0  ;;  %8994 = vmatprep.mubr.msk.bf16.mxu1 %vm3050_vm2, %v11967_v28 }
 0x373   : > { %v2859_v31 = vadd.f32 %v11654_v39, %v2590_v30  ;;  %v2592_v35 = vpop.f32.mrb[91].mxu0  ;;  %3752 = vmatmul.mubr.bf16.gmra.mrb[80].mxu1 %v11951_v59  ;;  %v2969_v42 = vmax.f32 %v2857_v25, 0.0 }
 0x374   : > { %v2860_v37 = vadd.f32 %v11658_v40, %v2592_v35  ;;  %v2970_v47 = vmax.f32 %v2858_v29, 0.0 }
 0x375   : > { %v2971_v45 = vmax.f32 %v2859_v31, 0.0 }
 0x376   : > { %v2972_v49 = vmax.f32 %v2860_v37, 0.0 }
 0x377   : > { %v11976_v50 = vpack.c.bf16 %v2971_v45, %v2969_v42 }
 0x378   : > { %v3038_v52 = vpack.c.bf16 %v2972_v49, %v2970_v47  ;;  %v2596_v53 = vpop.f32.mrb[92].mxu0 }
 0x379   : > { %v2861_v62 = vadd.f32 %v11654_v39, %v2596_v53  ;;  %v2598_v54 = vpop.f32.mrb[93].mxu0  ;;  %v11979_v57 = vld [vmem:[#allocation2 + $0x168] sm:$0xff] }
 0x37a   : > { %3101 = vst.msk [vmem:[#allocation2 + $0x178] sm:$0xff] %vm3050_vm2, %v3038_v52  ;;  %v2862_v58 = vadd.f32 %v11658_v40, %v2598_v54  ;;  %v2600_v61 = vpop.f32.mrb[94].mxu0  ;;  %8995 = vmatprep.mubr.msk.bf16.mxu1 %vm3050_vm2, %v11979_v57 }
 0x37b   : > { %v2863_v0 = vadd.f32 %v11654_v39, %v2600_v61  ;;  %v2602_v1 = vpop.f32.mrb[95].mxu0  ;;  %3762 = vmatmul.mubr.bf16.gmra.mrb[84].mxu1 %v11964_v21  ;;  %v2973_v6 = vmax.f32 %v2861_v62, 0.0 }
 0x37c   : > { %v2864_v3 = vadd.f32 %v11658_v40, %v2602_v1  ;;  %v2974_v8 = vmax.f32 %v2862_v58, 0.0 }
 0x37d   : > { %v2975_v7 = vmax.f32 %v2863_v0, 0.0 }
 0x37e   : > { %v2976_v10 = vmax.f32 %v2864_v3, 0.0 }
 0x37f   : > { %v11988_v11 = vpack.c.bf16 %v2975_v7, %v2973_v6 }
 0x380   : > { %v3040_v13 = vpack.c.bf16 %v2976_v10, %v2974_v8  ;;  %v2606_v15 = vpop.f32.mrb[96].mxu0 }
 0x381   : > { %v2865_v16 = vadd.f32 %v11654_v39, %v2606_v15  ;;  %v2608_v17 = vpop.f32.mrb[97].mxu0  ;;  %v11991_v23 = vld [vmem:[#allocation2 + $0x178] sm:$0xff] }
 0x382   : > { %3103 = vst.msk [vmem:[#allocation2 + $0x188] sm:$0xff] %vm3050_vm2, %v3040_v13  ;;  %v2866_v24 = vadd.f32 %v11658_v40, %v2608_v17  ;;  %v2610_v25 = vpop.f32.mrb[98].mxu0  ;;  %8996 = vmatprep.mubr.msk.bf16.mxu1 %vm3050_vm2, %v11991_v23 }
 0x383   : > { %v2867_v26 = vadd.f32 %v11654_v39, %v2610_v25  ;;  %v2612_v29 = vpop.f32.mrb[99].mxu0  ;;  %3772 = vmatmul.mubr.bf16.gmra.mrb[88].mxu1 %v11976_v50  ;;  %v2977_v31 = vmax.f32 %v2865_v16, 0.0 }
 0x384   : > { %v2868_v30 = vadd.f32 %v11658_v40, %v2612_v29  ;;  %v2978_v37 = vmax.f32 %v2866_v24, 0.0 }
 0x385   : > { %v2979_v35 = vmax.f32 %v2867_v26, 0.0 }
 0x386   : > { %v2980_v42 = vmax.f32 %v2868_v30, 0.0 }
 0x387   : > { %v12000_v45 = vpack.c.bf16 %v2979_v35, %v2977_v31 }
 0x388   : > { %v3042_v47 = vpack.c.bf16 %v2980_v42, %v2978_v37  ;;  %v2616_v49 = vpop.f32.mrb[100].mxu0 }
 0x389   : > { %v2869_v52 = vadd.f32 %v11654_v39, %v2616_v49  ;;  %v2618_v53 = vpop.f32.mrb[101].mxu0  ;;  %v12003_v62 = vld [vmem:[#allocation2 + $0x188] sm:$0xff] }
 0x38a   : > { %3105 = vst.msk [vmem:[#allocation2 + $0x198] sm:$0xff] %vm3050_vm2, %v3042_v47  ;;  %v2870_v54 = vadd.f32 %v11658_v40, %v2618_v53  ;;  %v2620_v58 = vpop.f32.mrb[102].mxu0  ;;  %8997 = vmatprep.mubr.msk.bf16.mxu1 %vm3050_vm2, %v12003_v62 }
 0x38b   : > { %v2871_v61 = vadd.f32 %v11654_v39, %v2620_v58  ;;  %v2622_v0 = vpop.f32.mrb[103].mxu0  ;;  %3782 = vmatmul.mubr.bf16.gmra.mrb[92].mxu1 %v11988_v11  ;;  %v2981_v3 = vmax.f32 %v2869_v52, 0.0 }
 0x38c   : > { %v2872_v1 = vadd.f32 %v11658_v40, %v2622_v0  ;;  %v2982_v7 = vmax.f32 %v2870_v54, 0.0 }
 0x38d   : > { %v2983_v6 = vmax.f32 %v2871_v61, 0.0 }
 0x38e   : > { %v2984_v8 = vmax.f32 %v2872_v1, 0.0 }
 0x38f   : > { %v12012_v10 = vpack.c.bf16 %v2983_v6, %v2981_v3 }
 0x390   : > { %v3044_v13 = vpack.c.bf16 %v2984_v8, %v2982_v7  ;;  %v2626_v15 = vpop.f32.mrb[104].mxu0 }
 0x391   : > { %v2873_v16 = vadd.f32 %v11654_v39, %v2626_v15  ;;  %v2628_v17 = vpop.f32.mrb[105].mxu0  ;;  %v12015_v24 = vld [vmem:[#allocation2 + $0x198] sm:$0xff] }
 0x392   : > { %3107 = vst.msk [vmem:[#allocation2 + $0x1a8] sm:$0xff] %vm3050_vm2, %v3044_v13  ;;  %v2874_v25 = vadd.f32 %v11658_v40, %v2628_v17  ;;  %v2630_v26 = vpop.f32.mrb[106].mxu0  ;;  %8998 = vmatprep.mubr.msk.bf16.mxu1 %vm3050_vm2, %v12015_v24 }
 0x393   : > { %v2875_v29 = vadd.f32 %v11654_v39, %v2630_v26  ;;  %v2632_v30 = vpop.f32.mrb[107].mxu0  ;;  %3792 = vmatmul.mubr.bf16.gmra.mrb[96].mxu1 %v12000_v45  ;;  %v2985_v35 = vmax.f32 %v2873_v16, 0.0 }
 0x394   : > { %v2876_v31 = vadd.f32 %v11658_v40, %v2632_v30  ;;  %v2986_v42 = vmax.f32 %v2874_v25, 0.0  ;;  %v10878_v30 = vld [vmem:[%s13215_s3 + $0x1f4] ss:$8 sps:$4 sm:$0xff]  }
 0x395   : > { %v2987_v37 = vmax.f32 %v2875_v29, 0.0  ;;  %v3113_v29 = vld [vmem:[#allocation2 + $0x8] sm:$0xff] }
 0x396   : > { %v2988_v47 = vmax.f32 %v2876_v31, 0.0  ;;  %v12056_v31 = vld [vmem:[#allocation2] sm:$0xff] }
 0x397   : > { %v12024_v49 = vpack.c.bf16 %v2987_v37, %v2985_v35  ;;  %v3115_v35 = vld [vmem:[#allocation2 + $0x18] sm:$0xff] }
 0x398   : > { %v3046_v52 = vpack.c.bf16 %v2988_v47, %v2986_v42  ;;  %v2636_v53 = vpop.f32.mrb[108].mxu0  ;;  %v10876_v37 = vld [vmem:[%s13215_s3 + $0x1f0] ss:$8 sps:$4 sm:$0xff]   ;;  %v10881_v42 = vld [vmem:[%s13215_s3 + $0x204] ss:$8 sps:$4 sm:$0xff]  }
 0x399   : > { %v2877_v54 = vadd.f32 %v11654_v39, %v2636_v53  ;;  %v2638_v58 = vpop.f32.mrb[109].mxu0  ;;  %v12027_v61 = vld [vmem:[#allocation2 + $0x1a8] sm:$0xff]  ;;  %v3114_v53 = vld [vmem:[#allocation2 + $0x10] sm:$0xff] }
 0x39a   : > { %3109 = vst.msk [vmem:[#allocation2 + $0x1b8] sm:$0xff] %vm3050_vm2, %v3046_v52  ;;  %v2878_v0 = vadd.f32 %v11658_v40, %v2638_v58  ;;  %v2640_v1 = vpop.f32.mrb[110].mxu0  ;;  %8999 = vmatprep.mubr.msk.bf16.mxu1 %vm3050_vm2, %v12027_v61  ;;  %v10879_v47 = vld [vmem:[%s13215_s3 + $0x200] ss:$8 sps:$4 sm:$0xff]   ;;  %v10884_v52 = vld [vmem:[%s13215_s3 + $0x214] ss:$8 sps:$4 sm:$0xff]  }
 0x39b   : > { %v2879_v3 = vadd.f32 %v11654_v39, %v2640_v1  ;;  %v2642_v6 = vpop.f32.mrb[111].mxu0  ;;  %3802 = vmatmul.mubr.bf16.gmra.mrb[100].mxu1 %v12012_v10  ;;  %v2989_v8 = vmax.f32 %v2877_v54, 0.0  ;;  %v12072_v54 = vld [vmem:[#allocation2 + $0x28] sm:$0xff]  ;;  %v10882_v58 = vld [vmem:[%s13215_s3 + $0x210] ss:$8 sps:$4 sm:$0xff]  }
 0x39c   : > { %v2880_v7 = vadd.f32 %v11658_v40, %v2642_v6  ;;  %v2990_v15 = vmax.f32 %v2878_v0, 0.0  ;;  %v10873_v40 = vld [vmem:[%s13215_s3 + $0x1e0] ss:$8 sps:$4 sm:$0xff]   ;;  %v10887_v0 = vld [vmem:[%s13215_s3 + $0x224] ss:$8 sps:$4 sm:$0xff]  }
 0x39d   : > { %v2991_v13 = vmax.f32 %v2879_v3, 0.0  ;;  %v10885_v1 = vld [vmem:[%s13215_s3 + $0x220] ss:$8 sps:$4 sm:$0xff]   ;;  %v10890_v3 = vld [vmem:[%s13215_s3 + $0x234] ss:$8 sps:$4 sm:$0xff]  }
 0x39e   : > { %v2992_v16 = vmax.f32 %v2880_v7, 0.0  ;;  %v12088_v6 = vld [vmem:[#allocation2 + $0x20] sm:$0xff]  ;;  %v12091_v7 = vld [vmem:[#allocation2 + $0x38] sm:$0xff] }
 0x39f   : > { %v12036_v17 = vpack.c.bf16 %v2991_v13, %v2989_v8  ;;  %v10888_v8 = vld [vmem:[%s13215_s3 + $0x230] ss:$8 sps:$4 sm:$0xff]   ;;  %v10893_v13 = vld [vmem:[%s13215_s3 + $0x244] ss:$8 sps:$4 sm:$0xff]  }
 0x3a0   : > { %v3048_v25 = vpack.c.bf16 %v2992_v16, %v2990_v15  ;;  %v10891_v15 = vld [vmem:[%s13215_s3 + $0x240] ss:$8 sps:$4 sm:$0xff]   ;;  %v10896_v16 = vld [vmem:[%s13215_s3 + $0x254] ss:$8 sps:$4 sm:$0xff]  }
 0x3a1   : > { %v12038_v26 = vld [vmem:[#allocation2 + $0x1b8] sm:$0xff] }
 0x3a2   : > { %3111 = vst.msk [vmem:[#allocation2 + $0x1c8] sm:$0xff] %vm3050_vm2, %v3048_v25  ;;  %9000 = vmatprep.mubr.msk.bf16.mxu1 %vm3050_vm2, %v12038_v26  ;;  %v12107_v25 = vld [vmem:[#allocation2 + $0x30] sm:$0xff] }
 0x3a3   : > { %3812 = vmatmul.mubr.bf16.gmra.mrb[104].mxu1 %v12024_v49 }
 0x3a9   : > { %v12044_v39 = vld [vmem:[#allocation2 + $0x1c8] sm:$0xff] }
 0x3aa   : > { %9001 = vmatprep.mubr.msk.bf16.mxu1 %vm3050_vm2, %v12044_v39 }
 0x3ab   : > { %3822 = vmatmul.mubr.bf16.gmra.mrb[108].mxu1 %v12036_v17 }
 0x3ac   : > { %9032 = vmatprep.mubr.msk.bf16.mxu1 %vm3050_vm2, %v3113_v29  ;;  %v12110_v29 = vld [vmem:[#allocation2 + $0x48] sm:$0xff] }
 0x3b3   : > { %4099 = vmatmul.mubr.bf16.vlgmr.msra.gmra.mrb[0].mxu1 %v12056_v31 }
 0x3b4   : > { %9033 = vmatprep.mubr.msk.bf16.mxu1 %vm3050_vm2, %v3115_v35  ;;  %4702 = vmatpush1.bf16.msra.mxu1 %v10873_v40  ;;  %v10894_v40 = vld [vmem:[%s13215_s3 + $0x250] ss:$8 sps:$4 sm:$0xff]   ;;  %v10897_v35 = vld [vmem:[%s13215_s3 + $0x260] ss:$8 sps:$4 sm:$0xff]  }
 0x3b5   : > { %4703 = vmatprep.subr.bf16.mxu1 %v10878_v30  ;;  %v10899_v30 = vld [vmem:[%s13215_s3 + $0x264] ss:$8 sps:$4 sm:$0xff]  }
 0x3b8   : > { %4704 = vmatpush1.bf16.msra.mxu1 %v10876_v37  ;;  %v10902_v37 = vld [vmem:[%s13215_s3 + $0x274] ss:$8 sps:$4 sm:$0xff]  }
 0x3b9   : > { %4705 = vmatprep.subr.bf16.mxu1 %v10881_v42  ;;  %v12126_v42 = vld [vmem:[#allocation2 + $0x40] sm:$0xff] }
 0x3bb   : > { %4109 = vmatmul.mubr.bf16.gmra.mrb[4].mxu1 %v3114_v53  ;;  %v10905_v53 = vld [vmem:[%s13215_s3 + $0x284] ss:$8 sps:$4 sm:$0xff]  }
 0x3bc   : > { %9034 = vmatprep.mubr.msk.bf16.mxu1 %vm3050_vm2, %v12072_v54  ;;  %4706 = vmatpush1.bf16.msra.mxu1 %v10879_v47  ;;  %v12129_v47 = vld [vmem:[#allocation2 + $0x58] sm:$0xff] }
 0x3bd   : > { %4707 = vmatprep.subr.bf16.mxu1 %v10884_v52  ;;  %v10900_v52 = vld [vmem:[%s13215_s3 + $0x270] ss:$8 sps:$4 sm:$0xff]  }
 0x3c0   : > { %4708 = vmatpush1.bf16.msra.mxu1 %v10882_v58  ;;  %v10903_v58 = vld [vmem:[%s13215_s3 + $0x280] ss:$8 sps:$4 sm:$0xff]  }
 0x3c1   : > { %4709 = vmatprep.subr.bf16.mxu1 %v10887_v0  ;;  %v10908_v0 = vld [vmem:[%s13215_s3 + $0x294] ss:$8 sps:$4 sm:$0xff]  }
 0x3c3   : > { %4119 = vmatmul.mubr.bf16.gmra.mrb[8].mxu1 %v12088_v6 }
 0x3c4   : > { %9035 = vmatprep.mubr.msk.bf16.mxu1 %vm3050_vm2, %v12091_v7  ;;  %4710 = vmatpush1.bf16.msra.mxu1 %v10885_v1  ;;  %v12145_v1 = vld [vmem:[#allocation2 + $0x50] sm:$0xff] }
 0x3c5   : > { %4711 = vmatprep.subr.bf16.mxu1 %v10890_v3  ;;  %v12148_v3 = vld [vmem:[#allocation2 + $0x68] sm:$0xff] }
 0x3c8   : > { %4712 = vmatpush1.bf16.msra.mxu1 %v10888_v8  ;;  %v10906_v8 = vld [vmem:[%s13215_s3 + $0x290] ss:$8 sps:$4 sm:$0xff]  }
 0x3c9   : > { %4713 = vmatprep.subr.bf16.mxu1 %v10893_v13  ;;  %v12155_v13 = vld [vmem:[#allocation2 + $0x60] sm:$0xff] }
 0x3cb   : > { %4129 = vmatmul.mubr.bf16.gmra.mrb[12].mxu1 %v12107_v25 }
 0x3cc   : > { %9036 = vmatprep.mubr.msk.bf16.mxu1 %vm3050_vm2, %v12110_v29  ;;  %4714 = vmatpush1.bf16.msra.mxu1 %v10891_v15  ;;  %v12158_v15 = vld [vmem:[#allocation2 + $0x78] sm:$0xff] }
 0x3cd   : > { %4715 = vmatprep.subr.bf16.mxu1 %v10896_v16  ;;  %v10909_v16 = vld [vmem:[%s13215_s3 + $0x2a0] ss:$8 sps:$4 sm:$0xff]  }
 0x3d0   : > { %4716 = vmatpush1.bf16.msra.mxu1 %v10894_v40  ;;  %v10911_v40 = vld [vmem:[%s13215_s3 + $0x2a4] ss:$8 sps:$4 sm:$0xff]  }
 0x3d1   : > { %4717 = vmatprep.subr.bf16.mxu1 %v10899_v30  ;;  %v12168_v30 = vld [vmem:[#allocation2 + $0x70] sm:$0xff] }
 0x3d3   : > { %4139 = vmatmul.mubr.bf16.gmra.mrb[16].mxu1 %v12126_v42 }
 0x3d4   : > { %9037 = vmatprep.mubr.msk.bf16.mxu1 %vm3050_vm2, %v12129_v47  ;;  %4718 = vmatpush1.bf16.msra.mxu1 %v10897_v35  ;;  %v12173_v35 = vld [vmem:[#allocation2 + $0x80] sm:$0xff] }
 0x3d5   : > { %4719 = vmatprep.subr.bf16.mxu1 %v10902_v37  ;;  %v10912_v37 = vld [vmem:[%s13215_s3 + $0x2b0] ss:$8 sps:$4 sm:$0xff]  }
 0x3d8   : > { %4720 = vmatpush1.bf16.msra.mxu1 %v10900_v52  ;;  %v10914_v52 = vld [vmem:[%s13215_s3 + $0x2b4] ss:$8 sps:$4 sm:$0xff]  }
 0x3d9   : > { %4721 = vmatprep.subr.bf16.mxu1 %v10905_v53  ;;  %v12184_v53 = vld [vmem:[#allocation2 + $0x90] sm:$0xff] }
 0x3db   : > { %4149 = vmatmul.mubr.bf16.gmra.mrb[20].mxu1 %v12145_v1 }
 0x3dc   : > { %9038 = vmatprep.mubr.msk.bf16.mxu1 %vm3050_vm2, %v12148_v3  ;;  %4722 = vmatpush1.bf16.msra.mxu1 %v10903_v58  ;;  %v10917_v58 = vld [vmem:[%s13215_s3 + $0x2c4] ss:$8 sps:$4 sm:$0xff]  }
 0x3dd   : > { %4723 = vmatprep.subr.bf16.mxu1 %v10908_v0  ;;  %v10936_v0 = vld [vmem:[%s13221_s9 + $0x48] sm:$0xff]  }
 0x3e0   : > { %4724 = vmatpush1.bf16.msra.mxu1 %v10906_v8  ;;  %v10939_v8 = vld [vmem:[%s13222_s10 + $0x50] sm:$0xff]  }
 0x3e1   : > { %4725 = vmatprep.subr.bf16.mxu1 %v10911_v40  ;;  %v10941_v40 = vld [vmem:[%s13222_s10 + $0x58] sm:$0xff]  }
 0x3e3   : > { %4159 = vmatmul.mubr.bf16.gmra.mrb[24].mxu1 %v12155_v13 }
 0x3e4   : > { %9039 = vmatprep.mubr.msk.bf16.mxu1 %vm3050_vm2, %v12158_v15  ;;  %4726 = vmatpush1.bf16.msra.mxu1 %v10909_v16  ;;  %v10940_v16 = vld [vmem:[%s13221_s9 + $0x58] sm:$0xff]  }
 0x3e5   : > { %4727 = vmatprep.subr.bf16.mxu1 %v10914_v52  ;;  %v4407_v52 = vld [vmem:[#allocation2 + $0xf8] sm:$0xff] }
 0x3e8   : > { %4728 = vmatpush1.bf16.msra.mxu1 %v10912_v37  ;;  %v4404_v37 = vld [vmem:[#allocation2 + $0xe0] sm:$0xff] }
 0x3e9   : > { %4729 = vmatprep.subr.bf16.mxu1 %v10917_v58  ;;  %v10947_v58 = vld [vmem:[%s13222_s10 + $0x70] sm:$0xff]  }
 0x3eb   : > { %4169 = vmatmul.mubr.bf16.gmra.mrb[28].mxu1 %v12168_v30 }
 0x3ec   : > { %9040 = vmatprep.mubr.msk.bf16.mxu1 %vm3050_vm2, %v11784_v19  ;;  %v12189_v19 = vld [vmem:[#allocation2 + $0xa0] sm:$0xff] }
 0x3f3   : > { %4179 = vmatmul.mubr.bf16.gmra.mrb[32].mxu1 %v12173_v35 }
 0x3f4   : > { %9041 = vmatprep.mubr.msk.bf16.mxu1 %vm3050_vm2, %v11799_v41  ;;  %v10915_v41 = vld [vmem:[%s13215_s3 + $0x2c0] ss:$8 sps:$4 sm:$0xff]  }
 0x3f5   : > { %4730 = vmatpush1.bf16.msra.mxu1 %v10915_v41  ;;  %v10946_v41 = vld [vmem:[%s13221_s9 + $0x70] sm:$0xff]  }
 0x3f6   : > { %5873 = vmatprep.subr.bf16.mxu1 %v12056_v31 }
 0x3fb   : > { %4189 = vmatmul.mubr.bf16.gmra.mrb[36].mxu1 %v12184_v53 }
 0x3fc   : > { %9042 = vmatprep.mubr.msk.bf16.mxu1 %vm3050_vm2, %v11811_v55  ;;  %v10920_v55 = vld [vmem:[%s13221_s9 + $0x8] sm:$0xff]  }
 0x403   : > { %4199 = vmatmul.mubr.bf16.gmra.mrb[40].mxu1 %v12189_v19 }
 0x404   : > { %9043 = vmatprep.mubr.msk.bf16.mxu1 %vm3050_vm2, %v11829_v9  ;;  %v10919_v9 = vld [vmem:[%s13222_s10] sm:$0xff]  }
 0x40b   : > { %4209 = vmatmul.mubr.bf16.gmra.mrb[44].mxu1 %v11807_v51  ;;  %v10918_v51 = vld [vmem:[%s13221_s9] sm:$0xff]  }
 0x40c   : > { %9044 = vmatprep.mubr.msk.bf16.mxu1 %vm3050_vm2, %v11848_v27  ;;  %5609 = vmatpush1.bf16.msra.mxu0 %v10918_v51  ;;  %v10924_v27 = vld [vmem:[%s13221_s9 + $0x18] sm:$0xff]   ;;  %v4406_v51 = vld [vmem:[#allocation2 + $0xf0] sm:$0xff] }
 0x40d   : > { %5610 = vmatprep.subr.bf16.mxu0 %v12056_v31 }
 0x410   : > { %5611 = vmatpush1.bf16.msra.mxu0 %v10920_v55  ;;  %v4409_v55 = vld [vmem:[#allocation2 + $0x108] sm:$0xff] }
 0x411   : > { %5612 = vmatprep.subr.bf16.mxu0 %v12056_v31 }
 0x413   : > { %4219 = vmatmul.mubr.bf16.gmra.mrb[48].mxu1 %v11825_v4  ;;  %v10922_v4 = vld [vmem:[%s13221_s9 + $0x10] sm:$0xff]  }
 0x414   : > { %9045 = vmatprep.mubr.msk.bf16.mxu1 %vm3050_vm2, %v11861_v48  ;;  %5613 = vmatpush1.bf16.msra.mxu0 %v10922_v4  ;;  %v10925_v48 = vld [vmem:[%s13222_s10 + $0x18] sm:$0xff]   ;;  %v4408_v4 = vld [vmem:[#allocation2 + $0x100] sm:$0xff] }
 0x415   : > { %5614 = vmatprep.subr.bf16.mxu0 %v12056_v31 }
 0x418   : > { %5615 = vmatpush1.bf16.msra.mxu0 %v10924_v27  ;;  %v4412_v27 = vld [vmem:[#allocation2 + $0x120] sm:$0xff] }
 0x419   : > { %5616 = vmatprep.subr.bf16.mxu0 %v12056_v31 }
 0x41b   : > { %4229 = vmatmul.mubr.bf16.gmra.mrb[52].mxu1 %v11844_v22  ;;  %v10921_v22 = vld [vmem:[%s13222_s10 + $0x8] sm:$0xff]  }
 0x41c   : > { %9046 = vmatprep.mubr.msk.bf16.mxu1 %vm3050_vm2, %v11877_v2  ;;  %v10927_v2 = vld [vmem:[%s13222_s10 + $0x20] sm:$0xff]  }
 0x423   : > { %4239 = vmatmul.mubr.bf16.gmra.mrb[56].mxu1 %v11857_v43  ;;  %v10923_v43 = vld [vmem:[%s13222_s10 + $0x10] sm:$0xff]  }
 0x424   : > { %9047 = vmatprep.mubr.msk.bf16.mxu1 %vm3050_vm2, %v11890_v20  ;;  %v10929_v20 = vld [vmem:[%s13222_s10 + $0x28] sm:$0xff]  }
 0x42b   : > { %4249 = vmatmul.mubr.bf16.gmra.mrb[60].mxu1 %v11873_v60  ;;  %v10926_v60 = vld [vmem:[%s13221_s9 + $0x20] sm:$0xff]  }
 0x42c   : > { %9048 = vmatprep.mubr.msk.bf16.mxu1 %vm3050_vm2, %v11903_v44  ;;  %5617 = vmatpush1.bf16.msra.mxu0 %v10926_v60  ;;  %v4395_v44 = vld [vmem:[#allocation2 + $0x98] sm:$0xff]  ;;  %v4418_v60 = vld [vmem:[#allocation2 + $0x150] sm:$0xff] }
 0x42d   : > { %5618 = vmatprep.subr.bf16.mxu0 %v12056_v31 }
 0x433   : > { %4259 = vmatmul.mubr.bf16.gmra.mrb[64].mxu1 %v11886_v14  ;;  %v10928_v14 = vld [vmem:[%s13221_s9 + $0x28] sm:$0xff]  }
 0x434   : > { %9049 = vmatprep.mubr.msk.bf16.mxu1 %vm3050_vm2, %v11916_v63  ;;  %5619 = vmatpush1.bf16.msra.mxu0 %v10928_v14  ;;  %v10931_v63 = vld [vmem:[%s13222_s10 + $0x30] sm:$0xff]  }
 0x435   : > { %5620 = vmatprep.subr.bf16.mxu0 %v12056_v31 }
 0x43b   : > { %4269 = vmatmul.mubr.bf16.gmra.mrb[68].mxu1 %v11899_v32  ;;  %v4393_v32 = vld [vmem:[#allocation2 + $0x88] sm:$0xff] }
 0x43c   : > { %9050 = vmatprep.mubr.msk.bf16.mxu1 %vm3050_vm2, %v11929_v18 }
 0x443   : > { %4279 = vmatmul.mubr.bf16.gmra.mrb[72].mxu1 %v11912_v56  ;;  %v10930_v56 = vld [vmem:[%s13221_s9 + $0x30] sm:$0xff]  }
 0x444   : > { %9051 = vmatprep.mubr.msk.bf16.mxu1 %vm3050_vm2, %v11942_v46  ;;  %5621 = vmatpush1.bf16.msra.mxu0 %v10930_v56 }
 0x445   : > { %5622 = vmatprep.subr.bf16.mxu0 %v12056_v31 }
 0x44b   : > { %4289 = vmatmul.mubr.bf16.gmra.mrb[76].mxu1 %v11925_v12  ;;  %v4397_v12 = vld [vmem:[#allocation2 + $0xa8] sm:$0xff] }
 0x44c   : > { %9052 = vmatprep.mubr.msk.bf16.mxu1 %vm3050_vm2, %v11955_v5 }
 0x453   : > { %4299 = vmatmul.mubr.bf16.gmra.mrb[80].mxu1 %v11938_v33  ;;  %v4399_v33 = vld [vmem:[#allocation2 + $0xb8] sm:$0xff] }
 0x454   : > { %9053 = vmatprep.mubr.msk.bf16.mxu1 %vm3050_vm2, %v11967_v28 }
 0x45b   : > { %4309 = vmatmul.mubr.bf16.gmra.mrb[84].mxu1 %v11951_v59  ;;  %v10932_v59 = vld [vmem:[%s13221_s9 + $0x38] sm:$0xff]  }
 0x45c   : > { %9054 = vmatprep.mubr.msk.bf16.mxu1 %vm3050_vm2, %v11979_v57  ;;  %5623 = vmatpush1.bf16.msra.mxu0 %v10932_v59 }
 0x45d   : > { %5624 = vmatprep.subr.bf16.mxu0 %v12056_v31 }
 0x463   : > { %4319 = vmatmul.mubr.bf16.gmra.mrb[88].mxu1 %v11964_v21 }
 0x464   : > { %9055 = vmatprep.mubr.msk.bf16.mxu1 %vm3050_vm2, %v11991_v23 }
 0x46b   : > { %4329 = vmatmul.mubr.bf16.gmra.mrb[92].mxu1 %v11976_v50 }
 0x46c   : > { %9056 = vmatprep.mubr.msk.bf16.mxu1 %vm3050_vm2, %v12003_v62 }
 0x473   : > { %4339 = vmatmul.mubr.bf16.gmra.mrb[96].mxu1 %v11988_v11 }
 0x474   : > { %9057 = vmatprep.mubr.msk.bf16.mxu1 %vm3050_vm2, %v12015_v24 }
 0x47b   : > { %4349 = vmatmul.mubr.bf16.gmra.mrb[100].mxu1 %v12000_v45 }
 0x47c   : > { %9058 = vmatprep.mubr.msk.bf16.mxu1 %vm3050_vm2, %v12027_v61 }
 0x483   : > { %4359 = vmatmul.mubr.bf16.gmra.mrb[104].mxu1 %v12012_v10 }
 0x484   : > { %9059 = vmatprep.mubr.msk.bf16.mxu1 %vm3050_vm2, %v12038_v26 }
 0x48b   : > { %4369 = vmatmul.mubr.bf16.gmra.mrb[108].mxu1 %v12024_v49 }
 0x48c   : > { %9120 = vmatprep.mubr.msk.bf16.mxu1 %vm3050_vm2, %v12072_v54  ;;  %v10933_v54 = vld [vmem:[%s13222_s10 + $0x38] sm:$0xff]  }
 0x493   : > { %4734 = vmatmul.mubr.bf16.vlgmr.msra.gmra.mrb[0].mxu1 %v12088_v6  ;;  %v4398_v6 = vld [vmem:[#allocation2 + $0xb0] sm:$0xff] }
 0x494   : > { %9121 = vmatprep.mubr.msk.bf16.mxu1 %vm3050_vm2, %v12091_v7  ;;  %5874 = vmatpush1.bf16.msra.mxu1 %v10919_v9  ;;  %v4401_v7 = vld [vmem:[#allocation2 + $0xc8] sm:$0xff]  ;;  %v4411_v9 = vld [vmem:[#allocation2 + $0x118] sm:$0xff] }
 0x495   : > { %5875 = vmatprep.subr.bf16.mxu1 %v12056_v31 }
 0x498   : > { %5876 = vmatpush1.bf16.msra.mxu1 %v10921_v22  ;;  %v4410_v22 = vld [vmem:[#allocation2 + $0x110] sm:$0xff] }
 0x499   : > { %5877 = vmatprep.subr.bf16.mxu1 %v12056_v31 }
 0x49b   : > { %4744 = vmatmul.mubr.bf16.gmra.mrb[4].mxu1 %v12107_v25  ;;  %v10934_v25 = vld [vmem:[%s13221_s9 + $0x40] sm:$0xff]  }
 0x49c   : > { %9122 = vmatprep.mubr.msk.bf16.mxu1 %vm3050_vm2, %v12110_v29  ;;  %5878 = vmatpush1.bf16.msra.mxu1 %v10923_v43  ;;  %v10935_v29 = vld [vmem:[%s13222_s10 + $0x40] sm:$0xff]   ;;  %v4414_v43 = vld [vmem:[#allocation2 + $0x130] sm:$0xff] }
 0x49d   : > { %5879 = vmatprep.subr.bf16.mxu1 %v12056_v31  ;;  %5625 = vmatpush1.bf16.msra.mxu0 %v10934_v25 }
 0x49e   : > { %5626 = vmatprep.subr.bf16.mxu0 %v12056_v31 }
 0x4a0   : > { %5880 = vmatpush1.bf16.msra.mxu1 %v10925_v48  ;;  %v4416_v48 = vld [vmem:[#allocation2 + $0x140] sm:$0xff] }
 0x4a1   : > { %5881 = vmatprep.subr.bf16.mxu1 %v12056_v31  ;;  %5627 = vmatpush1.bf16.msra.mxu0 %v10936_v0 }
 0x4a2   : > { %5628 = vmatprep.subr.bf16.mxu0 %v12056_v31 }
 0x4a3   : > { %4754 = vmatmul.mubr.bf16.gmra.mrb[8].mxu1 %v12126_v42  ;;  %v4400_v42 = vld [vmem:[#allocation2 + $0xc0] sm:$0xff] }
 0x4a4   : > { %9123 = vmatprep.mubr.msk.bf16.mxu1 %vm3050_vm2, %v12129_v47  ;;  %5882 = vmatpush1.bf16.msra.mxu1 %v10927_v2  ;;  %v4403_v47 = vld [vmem:[#allocation2 + $0xd8] sm:$0xff] }
 0x4a5   : > { %5883 = vmatprep.subr.bf16.mxu1 %v12056_v31 }
 0x4a8   : > { %5884 = vmatpush1.bf16.msra.mxu1 %v10929_v20 }
 0x4a9   : > { %5885 = vmatprep.subr.bf16.mxu1 %v12056_v31 }
 0x4ab   : > { %4764 = vmatmul.mubr.bf16.gmra.mrb[12].mxu1 %v12145_v1  ;;  %v10937_v1 = vld [vmem:[%s13222_s10 + $0x48] sm:$0xff]  }
 0x4ac   : > { %9124 = vmatprep.mubr.msk.bf16.mxu1 %vm3050_vm2, %v12148_v3  ;;  %5886 = vmatpush1.bf16.msra.mxu1 %v10931_v63  ;;  %v10938_v3 = vld [vmem:[%s13221_s9 + $0x50] sm:$0xff]  }
 0x4ad   : > { %5887 = vmatprep.subr.bf16.mxu1 %v12056_v31  ;;  %5629 = vmatpush1.bf16.msra.mxu0 %v10938_v3 }
 0x4ae   : > { %5630 = vmatprep.subr.bf16.mxu0 %v12056_v31 }
 0x4b0   : > { %5888 = vmatpush1.bf16.msra.mxu1 %v10933_v54 }
 0x4b1   : > { %5889 = vmatprep.subr.bf16.mxu1 %v12056_v31  ;;  %5631 = vmatpush1.bf16.msra.mxu0 %v10940_v16 }
 0x4b2   : > { %5632 = vmatprep.subr.bf16.mxu0 %v12056_v31 }
 0x4b3   : > { %4774 = vmatmul.mubr.bf16.gmra.mrb[16].mxu1 %v12155_v13  ;;  %v4402_v13 = vld [vmem:[#allocation2 + $0xd0] sm:$0xff] }
 0x4b4   : > { %9125 = vmatprep.mubr.msk.bf16.mxu1 %vm3050_vm2, %v12158_v15  ;;  %5890 = vmatpush1.bf16.msra.mxu1 %v10935_v29  ;;  %v4405_v15 = vld [vmem:[#allocation2 + $0xe8] sm:$0xff] }
 0x4b5   : > { %5891 = vmatprep.subr.bf16.mxu1 %v12056_v31 }
 0x4b8   : > { %5892 = vmatpush1.bf16.msra.mxu1 %v10937_v1 }
 0x4b9   : > { %5893 = vmatprep.subr.bf16.mxu1 %v12056_v31 }
 0x4bb   : > { %4784 = vmatmul.mubr.bf16.gmra.mrb[20].mxu1 %v12168_v30  ;;  %v10942_v30 = vld [vmem:[%s13221_s9 + $0x60] sm:$0xff]  }
 0x4bc   : > { %9126 = vmatprep.mubr.msk.bf16.mxu1 %vm3050_vm2, %v4393_v32  ;;  %5894 = vmatpush1.bf16.msra.mxu1 %v10939_v8 }
 0x4bd   : > { %5895 = vmatprep.subr.bf16.mxu1 %v12056_v31  ;;  %5633 = vmatpush1.bf16.msra.mxu0 %v10942_v30 }
 0x4be   : > { %5634 = vmatprep.subr.bf16.mxu0 %v12056_v31 }
 0x4c0   : > { %5896 = vmatpush1.bf16.msra.mxu1 %v10941_v40 }
 0x4c1   : > { %5897 = vmatprep.subr.bf16.mxu1 %v12056_v31 }
 0x4c3   : > { %4794 = vmatmul.mubr.bf16.gmra.mrb[24].mxu1 %v12173_v35  ;;  %v10943_v35 = vld [vmem:[%s13222_s10 + $0x60] sm:$0xff]  }
 0x4c4   : > { %9127 = vmatprep.mubr.msk.bf16.mxu1 %vm3050_vm2, %v4395_v44  ;;  %5898 = vmatpush1.bf16.msra.mxu1 %v10943_v35 }
 0x4c5   : > { %5899 = vmatprep.subr.bf16.mxu1 %v12056_v31 }
 0x4cb   : > { %4804 = vmatmul.mubr.bf16.gmra.mrb[28].mxu1 %v12184_v53  ;;  %v10944_v53 = vld [vmem:[%s13221_s9 + $0x68] sm:$0xff]  }
 0x4cc   : > { %9128 = vmatprep.mubr.msk.bf16.mxu1 %vm3050_vm2, %v4397_v12  ;;  %5635 = vmatpush1.bf16.msra.mxu0 %v10944_v53 }
 0x4cd   : > { %5636 = vmatprep.subr.bf16.mxu0 %v12056_v31 }
 0x4d0   : > { %5637 = vmatpush1.bf16.msra.mxu0 %v10946_v41 }
 0x4d3   : > { %4814 = vmatmul.mubr.bf16.gmra.mrb[32].mxu1 %v12189_v19  ;;  %v10945_v19 = vld [vmem:[%s13222_s10 + $0x68] sm:$0xff]  }
 0x4d4   : > { %9129 = vmatprep.mubr.msk.bf16.mxu1 %vm3050_vm2, %v4399_v33  ;;  %5900 = vmatpush1.bf16.msra.mxu1 %v10945_v19 }
 0x4d5   : > { %5901 = vmatprep.subr.bf16.mxu1 %v12056_v31 }
 0x4d8   : > { %5902 = vmatpush1.bf16.msra.mxu1 %v10947_v58 }
 0x4db   : > { %4824 = vmatmul.mubr.bf16.gmra.mrb[36].mxu1 %v4398_v6 }
 0x4dc   : > { %9130 = vmatprep.mubr.msk.bf16.mxu1 %vm3050_vm2, %v4401_v7 }
 0x4e3   : > { %4834 = vmatmul.mubr.bf16.gmra.mrb[40].mxu1 %v4400_v42 }
 0x4e4   : > { %9131 = vmatprep.mubr.msk.bf16.mxu1 %vm3050_vm2, %v4403_v47 }
 0x4eb   : > { %4844 = vmatmul.mubr.bf16.gmra.mrb[44].mxu1 %v4402_v13 }
 0x4ec   : > { %9132 = vmatprep.mubr.msk.bf16.mxu1 %vm3050_vm2, %v4405_v15 }
 0x4f3   : > { %4854 = vmatmul.mubr.bf16.gmra.mrb[48].mxu1 %v4404_v37 }
 0x4f4   : > { %9133 = vmatprep.mubr.msk.bf16.mxu1 %vm3050_vm2, %v4407_v52 }
 0x4fb   : > { %4864 = vmatmul.mubr.bf16.gmra.mrb[52].mxu1 %v4406_v51 }
 0x4fc   : > { %9134 = vmatprep.mubr.msk.bf16.mxu1 %vm3050_vm2, %v4409_v55 }
 0x503   : > { %4874 = vmatmul.mubr.bf16.gmra.mrb[56].mxu1 %v4408_v4 }
 0x504   : > { %9135 = vmatprep.mubr.msk.bf16.mxu1 %vm3050_vm2, %v4411_v9 }
 0x50b   : > { %4884 = vmatmul.mubr.bf16.gmra.mrb[60].mxu1 %v4410_v22 }
 0x50c   : > { %9136 = vmatprep.mubr.msk.bf16.mxu1 %vm3050_vm2, %v11929_v18  ;;  %v5126_v18 = vld [vmem:[%s13216_s4] sm:$0x3] }
 0x513   : > { %4894 = vmatmul.mubr.bf16.gmra.mrb[64].mxu1 %v4412_v27 }
 0x514   : > { %9137 = vmatprep.mubr.msk.bf16.mxu1 %vm3050_vm2, %v11942_v46  ;;  %v4435_v46 = vld [vmem:[#allocation2 + $0x1d8] sm:$0xff] }
 0x51b   : > { %4904 = vmatmul.mubr.bf16.gmra.mrb[68].mxu1 %v4414_v43 }
 0x51c   : > { %9138 = vmatprep.mubr.msk.bf16.mxu1 %vm3050_vm2, %v11955_v5  ;;  %v12433_v5 = vrot.slane %v5126_v18, %v2761_v36 }
 0x523   : > { %4914 = vmatmul.mubr.bf16.gmra.mrb[72].mxu1 %v4416_v48 }
 0x524   : > { %9139 = vmatprep.mubr.msk.bf16.mxu1 %vm3050_vm2, %v11967_v28 }
 0x52b   : > { %4924 = vmatmul.mubr.bf16.gmra.mrb[76].mxu1 %v4418_v60 }
 0x52c   : > { %9140 = vmatprep.mubr.msk.bf16.mxu1 %vm3050_vm2, %v11979_v57 }
 0x533   : > { %4934 = vmatmul.mubr.bf16.gmra.mrb[80].mxu1 %v11964_v21  ;;  %v12437_v21 = vrot.slane %v5126_v18, %v2765_v38 }
 0x534   : > { %9141 = vmatprep.mubr.msk.bf16.mxu1 %vm3050_vm2, %v11991_v23 }
 0x53b   : > { %4944 = vmatmul.mubr.bf16.gmra.mrb[84].mxu1 %v11976_v50 }
 0x53c   : > { %9142 = vmatprep.mubr.msk.bf16.mxu1 %vm3050_vm2, %v12003_v62 }
 0x543   : > { %4954 = vmatmul.mubr.bf16.gmra.mrb[88].mxu1 %v11988_v11 }
 0x544   : > { %9143 = vmatprep.mubr.msk.bf16.mxu1 %vm3050_vm2, %v12015_v24 }
 0x54b   : > { %4964 = vmatmul.mubr.bf16.gmra.mrb[92].mxu1 %v12000_v45 }
 0x54c   : > { %9144 = vmatprep.mubr.msk.bf16.mxu1 %vm3050_vm2, %v12027_v61 }
 0x553   : > { %4974 = vmatmul.mubr.bf16.gmra.mrb[96].mxu1 %v12012_v10 }
 0x554   : > { %9145 = vmatprep.mubr.msk.bf16.mxu1 %vm3050_vm2, %v12038_v26 }
 0x55b   : > { %4984 = vmatmul.mubr.bf16.gmra.mrb[100].mxu1 %v12024_v49 }
 0x55c   : > { %9146 = vmatprep.mubr.msk.bf16.mxu1 %vm3050_vm2, %v12044_v39 }
 0x563   : > { %4994 = vmatmul.mubr.bf16.gmra.mrb[104].mxu1 %v12036_v17 }
 0x564   : > { %9147 = vmatprep.mubr.msk.bf16.mxu1 %vm3050_vm2, %v4435_v46 }
 0x566   : > { %v4735_v28 = vpop.f32.mrb[0].mxu1 }
 0x567   : > { %v5138_v50 = vadd.f32 %v12433_v5, %v4735_v28  ;;  %v4737_v57 = vpop.f32.mrb[1].mxu1 }
 0x568   : > { %v5139_v11 = vadd.f32 %v12437_v21, %v4737_v57  ;;  %v4739_v23 = vpop.f32.mrb[2].mxu1 }
 0x569   : > { %v5140_v45 = vadd.f32 %v12433_v5, %v4739_v23  ;;  %v4741_v62 = vpop.f32.mrb[3].mxu1  ;;  %v5250_v36 = vmax.f32 %v5138_v50, 0.0 }
 0x56a   : > { %v5141_v10 = vadd.f32 %v12437_v21, %v4741_v62  ;;  %v5251_v34 = vmax.f32 %v5139_v11, 0.0 }
 0x56b   : > { %v5252_v24 = vmax.f32 %v5140_v45, 0.0  ;;  %5004 = vmatmul.mubr.bf16.gmra.mrb[108].mxu1 %v12056_v31 }
 0x56c   : > { %v5253_v38 = vmax.f32 %v5141_v10, 0.0 }
 0x56d   : > { %v5362_v49 = vpack.c.bf16 %v5252_v24, %v5250_v36 }
 0x56e   : > { %v5363_v61 = vpack.c.bf16 %v5253_v38, %v5251_v34  ;;  %v4745_v17 = vpop.f32.mrb[4].mxu1 }
 0x56f   : > { %v5142_v26 = vadd.f32 %v12433_v5, %v4745_v17  ;;  %v4747_v39 = vpop.f32.mrb[5].mxu1 }
 0x570   : > { %v5143_v2 = vadd.f32 %v12437_v21, %v4747_v39  ;;  %v4749_v14 = vpop.f32.mrb[6].mxu1 }
 0x571   : > { %v5144_v20 = vadd.f32 %v12433_v5, %v4749_v14  ;;  %v4751_v32 = vpop.f32.mrb[7].mxu1  ;;  %v5254_v56 = vmax.f32 %v5142_v26, 0.0 }
 0x572   : > { %v5145_v44 = vadd.f32 %v12437_v21, %v4751_v32  ;;  %v5255_v12 = vmax.f32 %v5143_v2, 0.0 }
 0x573   : > { %v5256_v63 = vmax.f32 %v5144_v20, 0.0 }
 0x574   : > { %v5257_v31 = vmax.f32 %v5145_v44, 0.0 }
 0x575   : > { %v5364_v33 = vpack.c.bf16 %v5256_v63, %v5254_v56 }
 0x576   : > { %v5365_v59 = vpack.c.bf16 %v5257_v31, %v5255_v12  ;;  %v4755_v54 = vpop.f32.mrb[8].mxu1 }
 0x577   : > { %v5418_v6 = vmax.bf16 %v5364_v33, %v5362_v49  ;;  %v5146_v7 = vadd.f32 %v12433_v5, %v4755_v54  ;;  %v4757_v25 = vpop.f32.mrb[9].mxu1 }
 0x578   : > { %v5419_v29 = vmax.bf16 %v5365_v59, %v5363_v61  ;;  %v5147_v42 = vadd.f32 %v12437_v21, %v4757_v25  ;;  %v4759_v47 = vpop.f32.mrb[10].mxu1 }
 0x579   : > { %v5148_v0 = vadd.f32 %v12433_v5, %v4759_v47  ;;  %v4761_v1 = vpop.f32.mrb[11].mxu1  ;;  %v5258_v8 = vmax.f32 %v5146_v7, 0.0 }
 0x57a   : > { %v5149_v3 = vadd.f32 %v12437_v21, %v4761_v1  ;;  %9163 = vmatprep.mubr.msk.bf16.mxu0 %vm3050_vm2, %v5419_v29  ;;  %9192 = vmatprep.mubr.msk.bf16.mxu1 %vm3050_vm2, %v5419_v29  ;;  %v5259_v15 = vmax.f32 %v5147_v42, 0.0 }
 0x57b   : > { %v5260_v13 = vmax.f32 %v5148_v0, 0.0  ;;  %5641 = vmatmul.mubr.bf16.vlgmr.msra.gmra.mrb[112].mxu0 %v5418_v6  ;;  %5906 = vmatmul.mubr.bf16.vlgmr.msra.gmra.mrb[112].mxu1 %v5418_v6 }
 0x57c   : > { %v5261_v16 = vmax.f32 %v5149_v3, 0.0 }
 0x57d   : > { %v5366_v40 = vpack.c.bf16 %v5260_v13, %v5258_v8 }
 0x57e   : > { %v5367_v30 = vpack.c.bf16 %v5261_v16, %v5259_v15  ;;  %v4765_v35 = vpop.f32.mrb[12].mxu1 }
 0x57f   : > { %v5150_v37 = vadd.f32 %v12433_v5, %v4765_v35  ;;  %v4767_v52 = vpop.f32.mrb[13].mxu1 }
 0x580   : > { %v5151_v53 = vadd.f32 %v12437_v21, %v4767_v52  ;;  %v4769_v19 = vpop.f32.mrb[14].mxu1 }
 0x581   : > { %v5152_v41 = vadd.f32 %v12433_v5, %v4769_v19  ;;  %v4771_v58 = vpop.f32.mrb[15].mxu1  ;;  %v5262_v55 = vmax.f32 %v5150_v37, 0.0 }
 0x582   : > { %v5153_v51 = vadd.f32 %v12437_v21, %v4771_v58  ;;  %v5263_v9 = vmax.f32 %v5151_v53, 0.0 }
 0x583   : > { %v5264_v4 = vmax.f32 %v5152_v41, 0.0 }
 0x584   : > { %v5265_v22 = vmax.f32 %v5153_v51, 0.0 }
 0x585   : > { %v5368_v27 = vpack.c.bf16 %v5264_v4, %v5262_v55 }
 0x586   : > { %v5369_v43 = vpack.c.bf16 %v5265_v22, %v5263_v9  ;;  %v4775_v48 = vpop.f32.mrb[16].mxu1 }
 0x587   : > { %v5154_v60 = vadd.f32 %v12433_v5, %v4775_v48  ;;  %v4777_v18 = vpop.f32.mrb[17].mxu1  ;;  %v5420_v46 = vmax.bf16 %v5368_v27, %v5366_v40 }
 0x588   : > { %v5421_v28 = vmax.bf16 %v5369_v43, %v5367_v30  ;;  %v5155_v50 = vadd.f32 %v12437_v21, %v4777_v18  ;;  %v4779_v57 = vpop.f32.mrb[18].mxu1 }
 0x589   : > { %v5156_v11 = vadd.f32 %v12433_v5, %v4779_v57  ;;  %v4781_v23 = vpop.f32.mrb[19].mxu1  ;;  %v5266_v62 = vmax.f32 %v5154_v60, 0.0 }
 0x58a   : > { %v5157_v45 = vadd.f32 %v12437_v21, %v4781_v23  ;;  %9164 = vmatprep.mubr.msk.bf16.mxu0 %vm3050_vm2, %v5421_v28  ;;  %9193 = vmatprep.mubr.msk.bf16.mxu1 %vm3050_vm2, %v5421_v28  ;;  %v5267_v36 = vmax.f32 %v5155_v50, 0.0 }
 0x58b   : > { %v5268_v10 = vmax.f32 %v5156_v11, 0.0  ;;  %5649 = vmatmul.mubr.bf16.gmra.mrb[116].mxu0 %v5420_v46  ;;  %5914 = vmatmul.mubr.bf16.gmra.mrb[116].mxu1 %v5420_v46 }
 0x58c   : > { %v5269_v24 = vmax.f32 %v5157_v45, 0.0 }
 0x58d   : > { %v5370_v34 = vpack.c.bf16 %v5268_v10, %v5266_v62 }
 0x58e   : > { %v5371_v38 = vpack.c.bf16 %v5269_v24, %v5267_v36  ;;  %v4785_v49 = vpop.f32.mrb[20].mxu1 }
 0x58f   : > { %v5158_v61 = vadd.f32 %v12433_v5, %v4785_v49  ;;  %v4787_v17 = vpop.f32.mrb[21].mxu1 }
 0x590   : > { %v5159_v26 = vadd.f32 %v12437_v21, %v4787_v17  ;;  %v4789_v39 = vpop.f32.mrb[22].mxu1 }
 0x591   : > { %v5160_v2 = vadd.f32 %v12433_v5, %v4789_v39  ;;  %v4791_v14 = vpop.f32.mrb[23].mxu1  ;;  %v5270_v32 = vmax.f32 %v5158_v61, 0.0 }
 0x592   : > { %v5161_v20 = vadd.f32 %v12437_v21, %v4791_v14  ;;  %v5271_v56 = vmax.f32 %v5159_v26, 0.0 }
 0x593   : > { %v5272_v44 = vmax.f32 %v5160_v2, 0.0 }
 0x594   : > { %v5273_v63 = vmax.f32 %v5161_v20, 0.0 }
 0x595   : > { %v5372_v12 = vpack.c.bf16 %v5272_v44, %v5270_v32 }
 0x596   : > { %v5373_v31 = vpack.c.bf16 %v5273_v63, %v5271_v56  ;;  %v4795_v33 = vpop.f32.mrb[24].mxu1 }
 0x597   : > { %v5162_v59 = vadd.f32 %v12433_v5, %v4795_v33  ;;  %v4797_v54 = vpop.f32.mrb[25].mxu1  ;;  %v5422_v6 = vmax.bf16 %v5372_v12, %v5370_v34 }
 0x598   : > { %v5423_v7 = vmax.bf16 %v5373_v31, %v5371_v38  ;;  %v5163_v25 = vadd.f32 %v12437_v21, %v4797_v54  ;;  %v4799_v29 = vpop.f32.mrb[26].mxu1 }
 0x599   : > { %v5164_v42 = vadd.f32 %v12433_v5, %v4799_v29  ;;  %v4801_v47 = vpop.f32.mrb[27].mxu1  ;;  %v5274_v1 = vmax.f32 %v5162_v59, 0.0 }
 0x59a   : > { %v5165_v0 = vadd.f32 %v12437_v21, %v4801_v47  ;;  %9165 = vmatprep.mubr.msk.bf16.mxu0 %vm3050_vm2, %v5423_v7  ;;  %9194 = vmatprep.mubr.msk.bf16.mxu1 %vm3050_vm2, %v5423_v7  ;;  %v5275_v8 = vmax.f32 %v5163_v25, 0.0 }
 0x59b   : > { %v5276_v3 = vmax.f32 %v5164_v42, 0.0  ;;  %5657 = vmatmul.mubr.bf16.gmra.mrb[120].mxu0 %v5422_v6  ;;  %5922 = vmatmul.mubr.bf16.gmra.mrb[120].mxu1 %v5422_v6 }
 0x59c   : > { %v5277_v13 = vmax.f32 %v5165_v0, 0.0 }
 0x59d   : > { %v5374_v15 = vpack.c.bf16 %v5276_v3, %v5274_v1 }
 0x59e   : > { %v5375_v16 = vpack.c.bf16 %v5277_v13, %v5275_v8  ;;  %v4805_v40 = vpop.f32.mrb[28].mxu1 }
 0x59f   : > { %v5166_v30 = vadd.f32 %v12433_v5, %v4805_v40  ;;  %v4807_v35 = vpop.f32.mrb[29].mxu1 }
 0x5a0   : > { %v5167_v37 = vadd.f32 %v12437_v21, %v4807_v35  ;;  %v4809_v52 = vpop.f32.mrb[30].mxu1 }
 0x5a1   : > { %v5168_v53 = vadd.f32 %v12433_v5, %v4809_v52  ;;  %v4811_v19 = vpop.f32.mrb[31].mxu1  ;;  %v5278_v58 = vmax.f32 %v5166_v30, 0.0 }
 0x5a2   : > { %v5169_v41 = vadd.f32 %v12437_v21, %v4811_v19  ;;  %v5279_v55 = vmax.f32 %v5167_v37, 0.0 }
 0x5a3   : > { %v5280_v51 = vmax.f32 %v5168_v53, 0.0 }
 0x5a4   : > { %v5281_v4 = vmax.f32 %v5169_v41, 0.0 }
 0x5a5   : > { %v5376_v9 = vpack.c.bf16 %v5280_v51, %v5278_v58 }
 0x5a6   : > { %v5377_v22 = vpack.c.bf16 %v5281_v4, %v5279_v55  ;;  %v4815_v27 = vpop.f32.mrb[32].mxu1  ;;  %v10948_v55 = vld [vmem:[%s13217_s5 + $0x40] sm:$0xff]  }
 0x5a7   : > { %v5170_v43 = vadd.f32 %v12433_v5, %v4815_v27  ;;  %v4817_v48 = vpop.f32.mrb[33].mxu1  ;;  %v5424_v60 = vmax.bf16 %v5376_v9, %v5374_v15  ;;  %9614 = vmatprep.subr.bf16.mxu0 %v10948_v55  ;;  %10050 = vmatprep.subr.bf16.mxu1 %v10948_v55 }
 0x5a8   : > { %v5425_v18 = vmax.bf16 %v5377_v22, %v5375_v16  ;;  %v5171_v46 = vadd.f32 %v12437_v21, %v4817_v48  ;;  %v4819_v28 = vpop.f32.mrb[34].mxu1  ;;  %9615 = vmatpush3.bf16.msra.mxu0 %v10948_v55  ;;  %10058 = vmatpush3.bf16.msra.mxu1 %v10948_v55 }
 0x5a9   : > { %v5172_v50 = vadd.f32 %v12433_v5, %v4819_v28  ;;  %v4821_v57 = vpop.f32.mrb[35].mxu1  ;;  %v5282_v23 = vmax.f32 %v5170_v43, 0.0  ;;  %v10949_v28 = vld [vmem:[%s13217_s5 + $0x48] sm:$0xff]  }
 0x5aa   : > { %v5173_v11 = vadd.f32 %v12437_v21, %v4821_v57  ;;  %9166 = vmatprep.mubr.msk.bf16.mxu0 %vm3050_vm2, %v5425_v18  ;;  %9195 = vmatprep.mubr.msk.bf16.mxu1 %vm3050_vm2, %v5425_v18  ;;  %v5283_v62 = vmax.f32 %v5171_v46, 0.0 }
 0x5ab   : > { %v5284_v45 = vmax.f32 %v5172_v50, 0.0  ;;  %5665 = vmatmul.mubr.bf16.gmra.mrb[124].mxu0 %v5424_v60  ;;  %5930 = vmatmul.mubr.bf16.gmra.mrb[124].mxu1 %v5424_v60 }
 0x5ac   : > { %v5285_v10 = vmax.f32 %v5173_v11, 0.0  ;;  %9616 = vmatprep.subr.bf16.mxu0 %v10949_v28  ;;  %10051 = vmatprep.subr.bf16.mxu1 %v10949_v28 }
 0x5ad   : > { %v5378_v36 = vpack.c.bf16 %v5284_v45, %v5282_v23  ;;  %9617 = vmatpush3.bf16.msra.mxu0 %v10949_v28  ;;  %10059 = vmatpush3.bf16.msra.mxu1 %v10949_v28 }
 0x5ae   : > { %v5379_v24 = vpack.c.bf16 %v5285_v10, %v5283_v62  ;;  %v4825_v34 = vpop.f32.mrb[36].mxu1  ;;  %v10950_v62 = vld [vmem:[%s13217_s5 + $0x50] sm:$0xff]  }
 0x5af   : > { %v5174_v38 = vadd.f32 %v12433_v5, %v4825_v34  ;;  %v4827_v49 = vpop.f32.mrb[37].mxu1  ;;  %9618 = vmatprep.subr.bf16.mxu0 %v10950_v62  ;;  %10052 = vmatprep.subr.bf16.mxu1 %v10950_v62 }
 0x5b0   : > { %v5175_v61 = vadd.f32 %v12437_v21, %v4827_v49  ;;  %v4829_v17 = vpop.f32.mrb[38].mxu1 }
 0x5b1   : > { %v5176_v26 = vadd.f32 %v12433_v5, %v4829_v17  ;;  %v4831_v39 = vpop.f32.mrb[39].mxu1  ;;  %v5286_v14 = vmax.f32 %v5174_v38, 0.0  ;;  %9619 = vmatpush3.bf16.msra.mxu0 %v10950_v62  ;;  %10060 = vmatpush3.bf16.msra.mxu1 %v10950_v62 }
 0x5b2   : > { %v5177_v2 = vadd.f32 %v12437_v21, %v4831_v39  ;;  %v5287_v32 = vmax.f32 %v5175_v61, 0.0  ;;  %v10951_v39 = vld [vmem:[%s13217_s5 + $0x58] sm:$0xff]  }
 0x5b3   : > { %v5288_v20 = vmax.f32 %v5176_v26, 0.0  ;;  %9620 = vmatprep.subr.bf16.mxu0 %v10951_v39  ;;  %10053 = vmatprep.subr.bf16.mxu1 %v10951_v39 }
 0x5b4   : > { %v5289_v44 = vmax.f32 %v5177_v2, 0.0 }
 0x5b5   : > { %v5380_v56 = vpack.c.bf16 %v5288_v20, %v5286_v14  ;;  %9621 = vmatpush3.bf16.msra.mxu0 %v10951_v39  ;;  %10061 = vmatpush3.bf16.msra.mxu1 %v10951_v39 }
 0x5b6   : > { %v5381_v63 = vpack.c.bf16 %v5289_v44, %v5287_v32  ;;  %v4835_v12 = vpop.f32.mrb[40].mxu1 }
 0x5b7   : > { %v5178_v31 = vadd.f32 %v12433_v5, %v4835_v12  ;;  %v4837_v33 = vpop.f32.mrb[41].mxu1  ;;  %v5426_v59 = vmax.bf16 %v5380_v56, %v5378_v36  ;;  %v10952_v56 = vld [vmem:[%s13217_s5 + $0x60] sm:$0xff]  }
 0x5b8   : > { %v5427_v54 = vmax.bf16 %v5381_v63, %v5379_v24  ;;  %v5179_v6 = vadd.f32 %v12437_v21, %v4837_v33  ;;  %v4839_v7 = vpop.f32.mrb[42].mxu1  ;;  %9622 = vmatprep.subr.bf16.mxu0 %v10952_v56  ;;  %10054 = vmatprep.subr.bf16.mxu1 %v10952_v56 }
 0x5b9   : > { %v5180_v25 = vadd.f32 %v12433_v5, %v4839_v7  ;;  %v4841_v29 = vpop.f32.mrb[43].mxu1  ;;  %v5290_v47 = vmax.f32 %v5178_v31, 0.0  ;;  %9623 = vmatpush3.bf16.msra.mxu0 %v10952_v56  ;;  %10062 = vmatpush3.bf16.msra.mxu1 %v10952_v56 }
 0x5ba   : > { %v5181_v42 = vadd.f32 %v12437_v21, %v4841_v29  ;;  %9167 = vmatprep.mubr.msk.bf16.mxu0 %vm3050_vm2, %v5427_v54  ;;  %9196 = vmatprep.mubr.msk.bf16.mxu1 %vm3050_vm2, %v5427_v54  ;;  %v5291_v1 = vmax.f32 %v5179_v6, 0.0 }
 0x5bb   : > { %v5292_v0 = vmax.f32 %v5180_v25, 0.0  ;;  %5673 = vmatmul.mubr.bf16.gmra.mrb[128].mxu0 %v5426_v59  ;;  %5938 = vmatmul.mubr.bf16.gmra.mrb[128].mxu1 %v5426_v59 }
 0x5bc   : > { %v5293_v3 = vmax.f32 %v5181_v42, 0.0 }
 0x5bd   : > { %v5382_v8 = vpack.c.bf16 %v5292_v0, %v5290_v47  ;;  %v10953_v47 = vld [vmem:[%s13217_s5 + $0x68] sm:$0xff]  }
 0x5be   : > { %v5383_v13 = vpack.c.bf16 %v5293_v3, %v5291_v1  ;;  %v4845_v15 = vpop.f32.mrb[44].mxu1  ;;  %9624 = vmatprep.subr.bf16.mxu0 %v10953_v47  ;;  %10055 = vmatprep.subr.bf16.mxu1 %v10953_v47 }
 0x5bf   : > { %v5182_v16 = vadd.f32 %v12433_v5, %v4845_v15  ;;  %v4847_v40 = vpop.f32.mrb[45].mxu1  ;;  %9625 = vmatpush3.bf16.msra.mxu0 %v10953_v47  ;;  %10063 = vmatpush3.bf16.msra.mxu1 %v10953_v47 }
 0x5c0   : > { %v5183_v30 = vadd.f32 %v12437_v21, %v4847_v40  ;;  %v4849_v35 = vpop.f32.mrb[46].mxu1 }
 0x5c1   : > { %v5184_v37 = vadd.f32 %v12433_v5, %v4849_v35  ;;  %v4851_v52 = vpop.f32.mrb[47].mxu1  ;;  %v5294_v19 = vmax.f32 %v5182_v16, 0.0 }
 0x5c2   : > { %v5185_v53 = vadd.f32 %v12437_v21, %v4851_v52  ;;  %v5295_v58 = vmax.f32 %v5183_v30, 0.0 }
 0x5c3   : > { %v5296_v41 = vmax.f32 %v5184_v37, 0.0 }
 0x5c4   : > { %v5297_v51 = vmax.f32 %v5185_v53, 0.0 }
 0x5c5   : > { %v5384_v4 = vpack.c.bf16 %v5296_v41, %v5294_v19 }
 0x5c6   : > { %v5385_v9 = vpack.c.bf16 %v5297_v51, %v5295_v58  ;;  %v4855_v22 = vpop.f32.mrb[48].mxu1  ;;  %v10955_v58 = vld [vmem:[%s13217_s5 + $0x78] sm:$0xff]  }
 0x5c7   : > { %v5186_v27 = vadd.f32 %v12433_v5, %v4855_v22  ;;  %v4857_v43 = vpop.f32.mrb[49].mxu1  ;;  %v5428_v48 = vmax.bf16 %v5384_v4, %v5382_v8  ;;  %v10954_v8 = vld [vmem:[%s13217_s5 + $0x70] sm:$0xff]  }
 0x5c8   : > { %v5429_v60 = vmax.bf16 %v5385_v9, %v5383_v13  ;;  %v5187_v18 = vadd.f32 %v12437_v21, %v4857_v43  ;;  %v4859_v46 = vpop.f32.mrb[50].mxu1  ;;  %9626 = vmatprep.subr.bf16.mxu0 %v10954_v8  ;;  %10056 = vmatprep.subr.bf16.mxu1 %v10954_v8 }
 0x5c9   : > { %v5188_v50 = vadd.f32 %v12433_v5, %v4859_v46  ;;  %v4861_v57 = vpop.f32.mrb[51].mxu1  ;;  %v5298_v23 = vmax.f32 %v5186_v27, 0.0  ;;  %9627 = vmatpush3.bf16.msra.mxu0 %v10954_v8  ;;  %10064 = vmatpush3.bf16.msra.mxu1 %v10954_v8 }
 0x5ca   : > { %v5189_v11 = vadd.f32 %v12437_v21, %v4861_v57  ;;  %9168 = vmatprep.mubr.msk.bf16.mxu0 %vm3050_vm2, %v5429_v60  ;;  %9197 = vmatprep.mubr.msk.bf16.mxu1 %vm3050_vm2, %v5429_v60  ;;  %v5299_v10 = vmax.f32 %v5187_v18, 0.0 }
 0x5cb   : > { %v5300_v45 = vmax.f32 %v5188_v50, 0.0  ;;  %5681 = vmatmul.mubr.bf16.gmra.mrb[132].mxu0 %v5428_v48  ;;  %5946 = vmatmul.mubr.bf16.gmra.mrb[132].mxu1 %v5428_v48 }
 0x5cc   : > { %v5301_v36 = vmax.f32 %v5189_v11, 0.0  ;;  %9628 = vmatprep.subr.bf16.mxu0 %v10955_v58  ;;  %10057 = vmatprep.subr.bf16.mxu1 %v10955_v58 }
 0x5cd   : > { %v5386_v24 = vpack.c.bf16 %v5300_v45, %v5298_v23  ;;  %9629 = vmatpush3.bf16.msra.mxu0 %v10955_v58  ;;  %10065 = vmatpush3.bf16.msra.mxu1 %v10955_v58 }
 0x5ce   : > { %v5387_v34 = vpack.c.bf16 %v5301_v36, %v5299_v10  ;;  %v4865_v38 = vpop.f32.mrb[52].mxu1 }
 0x5cf   : > { %v5190_v49 = vadd.f32 %v12433_v5, %v4865_v38  ;;  %v4867_v61 = vpop.f32.mrb[53].mxu1 }
 0x5d0   : > { %v5191_v17 = vadd.f32 %v12437_v21, %v4867_v61  ;;  %v4869_v26 = vpop.f32.mrb[54].mxu1 }
 0x5d1   : > { %v5192_v2 = vadd.f32 %v12433_v5, %v4869_v26  ;;  %v4871_v14 = vpop.f32.mrb[55].mxu1  ;;  %v5302_v32 = vmax.f32 %v5190_v49, 0.0 }
 0x5d2   : > { %v5193_v20 = vadd.f32 %v12437_v21, %v4871_v14  ;;  %v5303_v63 = vmax.f32 %v5191_v17, 0.0 }
 0x5d3   : > { %v5304_v44 = vmax.f32 %v5192_v2, 0.0 }
 0x5d4   : > { %v5305_v12 = vmax.f32 %v5193_v20, 0.0 }
 0x5d5   : > { %v5388_v31 = vpack.c.bf16 %v5304_v44, %v5302_v32 }
 0x5d6   : > { %v5389_v33 = vpack.c.bf16 %v5305_v12, %v5303_v63  ;;  %v4875_v59 = vpop.f32.mrb[56].mxu1 }
 0x5d7   : > { %v5194_v54 = vadd.f32 %v12433_v5, %v4875_v59  ;;  %v4877_v6 = vpop.f32.mrb[57].mxu1  ;;  %v5430_v7 = vmax.bf16 %v5388_v31, %v5386_v24 }
 0x5d8   : > { %v5431_v25 = vmax.bf16 %v5389_v33, %v5387_v34  ;;  %v5195_v29 = vadd.f32 %v12437_v21, %v4877_v6  ;;  %v4879_v42 = vpop.f32.mrb[58].mxu1 }
 0x5d9   : > { %v5196_v0 = vadd.f32 %v12433_v5, %v4879_v42  ;;  %v4881_v1 = vpop.f32.mrb[59].mxu1  ;;  %v5306_v13 = vmax.f32 %v5194_v54, 0.0 }
 0x5da   : > { %v5197_v3 = vadd.f32 %v12437_v21, %v4881_v1  ;;  %9169 = vmatprep.mubr.msk.bf16.mxu0 %vm3050_vm2, %v5431_v25  ;;  %9198 = vmatprep.mubr.msk.bf16.mxu1 %vm3050_vm2, %v5431_v25  ;;  %v5307_v16 = vmax.f32 %v5195_v29, 0.0 }
 0x5db   : > { %v5308_v15 = vmax.f32 %v5196_v0, 0.0  ;;  %5689 = vmatmul.mubr.bf16.gmra.mrb[136].mxu0 %v5430_v7  ;;  %5954 = vmatmul.mubr.bf16.gmra.mrb[136].mxu1 %v5430_v7 }
 0x5dc   : > { %v5309_v40 = vmax.f32 %v5197_v3, 0.0 }
 0x5dd   : > { %v5390_v30 = vpack.c.bf16 %v5308_v15, %v5306_v13 }
 0x5de   : > { %v5391_v35 = vpack.c.bf16 %v5309_v40, %v5307_v16  ;;  %v4885_v37 = vpop.f32.mrb[60].mxu1 }
 0x5df   : > { %v5198_v52 = vadd.f32 %v12433_v5, %v4885_v37  ;;  %v4887_v53 = vpop.f32.mrb[61].mxu1 }
 0x5e0   : > { %v5199_v19 = vadd.f32 %v12437_v21, %v4887_v53  ;;  %v4889_v41 = vpop.f32.mrb[62].mxu1 }
 0x5e1   : > { %v5200_v51 = vadd.f32 %v12433_v5, %v4889_v41  ;;  %v4891_v55 = vpop.f32.mrb[63].mxu1  ;;  %v5310_v9 = vmax.f32 %v5198_v52, 0.0 }
 0x5e2   : > { %v5201_v4 = vadd.f32 %v12437_v21, %v4891_v55  ;;  %v5311_v27 = vmax.f32 %v5199_v19, 0.0 }
 0x5e3   : > { %v5312_v22 = vmax.f32 %v5200_v51, 0.0 }
 0x5e4   : > { %v5313_v43 = vmax.f32 %v5201_v4, 0.0 }
 0x5e5   : > { %v5392_v48 = vpack.c.bf16 %v5312_v22, %v5310_v9 }
 0x5e6   : > { %v5393_v60 = vpack.c.bf16 %v5313_v43, %v5311_v27  ;;  %v4895_v18 = vpop.f32.mrb[64].mxu1 }
 0x5e7   : > { %v5202_v46 = vadd.f32 %v12433_v5, %v4895_v18  ;;  %v4897_v28 = vpop.f32.mrb[65].mxu1  ;;  %v5432_v50 = vmax.bf16 %v5392_v48, %v5390_v30 }
 0x5e8   : > { %v5433_v57 = vmax.bf16 %v5393_v60, %v5391_v35  ;;  %v5203_v11 = vadd.f32 %v12437_v21, %v4897_v28  ;;  %v4899_v23 = vpop.f32.mrb[66].mxu1 }
 0x5e9   : > { %v5204_v45 = vadd.f32 %v12433_v5, %v4899_v23  ;;  %v4901_v62 = vpop.f32.mrb[67].mxu1  ;;  %v5314_v36 = vmax.f32 %v5202_v46, 0.0 }
 0x5ea   : > { %v5205_v10 = vadd.f32 %v12437_v21, %v4901_v62  ;;  %9170 = vmatprep.mubr.msk.bf16.mxu0 %vm3050_vm2, %v5433_v57  ;;  %9199 = vmatprep.mubr.msk.bf16.mxu1 %vm3050_vm2, %v5433_v57  ;;  %v5315_v34 = vmax.f32 %v5203_v11, 0.0 }
 0x5eb   : > { %v5316_v24 = vmax.f32 %v5204_v45, 0.0  ;;  %5697 = vmatmul.mubr.bf16.gmra.mrb[140].mxu0 %v5432_v50  ;;  %5962 = vmatmul.mubr.bf16.gmra.mrb[140].mxu1 %v5432_v50 }
 0x5ec   : > { %v5317_v38 = vmax.f32 %v5205_v10, 0.0 }
 0x5ed   : > { %v5394_v49 = vpack.c.bf16 %v5316_v24, %v5314_v36 }
 0x5ee   : > { %v5395_v61 = vpack.c.bf16 %v5317_v38, %v5315_v34  ;;  %v4905_v17 = vpop.f32.mrb[68].mxu1 }
 0x5ef   : > { %v5206_v26 = vadd.f32 %v12433_v5, %v4905_v17  ;;  %v4907_v39 = vpop.f32.mrb[69].mxu1 }
 0x5f0   : > { %v5207_v2 = vadd.f32 %v12437_v21, %v4907_v39  ;;  %v4909_v14 = vpop.f32.mrb[70].mxu1 }
 0x5f1   : > { %v5208_v20 = vadd.f32 %v12433_v5, %v4909_v14  ;;  %v4911_v32 = vpop.f32.mrb[71].mxu1  ;;  %v5318_v56 = vmax.f32 %v5206_v26, 0.0 }
 0x5f2   : > { %v5209_v44 = vadd.f32 %v12437_v21, %v4911_v32  ;;  %v5319_v12 = vmax.f32 %v5207_v2, 0.0 }
 0x5f3   : > { %v5320_v63 = vmax.f32 %v5208_v20, 0.0 }
 0x5f4   : > { %v5321_v31 = vmax.f32 %v5209_v44, 0.0 }
 0x5f5   : > { %v5396_v33 = vpack.c.bf16 %v5320_v63, %v5318_v56 }
 0x5f6   : > { %v5397_v59 = vpack.c.bf16 %v5321_v31, %v5319_v12  ;;  %v4915_v54 = vpop.f32.mrb[72].mxu1 }
 0x5f7   : > { %v5210_v6 = vadd.f32 %v12433_v5, %v4915_v54  ;;  %v4917_v7 = vpop.f32.mrb[73].mxu1  ;;  %v5434_v25 = vmax.bf16 %v5396_v33, %v5394_v49 }
 0x5f8   : > { %v5435_v29 = vmax.bf16 %v5397_v59, %v5395_v61  ;;  %v5211_v42 = vadd.f32 %v12437_v21, %v4917_v7  ;;  %v4919_v47 = vpop.f32.mrb[74].mxu1 }
 0x5f9   : > { %v5212_v0 = vadd.f32 %v12433_v5, %v4919_v47  ;;  %v4921_v1 = vpop.f32.mrb[75].mxu1  ;;  %v5322_v8 = vmax.f32 %v5210_v6, 0.0 }
 0x5fa   : > { %v5213_v3 = vadd.f32 %v12437_v21, %v4921_v1  ;;  %9171 = vmatprep.mubr.msk.bf16.mxu0 %vm3050_vm2, %v5435_v29  ;;  %9200 = vmatprep.mubr.msk.bf16.mxu1 %vm3050_vm2, %v5435_v29  ;;  %v5323_v15 = vmax.f32 %v5211_v42, 0.0 }
 0x5fb   : > { %v5324_v13 = vmax.f32 %v5212_v0, 0.0  ;;  %5705 = vmatmul.mubr.bf16.gmra.mrb[144].mxu0 %v5434_v25  ;;  %5970 = vmatmul.mubr.bf16.gmra.mrb[144].mxu1 %v5434_v25 }
 0x5fc   : > { %v5325_v16 = vmax.f32 %v5213_v3, 0.0 }
 0x5fd   : > { %v5398_v40 = vpack.c.bf16 %v5324_v13, %v5322_v8 }
 0x5fe   : > { %v5399_v30 = vpack.c.bf16 %v5325_v16, %v5323_v15  ;;  %v4925_v35 = vpop.f32.mrb[76].mxu1 }
 0x5ff   : > { %v5214_v37 = vadd.f32 %v12433_v5, %v4925_v35  ;;  %v4927_v52 = vpop.f32.mrb[77].mxu1 }
 0x600   : > { %v5215_v53 = vadd.f32 %v12437_v21, %v4927_v52  ;;  %v4929_v19 = vpop.f32.mrb[78].mxu1 }
 0x601   : > { %v5216_v41 = vadd.f32 %v12433_v5, %v4929_v19  ;;  %v4931_v58 = vpop.f32.mrb[79].mxu1  ;;  %v5326_v55 = vmax.f32 %v5214_v37, 0.0 }
 0x602   : > { %v5217_v51 = vadd.f32 %v12437_v21, %v4931_v58  ;;  %v5327_v9 = vmax.f32 %v5215_v53, 0.0 }
 0x603   : > { %v5328_v4 = vmax.f32 %v5216_v41, 0.0 }
 0x604   : > { %v5329_v22 = vmax.f32 %v5217_v51, 0.0 }
 0x605   : > { %v5400_v27 = vpack.c.bf16 %v5328_v4, %v5326_v55 }
 0x606   : > { %v5401_v43 = vpack.c.bf16 %v5329_v22, %v5327_v9  ;;  %v4935_v48 = vpop.f32.mrb[80].mxu1  ;;  %v12586_v22 = vld [vmem:[%s13217_s5] sm:$0xff]  }
 0x607   : > { %v5218_v60 = vadd.f32 %v12433_v5, %v4935_v48  ;;  %v4937_v18 = vpop.f32.mrb[81].mxu1  ;;  %v5436_v46 = vmax.bf16 %v5400_v27, %v5398_v40  ;;  %9658 = vmatprep.subr.bf16.mxu0 %v12586_v22 }
 0x608   : > { %v5437_v28 = vmax.bf16 %v5401_v43, %v5399_v30  ;;  %v5219_v50 = vadd.f32 %v12437_v21, %v4937_v18  ;;  %v4939_v57 = vpop.f32.mrb[82].mxu1 }
 0x609   : > { %v5220_v11 = vadd.f32 %v12433_v5, %v4939_v57  ;;  %v4941_v23 = vpop.f32.mrb[83].mxu1  ;;  %v5330_v62 = vmax.f32 %v5218_v60, 0.0 }
 0x60a   : > { %v5221_v45 = vadd.f32 %v12437_v21, %v4941_v23  ;;  %9172 = vmatprep.mubr.msk.bf16.mxu0 %vm3050_vm2, %v5437_v28  ;;  %9201 = vmatprep.mubr.msk.bf16.mxu1 %vm3050_vm2, %v5437_v28  ;;  %v5331_v36 = vmax.f32 %v5219_v50, 0.0 }
 0x60b   : > { %v5332_v10 = vmax.f32 %v5220_v11, 0.0  ;;  %5713 = vmatmul.mubr.bf16.gmra.mrb[148].mxu0 %v5436_v46  ;;  %5978 = vmatmul.mubr.bf16.gmra.mrb[148].mxu1 %v5436_v46 }
 0x60c   : > { %v5333_v24 = vmax.f32 %v5221_v45, 0.0 }
 0x60d   : > { %v5402_v34 = vpack.c.bf16 %v5332_v10, %v5330_v62 }
 0x60e   : > { %v5403_v38 = vpack.c.bf16 %v5333_v24, %v5331_v36  ;;  %v4945_v49 = vpop.f32.mrb[84].mxu1 }
 0x60f   : > { %v5222_v61 = vadd.f32 %v12433_v5, %v4945_v49  ;;  %v4947_v17 = vpop.f32.mrb[85].mxu1 }
 0x610   : > { %v5223_v26 = vadd.f32 %v12437_v21, %v4947_v17  ;;  %v4949_v39 = vpop.f32.mrb[86].mxu1 }
 0x611   : > { %v5224_v2 = vadd.f32 %v12433_v5, %v4949_v39  ;;  %v4951_v14 = vpop.f32.mrb[87].mxu1  ;;  %v5334_v32 = vmax.f32 %v5222_v61, 0.0 }
 0x612   : > { %v5225_v20 = vadd.f32 %v12437_v21, %v4951_v14  ;;  %v5335_v56 = vmax.f32 %v5223_v26, 0.0 }
 0x613   : > { %v5336_v44 = vmax.f32 %v5224_v2, 0.0 }
 0x614   : > { %v5337_v63 = vmax.f32 %v5225_v20, 0.0 }
 0x615   : > { %v5404_v12 = vpack.c.bf16 %v5336_v44, %v5334_v32 }
 0x616   : > { %v5405_v31 = vpack.c.bf16 %v5337_v63, %v5335_v56  ;;  %v4955_v33 = vpop.f32.mrb[88].mxu1 }
 0x617   : > { %v5226_v59 = vadd.f32 %v12433_v5, %v4955_v33  ;;  %v4957_v54 = vpop.f32.mrb[89].mxu1  ;;  %v5438_v6 = vmax.bf16 %v5404_v12, %v5402_v34 }
 0x618   : > { %v5439_v7 = vmax.bf16 %v5405_v31, %v5403_v38  ;;  %v5227_v25 = vadd.f32 %v12437_v21, %v4957_v54  ;;  %v4959_v29 = vpop.f32.mrb[90].mxu1 }
 0x619   : > { %v5228_v42 = vadd.f32 %v12433_v5, %v4959_v29  ;;  %v4961_v47 = vpop.f32.mrb[91].mxu1  ;;  %v5338_v1 = vmax.f32 %v5226_v59, 0.0 }
 0x61a   : > { %v5229_v0 = vadd.f32 %v12437_v21, %v4961_v47  ;;  %9173 = vmatprep.mubr.msk.bf16.mxu0 %vm3050_vm2, %v5439_v7  ;;  %9202 = vmatprep.mubr.msk.bf16.mxu1 %vm3050_vm2, %v5439_v7  ;;  %v5339_v8 = vmax.f32 %v5227_v25, 0.0 }
 0x61b   : > { %v5340_v3 = vmax.f32 %v5228_v42, 0.0  ;;  %5721 = vmatmul.mubr.bf16.gmra.mrb[152].mxu0 %v5438_v6  ;;  %5986 = vmatmul.mubr.bf16.gmra.mrb[152].mxu1 %v5438_v6 }
 0x61c   : > { %v5341_v13 = vmax.f32 %v5229_v0, 0.0 }
 0x61d   : > { %v5406_v15 = vpack.c.bf16 %v5340_v3, %v5338_v1 }
 0x61e   : > { %v5407_v16 = vpack.c.bf16 %v5341_v13, %v5339_v8  ;;  %v4965_v40 = vpop.f32.mrb[92].mxu1 }
 0x61f   : > { %v5230_v30 = vadd.f32 %v12433_v5, %v4965_v40  ;;  %v4967_v35 = vpop.f32.mrb[93].mxu1 }
 0x620   : > { %v5231_v37 = vadd.f32 %v12437_v21, %v4967_v35  ;;  %v4969_v52 = vpop.f32.mrb[94].mxu1 }
 0x621   : > { %v5232_v53 = vadd.f32 %v12433_v5, %v4969_v52  ;;  %v4971_v19 = vpop.f32.mrb[95].mxu1  ;;  %v5342_v58 = vmax.f32 %v5230_v30, 0.0 }
 0x622   : > { %v5233_v41 = vadd.f32 %v12437_v21, %v4971_v19  ;;  %v5343_v55 = vmax.f32 %v5231_v37, 0.0 }
 0x623   : > { %v5344_v51 = vmax.f32 %v5232_v53, 0.0 }
 0x624   : > { %v5345_v4 = vmax.f32 %v5233_v41, 0.0 }
 0x625   : > { %v5408_v9 = vpack.c.bf16 %v5344_v51, %v5342_v58 }
 0x626   : > { %v5409_v27 = vpack.c.bf16 %v5345_v4, %v5343_v55  ;;  %v4975_v43 = vpop.f32.mrb[96].mxu1 }
 0x627   : > { %v5234_v48 = vadd.f32 %v12433_v5, %v4975_v43  ;;  %v4977_v60 = vpop.f32.mrb[97].mxu1  ;;  %v5440_v18 = vmax.bf16 %v5408_v9, %v5406_v15 }
 0x628   : > { %v5441_v46 = vmax.bf16 %v5409_v27, %v5407_v16  ;;  %v5235_v28 = vadd.f32 %v12437_v21, %v4977_v60  ;;  %v4979_v50 = vpop.f32.mrb[98].mxu1 }
 0x629   : > { %v5236_v57 = vadd.f32 %v12433_v5, %v4979_v50  ;;  %v4981_v11 = vpop.f32.mrb[99].mxu1  ;;  %v5346_v45 = vmax.f32 %v5234_v48, 0.0 }
 0x62a   : > { %v5237_v23 = vadd.f32 %v12437_v21, %v4981_v11  ;;  %9174 = vmatprep.mubr.msk.bf16.mxu0 %vm3050_vm2, %v5441_v46  ;;  %9203 = vmatprep.mubr.msk.bf16.mxu1 %vm3050_vm2, %v5441_v46  ;;  %v5347_v10 = vmax.f32 %v5235_v28, 0.0 }
 0x62b   : > { %v5348_v62 = vmax.f32 %v5236_v57, 0.0  ;;  %5729 = vmatmul.mubr.bf16.gmra.mrb[156].mxu0 %v5440_v18  ;;  %5994 = vmatmul.mubr.bf16.gmra.mrb[156].mxu1 %v5440_v18 }
 0x62c   : > { %v5349_v36 = vmax.f32 %v5237_v23, 0.0 }
 0x62d   : > { %v5410_v24 = vpack.c.bf16 %v5348_v62, %v5346_v45 }
 0x62e   : > { %v5411_v34 = vpack.c.bf16 %v5349_v36, %v5347_v10  ;;  %v4985_v38 = vpop.f32.mrb[100].mxu1 }
 0x62f   : > { %v5238_v49 = vadd.f32 %v12433_v5, %v4985_v38  ;;  %v4987_v61 = vpop.f32.mrb[101].mxu1 }
 0x630   : > { %v5239_v17 = vadd.f32 %v12437_v21, %v4987_v61  ;;  %v4989_v26 = vpop.f32.mrb[102].mxu1 }
 0x631   : > { %v5240_v39 = vadd.f32 %v12433_v5, %v4989_v26  ;;  %v4991_v2 = vpop.f32.mrb[103].mxu1  ;;  %v5350_v20 = vmax.f32 %v5238_v49, 0.0 }
 0x632   : > { %v5241_v14 = vadd.f32 %v12437_v21, %v4991_v2  ;;  %v5351_v44 = vmax.f32 %v5239_v17, 0.0  ;;  %v10958_v2 = vld [vmem:[%s13217_s5 + $0x10] sm:$0xff]  }
 0x633   : > { %v5352_v32 = vmax.f32 %v5240_v39, 0.0  ;;  %v10957_v39 = vld [vmem:[%s13217_s5 + $0x8] sm:$0xff]  }
 0x634   : > { %v5353_v56 = vmax.f32 %v5241_v14, 0.0  ;;  %v10959_v14 = vld [vmem:[%s13217_s5 + $0x18] sm:$0xff]  }
 0x635   : > { %v5412_v63 = vpack.c.bf16 %v5352_v32, %v5350_v20 }
 0x636   : > { %v5413_v12 = vpack.c.bf16 %v5353_v56, %v5351_v44  ;;  %v4995_v31 = vpop.f32.mrb[104].mxu1 }
 0x637   : > { %v5242_v33 = vadd.f32 %v12433_v5, %v4995_v31  ;;  %v4997_v59 = vpop.f32.mrb[105].mxu1  ;;  %v5442_v54 = vmax.bf16 %v5412_v63, %v5410_v24 }
 0x638   : > { %v5443_v6 = vmax.bf16 %v5413_v12, %v5411_v34  ;;  %v5243_v7 = vadd.f32 %v12437_v21, %v4997_v59  ;;  %v4999_v25 = vpop.f32.mrb[106].mxu1 }
 0x639   : > { %v5244_v29 = vadd.f32 %v12433_v5, %v4999_v25  ;;  %v5001_v42 = vpop.f32.mrb[107].mxu1  ;;  %v5354_v0 = vmax.f32 %v5242_v33, 0.0  ;;  %v10962_v25 = vld [vmem:[%s13217_s5 + $0x30] sm:$0xff]  }
 0x63a   : > { %v5245_v47 = vadd.f32 %v12437_v21, %v5001_v42  ;;  %9175 = vmatprep.mubr.msk.bf16.mxu0 %vm3050_vm2, %v5443_v6  ;;  %9204 = vmatprep.mubr.msk.bf16.mxu1 %vm3050_vm2, %v5443_v6  ;;  %v5355_v3 = vmax.f32 %v5243_v7, 0.0  ;;  %v10961_v7 = vld [vmem:[%s13217_s5 + $0x28] sm:$0xff]  }
 0x63b   : > { %v5356_v1 = vmax.f32 %v5244_v29, 0.0  ;;  %5737 = vmatmul.mubr.bf16.gmra.mrb[160].mxu0 %v5442_v54  ;;  %6002 = vmatmul.mubr.bf16.gmra.mrb[160].mxu1 %v5442_v54  ;;  %v10963_v29 = vld [vmem:[%s13217_s5 + $0x38] sm:$0xff]  }
 0x63c   : > { %v5357_v8 = vmax.f32 %v5245_v47, 0.0 }
 0x63d   : > { %v5414_v13 = vpack.c.bf16 %v5356_v1, %v5354_v0 }
 0x63e   : > { %v5415_v15 = vpack.c.bf16 %v5357_v8, %v5355_v3  ;;  %v5005_v16 = vpop.f32.mrb[108].mxu1  ;;  %v12645_v8 = vld [vmem:[%s13217_s5 + $0x80] sm:$0xff]  }
 0x63f   : > { %v5246_v40 = vadd.f32 %v12433_v5, %v5005_v16  ;;  %v5007_v30 = vpop.f32.mrb[109].mxu1 }
 0x640   : > { %v5247_v35 = vadd.f32 %v12437_v21, %v5007_v30  ;;  %v5009_v37 = vpop.f32.mrb[110].mxu1 }
 0x641   : > { %v5248_v52 = vadd.f32 %v12433_v5, %v5009_v37  ;;  %v5011_v53 = vpop.f32.mrb[111].mxu1  ;;  %v5358_v41 = vmax.f32 %v5246_v40, 0.0 }
 0x642   : > { %v5249_v19 = vadd.f32 %v12437_v21, %v5011_v53  ;;  %v5359_v51 = vmax.f32 %v5247_v35, 0.0 }
 0x643   : > { %v5360_v58 = vmax.f32 %v5248_v52, 0.0 }
 0x644   : > { %v5361_v55 = vmax.f32 %v5249_v19, 0.0 }
 0x645   : > { %v5416_v4 = vpack.c.bf16 %v5360_v58, %v5358_v41 }
 0x646   : > { %v5417_v9 = vpack.c.bf16 %v5361_v55, %v5359_v51 }
 0x647   : > { %v5444_v27 = vmax.bf16 %v5416_v4, %v5414_v13 }
 0x648   : > { %v5445_v43 = vmax.bf16 %v5417_v9, %v5415_v15 }
 0x64a   : > { %9176 = vmatprep.mubr.msk.bf16.mxu0 %vm3050_vm2, %v5445_v43  ;;  %9205 = vmatprep.mubr.msk.bf16.mxu1 %vm3050_vm2, %v5445_v43 }
 0x64b   : > { %5745 = vmatmul.mubr.bf16.gmra.mrb[164].mxu0 %v5444_v27  ;;  %6010 = vmatmul.mubr.bf16.gmra.mrb[164].mxu1 %v5444_v27 }
 0x64e   : > { %v5642_v48 = vpop.f32.mrb[112].mxu0  ;;  %v5907_v60 = vpop.f32.mrb[112].mxu1 }
 0x64f   : > { %v6018_v5 = vmax.f32 %v5642_v48, %v5907_v60  ;;  %v5644_v18 = vpop.f32.mrb[113].mxu0  ;;  %v5909_v46 = vpop.f32.mrb[113].mxu1 }
 0x650   : > { %v5645_v21 = vpop.f32.mrb[114].mxu0  ;;  %v5910_v28 = vpop.f32.mrb[114].mxu1 }
 0x651   : > { %v6019_v50 = vmax.f32 %v5645_v21, %v5910_v28  ;;  %v5647_v57 = vpop.f32.mrb[115].mxu0  ;;  %v5912_v11 = vpop.f32.mrb[115].mxu1 }
 0x653   : > { %v12611_v23 = vpack.c.bf16 %v6019_v50, %v6018_v5 }
 0x655   : > { %9630 = vmatprep.mubr.bf16.mxu0 %v12611_v23 }
 0x65e   : > { %v5650_v45 = vpop.f32.mrb[116].mxu0  ;;  %v5915_v62 = vpop.f32.mrb[116].mxu1 }
 0x65f   : > { %v6020_v10 = vmax.f32 %v5650_v45, %v5915_v62  ;;  %v5652_v36 = vpop.f32.mrb[117].mxu0  ;;  %v5917_v24 = vpop.f32.mrb[117].mxu1 }
 0x660   : > { %v5653_v34 = vpop.f32.mrb[118].mxu0  ;;  %v5918_v38 = vpop.f32.mrb[118].mxu1 }
 0x661   : > { %v6021_v49 = vmax.f32 %v5653_v34, %v5918_v38  ;;  %v5655_v61 = vpop.f32.mrb[119].mxu0  ;;  %v5920_v17 = vpop.f32.mrb[119].mxu1 }
 0x663   : > { %v12614_v26 = vpack.c.bf16 %v6021_v49, %v6020_v10 }
 0x665   : > { %9631 = vmatmul.mubr.bf16.vlgmr.msra.gmra.mrb[168].mxu0 %v12614_v26 }
 0x666   : > { %9659 = vmatpush3.bf16.msra.mxu0 %v12586_v22  ;;  %v10960_v22 = vld [vmem:[%s13217_s5 + $0x20] sm:$0xff]  }
 0x667   : > { %9660 = vmatprep.subr.bf16.mxu0 %v10957_v39 }
 0x66a   : > { %9661 = vmatpush3.bf16.msra.mxu0 %v10957_v39 }
 0x66b   : > { %9662 = vmatprep.subr.bf16.mxu0 %v10958_v2 }
 0x66e   : > { %v5658_v20 = vpop.f32.mrb[120].mxu0  ;;  %v5923_v32 = vpop.f32.mrb[120].mxu1  ;;  %9663 = vmatpush3.bf16.msra.mxu0 %v10958_v2 }
 0x66f   : > { %v6022_v44 = vmax.f32 %v5658_v20, %v5923_v32  ;;  %v5660_v56 = vpop.f32.mrb[121].mxu0  ;;  %v5925_v63 = vpop.f32.mrb[121].mxu1  ;;  %9664 = vmatprep.subr.bf16.mxu0 %v10959_v14 }
 0x670   : > { %v5661_v12 = vpop.f32.mrb[122].mxu0  ;;  %v5926_v31 = vpop.f32.mrb[122].mxu1 }
 0x671   : > { %v6023_v33 = vmax.f32 %v5661_v12, %v5926_v31  ;;  %v5663_v59 = vpop.f32.mrb[123].mxu0  ;;  %v5928_v54 = vpop.f32.mrb[123].mxu1 }
 0x672   : > { %9665 = vmatpush3.bf16.msra.mxu0 %v10959_v14  ;;  %v12663_v59 = vld [vmem:[#allocation2] sm:$0xff]  ;;  %v10965_v54 = vld [vmem:[%s13217_s5 + $0x88] sm:$0xff]  }
 0x673   : > { %v12630_v6 = vpack.c.bf16 %v6023_v33, %v6022_v44  ;;  %9666 = vmatprep.subr.bf16.mxu0 %v10960_v22 }
 0x675   : > { %9634 = vmatprep.mubr.bf16.mxu0 %v12630_v6 }
 0x676   : > { %9667 = vmatpush3.bf16.msra.mxu0 %v10960_v22 }
 0x677   : > { %9668 = vmatprep.subr.bf16.mxu0 %v10961_v7 }
 0x67a   : > { %9669 = vmatpush3.bf16.msra.mxu0 %v10961_v7 }
 0x67b   : > { %9670 = vmatprep.subr.bf16.mxu0 %v10962_v25 }
 0x67e   : > { %v5666_v42 = vpop.f32.mrb[124].mxu0  ;;  %v5931_v47 = vpop.f32.mrb[124].mxu1  ;;  %9671 = vmatpush3.bf16.msra.mxu0 %v10962_v25 }
 0x67f   : > { %v6024_v0 = vmax.f32 %v5666_v42, %v5931_v47  ;;  %v5668_v1 = vpop.f32.mrb[125].mxu0  ;;  %v5933_v3 = vpop.f32.mrb[125].mxu1  ;;  %9672 = vmatprep.subr.bf16.mxu0 %v10963_v29 }
 0x680   : > { %v5669_v13 = vpop.f32.mrb[126].mxu0  ;;  %v5934_v15 = vpop.f32.mrb[126].mxu1 }
 0x681   : > { %v6025_v16 = vmax.f32 %v5669_v13, %v5934_v15  ;;  %v5671_v40 = vpop.f32.mrb[127].mxu0  ;;  %v5936_v30 = vpop.f32.mrb[127].mxu1 }
 0x682   : > { %9673 = vmatpush3.bf16.msra.mxu0 %v10963_v29  ;;  %v10968_v40 = vld [vmem:[%s13217_s5 + $0xa0] sm:$0xff]   ;;  %v10969_v30 = vld [vmem:[%s13217_s5 + $0xa8] sm:$0xff]  }
 0x683   : > { %v12647_v35 = vpack.c.bf16 %v6025_v16, %v6024_v0  ;;  %9702 = vmatprep.subr.bf16.mxu0 %v12645_v8  ;;  %v10966_v0 = vld [vmem:[%s13217_s5 + $0x90] sm:$0xff]  }
 0x685   : > { %9635 = vmatmul.mubr.bf16.gmra.mrb[172].mxu0 %v12647_v35 }
 0x68e   : > { %v5674_v37 = vpop.f32.mrb[128].mxu0  ;;  %v5939_v52 = vpop.f32.mrb[128].mxu1 }
 0x68f   : > { %v6026_v53 = vmax.f32 %v5674_v37, %v5939_v52  ;;  %v5676_v19 = vpop.f32.mrb[129].mxu0  ;;  %v5941_v41 = vpop.f32.mrb[129].mxu1 }
 0x690   : > { %v5677_v58 = vpop.f32.mrb[130].mxu0  ;;  %v5942_v51 = vpop.f32.mrb[130].mxu1 }
 0x691   : > { %v6027_v55 = vmax.f32 %v5677_v58, %v5942_v51  ;;  %v5679_v4 = vpop.f32.mrb[131].mxu0  ;;  %v5944_v9 = vpop.f32.mrb[131].mxu1  ;;  %v10970_v58 = vld [vmem:[%s13217_s5 + $0xb0] sm:$0xff]  }
 0x693   : > { %v12651_v27 = vpack.c.bf16 %v6027_v55, %v6026_v53 }
 0x695   : > { %9638 = vmatprep.mubr.bf16.mxu0 %v12651_v27 }
 0x69e   : > { %v5682_v43 = vpop.f32.mrb[132].mxu0  ;;  %v5947_v48 = vpop.f32.mrb[132].mxu1 }
 0x69f   : > { %v6028_v60 = vmax.f32 %v5682_v43, %v5947_v48  ;;  %v5684_v5 = vpop.f32.mrb[133].mxu0  ;;  %v5949_v18 = vpop.f32.mrb[133].mxu1 }
 0x6a0   : > { %v5685_v46 = vpop.f32.mrb[134].mxu0  ;;  %v5950_v21 = vpop.f32.mrb[134].mxu1 }
 0x6a1   : > { %v6029_v28 = vmax.f32 %v5685_v46, %v5950_v21  ;;  %v5687_v50 = vpop.f32.mrb[135].mxu0  ;;  %v5952_v57 = vpop.f32.mrb[135].mxu1 }
 0x6a3   : > { %v12654_v11 = vpack.c.bf16 %v6029_v28, %v6028_v60  ;;  %v10971_v60 = vld [vmem:[%s13217_s5 + $0xb8] sm:$0xff]  }
 0x6a5   : > { %9639 = vmatmul.mubr.bf16.gmra.mrb[176].mxu0 %v12654_v11 }
 0x6ae   : > { %v5690_v45 = vpop.f32.mrb[136].mxu0  ;;  %v5955_v62 = vpop.f32.mrb[136].mxu1 }
 0x6af   : > { %v6030_v10 = vmax.f32 %v5690_v45, %v5955_v62  ;;  %v5692_v36 = vpop.f32.mrb[137].mxu0  ;;  %v5957_v24 = vpop.f32.mrb[137].mxu1 }
 0x6b0   : > { %v5693_v34 = vpop.f32.mrb[138].mxu0  ;;  %v5958_v38 = vpop.f32.mrb[138].mxu1 }
 0x6b1   : > { %v6031_v49 = vmax.f32 %v5693_v34, %v5958_v38  ;;  %v5695_v61 = vpop.f32.mrb[139].mxu0  ;;  %v5960_v17 = vpop.f32.mrb[139].mxu1 }
 0x6b3   : > { %v12657_v39 = vpack.c.bf16 %v6031_v49, %v6030_v10 }
 0x6b5   : > { %9642 = vmatprep.mubr.bf16.mxu0 %v12657_v39 }
 0x6be   : > { %v5698_v2 = vpop.f32.mrb[140].mxu0  ;;  %v5963_v14 = vpop.f32.mrb[140].mxu1 }
 0x6bf   : > { %v6032_v20 = vmax.f32 %v5698_v2, %v5963_v14  ;;  %v5700_v32 = vpop.f32.mrb[141].mxu0  ;;  %v5965_v44 = vpop.f32.mrb[141].mxu1 }
 0x6c0   : > { %v5701_v56 = vpop.f32.mrb[142].mxu0  ;;  %v5966_v63 = vpop.f32.mrb[142].mxu1 }
 0x6c1   : > { %v6033_v22 = vmax.f32 %v5701_v56, %v5966_v63  ;;  %v5703_v12 = vpop.f32.mrb[143].mxu0  ;;  %v5968_v31 = vpop.f32.mrb[143].mxu1 }
 0x6c3   : > { %v12660_v33 = vpack.c.bf16 %v6033_v22, %v6032_v20 }
 0x6c5   : > { %9643 = vmatmul.mubr.bf16.gmra.mrb[180].mxu0 %v12660_v33 }
 0x6c6   : > { %9674 = vmatprep.mubr.bf16.mxu0 %v12663_v59 }
 0x6cd   : > { %9675 = vmatmul.mubr.bf16.vlgmr.msra.gmra.mrb[168].mxu0 %v12611_v23 }
 0x6ce   : > { %v5706_v7 = vpop.f32.mrb[144].mxu0  ;;  %v5971_v25 = vpop.f32.mrb[144].mxu1  ;;  %9678 = vmatprep.mubr.bf16.mxu0 %v12614_v26  ;;  %9703 = vmatpush3.bf16.msra.mxu0 %v12645_v8  ;;  %v10967_v8 = vld [vmem:[%s13217_s5 + $0x98] sm:$0xff]  }
 0x6cf   : > { %v6034_v29 = vmax.f32 %v5706_v7, %v5971_v25  ;;  %v5708_v42 = vpop.f32.mrb[145].mxu0  ;;  %v5973_v47 = vpop.f32.mrb[145].mxu1  ;;  %9704 = vmatprep.subr.bf16.mxu0 %v10965_v54 }
 0x6d0   : > { %v5709_v1 = vpop.f32.mrb[146].mxu0  ;;  %v5974_v3 = vpop.f32.mrb[146].mxu1 }
 0x6d1   : > { %v6035_v13 = vmax.f32 %v5709_v1, %v5974_v3  ;;  %v5711_v15 = vpop.f32.mrb[147].mxu0  ;;  %v5976_v16 = vpop.f32.mrb[147].mxu1 }
 0x6d2   : > { %9705 = vmatpush3.bf16.msra.mxu0 %v10965_v54 }
 0x6d3   : > { %v12675_v23 = vpack.c.bf16 %v6035_v13, %v6034_v29  ;;  %9706 = vmatprep.subr.bf16.mxu0 %v10966_v0 }
 0x6d5   : > { %9646 = vmatprep.mubr.bf16.mxu1 %v12675_v23  ;;  %9679 = vmatmul.mubr.bf16.gmra.mrb[172].mxu0 %v12630_v6 }
 0x6d6   : > { %9682 = vmatprep.mubr.bf16.mxu0 %v12647_v35  ;;  %9707 = vmatpush3.bf16.msra.mxu0 %v10966_v0 }
 0x6d7   : > { %9708 = vmatprep.subr.bf16.mxu0 %v10967_v8 }
 0x6da   : > { %9709 = vmatpush3.bf16.msra.mxu0 %v10967_v8 }
 0x6db   : > { %9710 = vmatprep.subr.bf16.mxu0 %v10968_v40 }
 0x6dd   : > { %9683 = vmatmul.mubr.bf16.gmra.mrb[176].mxu0 %v12651_v27 }
 0x6de   : > { %v5714_v37 = vpop.f32.mrb[148].mxu0  ;;  %v5979_v52 = vpop.f32.mrb[148].mxu1  ;;  %9686 = vmatprep.mubr.bf16.mxu0 %v12654_v11  ;;  %9711 = vmatpush3.bf16.msra.mxu0 %v10968_v40 }
 0x6df   : > { %v6036_v53 = vmax.f32 %v5714_v37, %v5979_v52  ;;  %v5716_v19 = vpop.f32.mrb[149].mxu0  ;;  %v5981_v41 = vpop.f32.mrb[149].mxu1  ;;  %9712 = vmatprep.subr.bf16.mxu0 %v10969_v30 }
 0x6e0   : > { %v5717_v51 = vpop.f32.mrb[150].mxu0  ;;  %v5982_v55 = vpop.f32.mrb[150].mxu1 }
 0x6e1   : > { %v6037_v4 = vmax.f32 %v5717_v51, %v5982_v55  ;;  %v5719_v9 = vpop.f32.mrb[151].mxu0  ;;  %v5984_v43 = vpop.f32.mrb[151].mxu1 }
 0x6e2   : > { %9713 = vmatpush3.bf16.msra.mxu0 %v10969_v30 }
 0x6e3   : > { %v12694_v48 = vpack.c.bf16 %v6037_v4, %v6036_v53  ;;  %9714 = vmatprep.subr.bf16.mxu0 %v10970_v58  ;;  %v10980_v53 = vld [vmem:[%s13219_s7] sm:$0xff]  }
 0x6e5   : > { %9647 = vmatmul.mubr.bf16.vlgmr.msra.gmra.mrb[168].mxu1 %v12694_v48  ;;  %9687 = vmatmul.mubr.bf16.gmra.mrb[180].mxu0 %v12657_v39 }
 0x6e6   : > { %9690 = vmatprep.mubr.bf16.mxu0 %v12660_v33  ;;  %9715 = vmatpush3.bf16.msra.mxu0 %v10970_v58 }
 0x6e7   : > { %9716 = vmatprep.subr.bf16.mxu0 %v10971_v60 }
 0x6ea   : > { %9717 = vmatpush3.bf16.msra.mxu0 %v10971_v60 }
 0x6ed   : > { %9691 = vmatmul.mubr.bf16.gmra.mrb[184].mxu0 %v12675_v23 }
 0x6ee   : > { %v5722_v5 = vpop.f32.mrb[152].mxu0  ;;  %v5987_v18 = vpop.f32.mrb[152].mxu1  ;;  %9694 = vmatprep.mubr.bf16.mxu0 %v12694_v48 }
 0x6ef   : > { %v6038_v46 = vmax.f32 %v5722_v5, %v5987_v18  ;;  %v5724_v21 = vpop.f32.mrb[153].mxu0  ;;  %v5989_v28 = vpop.f32.mrb[153].mxu1 }
 0x6f0   : > { %v5725_v50 = vpop.f32.mrb[154].mxu0  ;;  %v5990_v57 = vpop.f32.mrb[154].mxu1 }
 0x6f1   : > { %v6039_v45 = vmax.f32 %v5725_v50, %v5990_v57  ;;  %v5727_v62 = vpop.f32.mrb[155].mxu0  ;;  %v5992_v10 = vpop.f32.mrb[155].mxu1 }
 0x6f3   : > { %v6056_v36 = vpack.c.bf16 %v6039_v45, %v6038_v46 }
 0x6f5   : > { %9650 = vmatprep.mubr.bf16.mxu1 %v6056_v36  ;;  %9695 = vmatmul.mubr.bf16.gmra.mrb[188].mxu0 %v6056_v36 }
 0x6fe   : > { %v5730_v24 = vpop.f32.mrb[156].mxu0  ;;  %v5995_v34 = vpop.f32.mrb[156].mxu1 }
 0x6ff   : > { %v6040_v38 = vmax.f32 %v5730_v24, %v5995_v34  ;;  %v5732_v49 = vpop.f32.mrb[157].mxu0  ;;  %v5997_v61 = vpop.f32.mrb[157].mxu1 }
 0x700   : > { %v5733_v17 = vpop.f32.mrb[158].mxu0  ;;  %v5998_v2 = vpop.f32.mrb[158].mxu1 }
 0x701   : > { %v6041_v14 = vmax.f32 %v5733_v17, %v5998_v2  ;;  %v5735_v20 = vpop.f32.mrb[159].mxu0  ;;  %v6000_v32 = vpop.f32.mrb[159].mxu1 }
 0x703   : > { %v6057_v44 = vpack.c.bf16 %v6041_v14, %v6040_v38  ;;  %v10981_v14 = vld [vmem:[%s13219_s7 + $0x8] sm:$0xff]  }
 0x705   : > { %9651 = vmatmul.mubr.bf16.gmra.mrb[172].mxu1 %v6057_v44  ;;  %9698 = vmatprep.mubr.bf16.mxu0 %v6057_v44 }
 0x70e   : > { %v5738_v56 = vpop.f32.mrb[160].mxu0  ;;  %v6003_v63 = vpop.f32.mrb[160].mxu1 }
 0x70f   : > { %v6042_v22 = vmax.f32 %v5738_v56, %v6003_v63  ;;  %v5740_v12 = vpop.f32.mrb[161].mxu0  ;;  %v6005_v31 = vpop.f32.mrb[161].mxu1 }
 0x710   : > { %v5741_v54 = vpop.f32.mrb[162].mxu0  ;;  %v6006_v7 = vpop.f32.mrb[162].mxu1 }
 0x711   : > { %v6043_v25 = vmax.f32 %v5741_v54, %v6006_v7  ;;  %v5743_v29 = vpop.f32.mrb[163].mxu0  ;;  %v6008_v42 = vpop.f32.mrb[163].mxu1  ;;  %v10982_v7 = vld [vmem:[%s13219_s7 + $0x10] sm:$0xff]  }
 0x713   : > { %v6058_v47 = vpack.c.bf16 %v6043_v25, %v6042_v22 }
 0x715   : > { %9654 = vmatprep.mubr.bf16.mxu1 %v6058_v47  ;;  %9699 = vmatmul.mubr.bf16.gmra.mrb[192].mxu0 %v6058_v47 }
 0x716   : > { %9718 = vmatprep.mubr.bf16.mxu0 %v12614_v26  ;;  %v10972_v26 = vld [vmem:[%s13219_s7 + $0x40] sm:$0xff]  }
 0x717   : > { %9746 = vmatprep.subr.bf16.mxu1 %v10972_v26 }
 0x718   : > { %9747 = vmatpush3.bf16.msra.mxu1 %v10972_v26  ;;  %v10984_v26 = vld [vmem:[%s13219_s7 + $0x20] sm:$0xff]  }
 0x71d   : > { %9719 = vmatmul.mubr.bf16.vlgmr.msra.gmra.mrb[168].mxu0 %v12630_v6  ;;  %v10973_v6 = vld [vmem:[%s13219_s7 + $0x48] sm:$0xff]  }
 0x71e   : > { %v5746_v0 = vpop.f32.mrb[164].mxu0  ;;  %v6011_v1 = vpop.f32.mrb[164].mxu1  ;;  %9722 = vmatprep.mubr.bf16.mxu0 %v12647_v35  ;;  %9748 = vmatprep.subr.bf16.mxu1 %v10973_v6  ;;  %v10974_v35 = vld [vmem:[%s13219_s7 + $0x50] sm:$0xff]  }
 0x71f   : > { %v6044_v3 = vmax.f32 %v5746_v0, %v6011_v1  ;;  %v5748_v13 = vpop.f32.mrb[165].mxu0  ;;  %v6013_v15 = vpop.f32.mrb[165].mxu1  ;;  %9749 = vmatpush3.bf16.msra.mxu1 %v10973_v6 }
 0x720   : > { %v5749_v16 = vpop.f32.mrb[166].mxu0  ;;  %v6014_v8 = vpop.f32.mrb[166].mxu1  ;;  %9750 = vmatprep.subr.bf16.mxu1 %v10974_v35  ;;  %v10983_v13 = vld [vmem:[%s13219_s7 + $0x18] sm:$0xff]  }
 0x721   : > { %v6045_v40 = vmax.f32 %v5749_v16, %v6014_v8  ;;  %v5751_v30 = vpop.f32.mrb[167].mxu0  ;;  %v6016_v37 = vpop.f32.mrb[167].mxu1 }
 0x723   : > { %v6059_v52 = vpack.c.bf16 %v6045_v40, %v6044_v3  ;;  %9751 = vmatpush3.bf16.msra.mxu1 %v10974_v35 }
 0x725   : > { %9655 = vmatmul.mubr.bf16.gmra.mrb[176].mxu1 %v6059_v52  ;;  %9723 = vmatmul.mubr.bf16.gmra.mrb[172].mxu0 %v12651_v27  ;;  %v10975_v27 = vld [vmem:[%s13219_s7 + $0x58] sm:$0xff]  }
 0x726   : > { %9726 = vmatprep.mubr.bf16.mxu0 %v12654_v11  ;;  %9752 = vmatprep.subr.bf16.mxu1 %v10975_v27  ;;  %v10976_v11 = vld [vmem:[%s13219_s7 + $0x60] sm:$0xff]  }
 0x727   : > { %9753 = vmatpush3.bf16.msra.mxu1 %v10975_v27 }
 0x728   : > { %9754 = vmatprep.subr.bf16.mxu1 %v10976_v11 }
 0x72b   : > { %9755 = vmatpush3.bf16.msra.mxu1 %v10976_v11 }
 0x72d   : > { %9727 = vmatmul.mubr.bf16.gmra.mrb[176].mxu0 %v12657_v39  ;;  %v10977_v39 = vld [vmem:[%s13219_s7 + $0x68] sm:$0xff]  }
 0x72e   : > { %9730 = vmatprep.mubr.bf16.mxu0 %v12660_v33  ;;  %9756 = vmatprep.subr.bf16.mxu1 %v10977_v39  ;;  %v10978_v33 = vld [vmem:[%s13219_s7 + $0x70] sm:$0xff]  }
 0x72f   : > { %9757 = vmatpush3.bf16.msra.mxu1 %v10977_v39 }
 0x730   : > { %9758 = vmatprep.subr.bf16.mxu1 %v10978_v33 }
 0x733   : > { %9759 = vmatpush3.bf16.msra.mxu1 %v10978_v33 }
 0x735   : > { %9731 = vmatmul.mubr.bf16.gmra.mrb[180].mxu0 %v12675_v23  ;;  %v10979_v23 = vld [vmem:[%s13219_s7 + $0x78] sm:$0xff]  }
 0x736   : > { %9734 = vmatprep.mubr.bf16.mxu0 %v12694_v48  ;;  %9760 = vmatprep.subr.bf16.mxu1 %v10979_v23  ;;  %v12760_v48 = vld [vmem:[%s13218_s6] ss:$0 sm:$0xff] }
 0x737   : > { %9761 = vmatpush3.bf16.msra.mxu1 %v10979_v23 }
 0x738   : > { %9790 = vmatprep.subr.bf16.mxu1 %v10980_v53 }
 0x73d   : > { %9735 = vmatmul.mubr.bf16.gmra.mrb[184].mxu0 %v6056_v36 }
 0x73e   : > { %9738 = vmatprep.mubr.bf16.mxu0 %v6057_v44 }
 0x745   : > { %9739 = vmatmul.mubr.bf16.gmra.mrb[188].mxu0 %v6058_v47 }
 0x746   : > { %9742 = vmatprep.mubr.bf16.mxu0 %v6059_v52 }
 0x74d   : > { %9743 = vmatmul.mubr.bf16.gmra.mrb[192].mxu0 %v12663_v59 }
 0x7b8   : > { %v12741_v19 = vpop.f32.mrb[168].mxu1 }
 0x7b9   : > { %v12743_v41 = vpop.f32.mrb[169].mxu1 }
 0x7ba   : > { %v12745_v58 = vpop.f32.mrb[170].mxu1 }
 0x7bb   : > { %v12747_v51 = vpop.f32.mrb[171].mxu1 }
 0x7d8   : > { %v12749_v55 = vpop.f32.mrb[172].mxu1 }
 0x7d9   : > { %v12751_v4 = vpop.f32.mrb[173].mxu1 }
 0x7da   : > { %v12753_v9 = vpop.f32.mrb[174].mxu1 }
 0x7db   : > { %v12755_v43 = vpop.f32.mrb[175].mxu1 }
 0x7f0   : > { %v9720_v60 = vpop.f32.mrb[168].mxu0 }
 0x7f1   : > { %v6787_v5 = vadd.f32 %v9720_v60, %v12760_v48  ;;  %v6639_v18 = vpop.f32.mrb[169].mxu0 }
 0x7f2   : > { %v6785_v46 = vadd.f32 %v12760_v48, %v6639_v18  ;;  %v9721_v21 = vpop.f32.mrb[170].mxu0 }
 0x7f3   : > { %v6788_v28 = vadd.f32 %v9721_v21, %v12760_v48  ;;  %v6642_v50 = vpop.f32.mrb[171].mxu0  ;;  %v6815_v45 = vmax.f32 %v6787_v5, 0.0 }
 0x7f4   : > { %v6786_v57 = vadd.f32 %v12760_v48, %v6642_v50  ;;  %v6813_v10 = vmax.f32 %v6785_v46, 0.0 }
 0x7f5   : > { %v6816_v62 = vmax.f32 %v6788_v28, 0.0 }
 0x7f6   : > { %v6814_v36 = vmax.f32 %v6786_v57, 0.0  ;;  %v10986_v57 = vld [vmem:[%s13219_s7 + $0x30] sm:$0xff]  }
 0x7f7   : > { %v12766_v24 = vpack.c.bf16 %v6816_v62, %v6815_v45 }
 0x7f8   : > { %v12768_v34 = vpack.c.bf16 %v6814_v36, %v6813_v10  ;;  %v12770_v38 = vpop.f32.mrb[176].mxu1  ;;  %v9724_v49 = vpop.f32.mrb[172].mxu0 }
 0x7f9   : > { %v6791_v61 = vadd.f32 %v9724_v49, %v12760_v48  ;;  %v12773_v17 = vpop.f32.mrb[177].mxu1  ;;  %v6655_v2 = vpop.f32.mrb[173].mxu0 }
 0x7fa   : > { %v6789_v20 = vadd.f32 %v12760_v48, %v6655_v2  ;;  %v12779_v32 = vpop.f32.mrb[178].mxu1  ;;  %v9725_v44 = vpop.f32.mrb[174].mxu0  ;;  %9762 = vmatprep.mubr.bf16.mxu1 %v12768_v34 }
 0x7fb   : > { %v6792_v56 = vadd.f32 %v9725_v44, %v12760_v48  ;;  %v12783_v63 = vpop.f32.mrb[179].mxu1  ;;  %v6658_v22 = vpop.f32.mrb[175].mxu0  ;;  %9763 = vmatmul.mubr.bf16.vlgmr.msra.gmra.mrb[180].mxu1 %v12766_v24  ;;  %v6819_v31 = vmax.f32 %v6791_v61, 0.0 }
 0x7fc   : > { %v6790_v12 = vadd.f32 %v12760_v48, %v6658_v22  ;;  %9791 = vmatpush3.bf16.msra.mxu1 %v10980_v53  ;;  %v6817_v25 = vmax.f32 %v6789_v20, 0.0  ;;  %v10985_v53 = vld [vmem:[%s13219_s7 + $0x28] sm:$0xff]  }
 0x7fd   : > { %v6820_v54 = vmax.f32 %v6792_v56, 0.0  ;;  %9792 = vmatprep.subr.bf16.mxu1 %v10981_v14 }
 0x7fe   : > { %v6818_v29 = vmax.f32 %v6790_v12, 0.0 }
 0x7ff   : > { %v12790_v42 = vpack.c.bf16 %v6820_v54, %v6819_v31 }
 0x800   : > { %v12792_v47 = vpack.c.bf16 %v6818_v29, %v6817_v25  ;;  %v9728_v0 = vpop.f32.mrb[176].mxu0  ;;  %9793 = vmatpush3.bf16.msra.mxu1 %v10981_v14  ;;  %v10987_v14 = vld [vmem:[%s13219_s7 + $0x38] sm:$0xff]  }
 0x801   : > { %v6795_v1 = vadd.f32 %v9728_v0, %v12760_v48  ;;  %v6671_v3 = vpop.f32.mrb[177].mxu0  ;;  %9794 = vmatprep.subr.bf16.mxu1 %v10982_v7 }
 0x802   : > { %v6793_v15 = vadd.f32 %v12760_v48, %v6671_v3  ;;  %v9729_v16 = vpop.f32.mrb[178].mxu0  ;;  %9766 = vmatprep.mubr.bf16.mxu1 %v12792_v47 }
 0x803   : > { %v6796_v8 = vadd.f32 %v9729_v16, %v12760_v48  ;;  %v6674_v40 = vpop.f32.mrb[179].mxu0  ;;  %9767 = vmatmul.mubr.bf16.gmra.mrb[184].mxu1 %v12790_v42  ;;  %v6823_v37 = vmax.f32 %v6795_v1, 0.0 }
 0x804   : > { %v6794_v30 = vadd.f32 %v12760_v48, %v6674_v40  ;;  %9795 = vmatpush3.bf16.msra.mxu1 %v10982_v7  ;;  %v6821_v6 = vmax.f32 %v6793_v15, 0.0 }
 0x805   : > { %v6824_v52 = vmax.f32 %v6796_v8, 0.0  ;;  %9796 = vmatprep.subr.bf16.mxu1 %v10983_v13 }
 0x806   : > { %v6822_v35 = vmax.f32 %v6794_v30, 0.0 }
 0x807   : > { %v12806_v27 = vpack.c.bf16 %v6824_v52, %v6823_v37 }
 0x808   : > { %v12808_v11 = vpack.c.bf16 %v6822_v35, %v6821_v6  ;;  %v9732_v39 = vpop.f32.mrb[180].mxu0  ;;  %9797 = vmatpush3.bf16.msra.mxu1 %v10983_v13  ;;  %v11068_v35 = vmov 0.0  }
 0x809   : > { %v6799_v33 = vadd.f32 %v9732_v39, %v12760_v48  ;;  %v6687_v23 = vpop.f32.mrb[181].mxu0  ;;  %9798 = vmatprep.subr.bf16.mxu1 %v10984_v26  ;;  %9878 = vmatprep.subr.bf16.mxu0 %v11068_v35 }
 0x80a   : > { %v6797_v60 = vadd.f32 %v12760_v48, %v6687_v23  ;;  %v9733_v5 = vpop.f32.mrb[182].mxu0  ;;  %9770 = vmatprep.mubr.bf16.mxu1 %v12808_v11  ;;  %9894 = vmatprep.mubr.msk.bf16.mxu0 %vm11069_vm3, %v11068_v35 }
 0x80b   : > { %v6800_v18 = vadd.f32 %v9733_v5, %v12760_v48  ;;  %v6690_v46 = vpop.f32.mrb[183].mxu0  ;;  %9771 = vmatmul.mubr.bf16.gmra.mrb[188].mxu1 %v12806_v27  ;;  %v6827_v28 = vmax.f32 %v6799_v33, 0.0 }
 0x80c   : > { %v6798_v21 = vadd.f32 %v12760_v48, %v6690_v46  ;;  %9799 = vmatpush3.bf16.msra.mxu1 %v10984_v26  ;;  %v6825_v45 = vmax.f32 %v6797_v60, 0.0 }
 0x80d   : > { %v6828_v50 = vmax.f32 %v6800_v18, 0.0  ;;  %9800 = vmatprep.subr.bf16.mxu1 %v10985_v53 }
 0x80e   : > { %v6826_v62 = vmax.f32 %v6798_v21, 0.0 }
 0x80f   : > { %v12822_v10 = vpack.c.bf16 %v6828_v50, %v6827_v28 }
 0x810   : > { %v12824_v36 = vpack.c.bf16 %v6826_v62, %v6825_v45  ;;  %v9736_v49 = vpop.f32.mrb[184].mxu0  ;;  %9801 = vmatpush3.bf16.msra.mxu1 %v10985_v53  ;;  %v11000_v62 = vld [vmem:[%s13223_s11 + $0x10] sm:$0xff]  }
 0x811   : > { %v10066_v61 = vadd.f32 %v9736_v49, %v12741_v19  ;;  %v6703_v2 = vpop.f32.mrb[185].mxu0  ;;  %9802 = vmatprep.subr.bf16.mxu1 %v10986_v57 }
 0x812   : > { %v10067_v20 = vadd.f32 %v6703_v2, %v12743_v41  ;;  %v9737_v44 = vpop.f32.mrb[186].mxu0  ;;  %9774 = vmatprep.mubr.bf16.mxu1 %v12824_v36  ;;  %v12841_v41 = vld [vmem:[%s13219_s7 + $0x80] sm:$0xff]  }
 0x813   : > { %v6803_v56 = vadd.f32 %v10066_v61, %v12760_v48  ;;  %v10068_v22 = vadd.f32 %v9737_v44, %v12745_v58  ;;  %v6706_v12 = vpop.f32.mrb[187].mxu0  ;;  %9775 = vmatmul.mubr.bf16.gmra.mrb[192].mxu1 %v12822_v10 }
 0x814   : > { %v6801_v19 = vadd.f32 %v10067_v20, %v12760_v48  ;;  %v10069_v31 = vadd.f32 %v6706_v12, %v12747_v51  ;;  %9803 = vmatpush3.bf16.msra.mxu1 %v10986_v57  ;;  %v10989_v12 = vld [vmem:[%s13219_s7 + $0x88] sm:$0xff]  }
 0x815   : > { %v6804_v54 = vadd.f32 %v10068_v22, %v12760_v48  ;;  %9804 = vmatprep.subr.bf16.mxu1 %v10987_v14  ;;  %v6831_v25 = vmax.f32 %v6803_v56, 0.0  ;;  %v11006_v22 = vld [vmem:[%s13223_s11 + $0x28] sm:$0xff]  }
 0x816   : > { %v6802_v7 = vadd.f32 %v10069_v31, %v12760_v48  ;;  %v6829_v29 = vmax.f32 %v6801_v19, 0.0  ;;  %v11008_v19 = vld [vmem:[%s13223_s11 + $0x30] sm:$0xff]  }
 0x817   : > { %v6832_v58 = vmax.f32 %v6804_v54, 0.0  ;;  %v10990_v31 = vld [vmem:[%s13219_s7 + $0x90] sm:$0xff]   ;;  %v10991_v54 = vld [vmem:[%s13219_s7 + $0x98] sm:$0xff]  }
 0x818   : > { %v6830_v0 = vmax.f32 %v6802_v7, 0.0  ;;  %v9740_v1 = vpop.f32.mrb[188].mxu0  ;;  %9805 = vmatpush3.bf16.msra.mxu1 %v10987_v14  ;;  %v11002_v14 = vld [vmem:[%s13223_s11 + $0x18] sm:$0xff]   ;;  %v10994_v7 = vld [vmem:[%s13219_s7 + $0xb0] sm:$0xff]  }
 0x819   : > { %v10070_v3 = vadd.f32 %v9740_v1, %v12749_v55  ;;  %v6719_v51 = vpop.f32.mrb[189].mxu0  ;;  %v12845_v13 = vpack.c.bf16 %v6832_v58, %v6831_v25  ;;  %9834 = vmatprep.subr.bf16.mxu1 %v12841_v41  ;;  %v10995_v25 = vld [vmem:[%s13219_s7 + $0xb8] sm:$0xff]   ;;  %v10997_v58 = vld [vmem:[%s13224_s12] sm:$0xff]  }
 0x81a   : > { %v10071_v15 = vadd.f32 %v6719_v51, %v12751_v4  ;;  %v9741_v16 = vpop.f32.mrb[190].mxu0  ;;  %v12849_v8 = vpack.c.bf16 %v6830_v0, %v6829_v29  ;;  %v10996_v4 = vld [vmem:[%s13223_s11] sm:$0xff]   ;;  %v10999_v29 = vld [vmem:[%s13224_s12 + $0x8] sm:$0xff]  }
 0x81b   : > { %v6807_v40 = vadd.f32 %v10070_v3, %v12760_v48  ;;  %v10072_v30 = vadd.f32 %v9741_v16, %v12753_v9  ;;  %v6722_v37 = vpop.f32.mrb[191].mxu0  ;;  %9879 = vmatpush3.bf16.msra.mxu0 %v10996_v4 }
 0x81c   : > { %v6805_v52 = vadd.f32 %v10071_v15, %v12760_v48  ;;  %v10073_v26 = vadd.f32 %v6722_v37, %v12755_v43  ;;  %9778 = vmatprep.mubr.bf16.mxu1 %v12849_v8  ;;  %v10998_v43 = vld [vmem:[%s13223_s11 + $0x8] sm:$0xff]   ;;  %9880 = vmatprep.subr.bf16.mxu0 %v11068_v35 }
 0x81d   : > { %v6808_v55 = vadd.f32 %v10072_v30, %v12760_v48  ;;  %9779 = vmatmul.mubr.bf16.gmra.mrb[196].mxu1 %v12845_v13  ;;  %v6835_v9 = vmax.f32 %v6807_v40, 0.0 }
 0x81e   : > { %v6806_v6 = vadd.f32 %v10073_v26, %v12760_v48  ;;  %v6833_v33 = vmax.f32 %v6805_v52, 0.0 }
 0x81f   : > { %v6836_v39 = vmax.f32 %v6808_v55, 0.0  ;;  %9881 = vmatpush3.bf16.msra.mxu0 %v10998_v43 }
 0x820   : > { %v6834_v23 = vmax.f32 %v6806_v6, 0.0  ;;  %v9744_v53 = vpop.f32.mrb[192].mxu0  ;;  %9882 = vmatprep.subr.bf16.mxu0 %v11068_v35 }
 0x821   : > { %v10074_v60 = vadd.f32 %v9744_v53, %v12770_v38  ;;  %v6735_v5 = vpop.f32.mrb[193].mxu0  ;;  %v12868_v18 = vpack.c.bf16 %v6836_v39, %v6835_v9 }
 0x822   : > { %v10075_v46 = vadd.f32 %v6735_v5, %v12773_v17  ;;  %v9745_v21 = vpop.f32.mrb[194].mxu0  ;;  %v12871_v28 = vpack.c.bf16 %v6834_v23, %v6833_v33  ;;  %v11012_v23 = vld [vmem:[%s13225_s13] sm:$0xff]  }
 0x823   : > { %v6811_v50 = vadd.f32 %v10074_v60, %v12760_v48  ;;  %v10076_v57 = vadd.f32 %v9745_v21, %v12779_v32  ;;  %v6738_v45 = vpop.f32.mrb[195].mxu0  ;;  %9883 = vmatpush3.bf16.msra.mxu0 %v11000_v62 }
 0x824   : > { %v6809_v38 = vadd.f32 %v10075_v46, %v12760_v48  ;;  %v10077_v49 = vadd.f32 %v6738_v45, %v12783_v63  ;;  %9782 = vmatprep.mubr.bf16.mxu1 %v12871_v28  ;;  %9884 = vmatprep.subr.bf16.mxu0 %v11068_v35 }
 0x825   : > { %v6812_v17 = vadd.f32 %v10076_v57, %v12760_v48  ;;  %9783 = vmatmul.mubr.bf16.gmra.mrb[200].mxu1 %v12868_v18  ;;  %v6839_v61 = vmax.f32 %v6811_v50, 0.0  ;;  %v11013_v50 = vld [vmem:[%s13225_s13 + $0x8] sm:$0xff]  }
 0x826   : > { %v6810_v32 = vadd.f32 %v10077_v49, %v12760_v48  ;;  %v6837_v20 = vmax.f32 %v6809_v38, 0.0  ;;  %v11004_v48 = vld [vmem:[%s13223_s11 + $0x20] sm:$0xff]  }
 0x827   : > { %v6840_v2 = vmax.f32 %v6812_v17, 0.0  ;;  %9885 = vmatpush3.bf16.msra.mxu0 %v11002_v14 }
 0x828   : > { %v6838_v44 = vmax.f32 %v6810_v32, 0.0  ;;  %9886 = vmatprep.subr.bf16.mxu0 %v11068_v35 }
 0x829   : > { %v12889_v63 = vpack.c.bf16 %v6840_v2, %v6839_v61  ;;  %v11014_v2 = vld [vmem:[%s13225_s13 + $0x10] sm:$0xff]  }
 0x82a   : > { %v12891_v56 = vpack.c.bf16 %v6838_v44, %v6837_v20  ;;  %v11015_v44 = vld [vmem:[%s13225_s13 + $0x18] ss:$0 sps:$4 sm:$0xff]  }
 0x82b   : > { %9887 = vmatpush3.bf16.msra.mxu0 %v11004_v48 }
 0x82c   : > { %9786 = vmatprep.mubr.bf16.mxu1 %v12891_v56  ;;  %9888 = vmatprep.subr.bf16.mxu0 %v11068_v35 }
 0x82d   : > { %9787 = vmatmul.mubr.bf16.gmra.mrb[204].mxu1 %v12889_v63 }
 0x82e   : > { %9806 = vmatprep.mubr.bf16.mxu1 %v12663_v59 }
 0x82f   : > { %9889 = vmatpush3.bf16.msra.mxu0 %v11006_v22 }
 0x830   : > { %9890 = vmatprep.subr.bf16.mxu0 %v11068_v35 }
 0x833   : > { %9891 = vmatpush3.bf16.msra.mxu0 %v11008_v19 }
 0x834   : > { %9892 = vmatprep.subr.bf16.mxu0 %v11068_v35 }
 0x835   : > { %9807 = vmatmul.mubr.bf16.vlgmr.msra.gmra.mrb[180].mxu1 %v12768_v34  ;;  %v10992_v34 = vld [vmem:[%s13219_s7 + $0xa0] sm:$0xff]  }
 0x836   : > { %9810 = vmatprep.mubr.bf16.mxu1 %v12766_v24  ;;  %9835 = vmatpush3.bf16.msra.mxu1 %v12841_v41  ;;  %v10993_v41 = vld [vmem:[%s13219_s7 + $0xa8] sm:$0xff]  }
 0x837   : > { %9836 = vmatprep.subr.bf16.mxu1 %v10989_v12 }
 0x83a   : > { %9837 = vmatpush3.bf16.msra.mxu1 %v10989_v12 }
 0x83b   : > { %9838 = vmatprep.subr.bf16.mxu1 %v10990_v31 }
 0x83d   : > { %9811 = vmatmul.mubr.bf16.gmra.mrb[184].mxu1 %v12792_v47 }
 0x83e   : > { %9814 = vmatprep.mubr.bf16.mxu1 %v12790_v42  ;;  %9839 = vmatpush3.bf16.msra.mxu1 %v10990_v31  ;;  %v8019_v31 = vsel %vm8017_vm4, %v11015_v44, 0 }
 0x83f   : > { %9840 = vmatprep.subr.bf16.mxu1 %v10991_v54 }
 0x842   : > { %9841 = vmatpush3.bf16.msra.mxu1 %v10991_v54 }
 0x843   : > { %9842 = vmatprep.subr.bf16.mxu1 %v10992_v34 }
 0x845   : > { %9815 = vmatmul.mubr.bf16.gmra.mrb[188].mxu1 %v12808_v11 }
 0x846   : > { %9818 = vmatprep.mubr.bf16.mxu1 %v12806_v27  ;;  %9843 = vmatpush3.bf16.msra.mxu1 %v10992_v34 }
 0x847   : > { %9844 = vmatprep.subr.bf16.mxu1 %v10993_v41 }
 0x84a   : > { %9845 = vmatpush3.bf16.msra.mxu1 %v10993_v41 }
 0x84b   : > { %9846 = vmatprep.subr.bf16.mxu1 %v10994_v7 }
 0x84d   : > { %9819 = vmatmul.mubr.bf16.gmra.mrb[192].mxu1 %v12824_v36 }
 0x84e   : > { %9822 = vmatprep.mubr.bf16.mxu1 %v12822_v10  ;;  %9847 = vmatpush3.bf16.msra.mxu1 %v10994_v7 }
 0x84f   : > { %9848 = vmatprep.subr.bf16.mxu1 %v10995_v25 }
 0x852   : > { %9849 = vmatpush3.bf16.msra.mxu1 %v10995_v25 }
 0x853   : > { %9922 = vmatprep.subr.bf16.mxu1 %v11068_v35 }
 0x855   : > { %9823 = vmatmul.mubr.bf16.gmra.mrb[196].mxu1 %v12849_v8 }
 0x856   : > { %9826 = vmatprep.mubr.bf16.mxu1 %v12845_v13 }
 0x85d   : > { %9827 = vmatmul.mubr.bf16.gmra.mrb[200].mxu1 %v12871_v28 }
 0x85e   : > { %9830 = vmatprep.mubr.bf16.mxu1 %v12868_v18 }
 0x865   : > { %9831 = vmatmul.mubr.bf16.gmra.mrb[204].mxu1 %v12891_v56 }
 0x866   : > { %9850 = vmatprep.mubr.bf16.mxu1 %v12766_v24  ;;  %v11001_v24 = vld [vmem:[%s13224_s12 + $0x10] sm:$0xff]  }
 0x86d   : > { %9851 = vmatmul.mubr.bf16.vlgmr.msra.gmra.mrb[180].mxu1 %v12792_v47  ;;  %v11005_v47 = vld [vmem:[%s13224_s12 + $0x20] sm:$0xff]  }
 0x86e   : > { %9854 = vmatprep.mubr.bf16.mxu1 %v12790_v42  ;;  %9923 = vmatpush3.bf16.msra.mxu1 %v10997_v58  ;;  %v11003_v42 = vld [vmem:[%s13224_s12 + $0x18] sm:$0xff]  }
 0x86f   : > { %9924 = vmatprep.subr.bf16.mxu1 %v11068_v35 }
 0x872   : > { %9925 = vmatpush3.bf16.msra.mxu1 %v10999_v29 }
 0x873   : > { %9926 = vmatprep.subr.bf16.mxu1 %v11068_v35 }
 0x875   : > { %9855 = vmatmul.mubr.bf16.gmra.mrb[184].mxu1 %v12808_v11  ;;  %v11009_v11 = vld [vmem:[%s13224_s12 + $0x30] sm:$0xff]  }
 0x876   : > { %9858 = vmatprep.mubr.bf16.mxu1 %v12806_v27  ;;  %9927 = vmatpush3.bf16.msra.mxu1 %v11001_v24  ;;  %v11007_v27 = vld [vmem:[%s13224_s12 + $0x28] sm:$0xff]  }
 0x877   : > { %9928 = vmatprep.subr.bf16.mxu1 %v11068_v35 }
 0x87a   : > { %9929 = vmatpush3.bf16.msra.mxu1 %v11003_v42 }
 0x87b   : > { %9930 = vmatprep.subr.bf16.mxu1 %v11068_v35 }
 0x87d   : > { %9859 = vmatmul.mubr.bf16.gmra.mrb[188].mxu1 %v12824_v36  ;;  %v11011_v36 = vld [vmem:[%s13224_s12 + $0x38] sm:$0xff]  }
 0x87e   : > { %9862 = vmatprep.mubr.bf16.mxu1 %v12822_v10  ;;  %9931 = vmatpush3.bf16.msra.mxu1 %v11005_v47  ;;  %v11010_v10 = vld [vmem:[%s13223_s11 + $0x38] sm:$0xff]  }
 0x87f   : > { %9932 = vmatprep.subr.bf16.mxu1 %v11068_v35  ;;  %9893 = vmatpush3.bf16.msra.mxu0 %v11010_v10 }
 0x880   : > { %9966 = vmatprep.subr.bf16.mxu0 %v11068_v35 }
 0x882   : > { %9933 = vmatpush3.bf16.msra.mxu1 %v11007_v27 }
 0x883   : > { %9934 = vmatprep.subr.bf16.mxu1 %v11068_v35 }
 0x885   : > { %9863 = vmatmul.mubr.bf16.gmra.mrb[192].mxu1 %v12849_v8 }
 0x886   : > { %9866 = vmatprep.mubr.bf16.mxu1 %v12845_v13  ;;  %9935 = vmatpush3.bf16.msra.mxu1 %v11009_v11 }
 0x887   : > { %9936 = vmatprep.subr.bf16.mxu1 %v11068_v35 }
 0x88a   : > { %9937 = vmatpush3.bf16.msra.mxu1 %v11011_v36 }
 0x88d   : > { %9867 = vmatmul.mubr.bf16.gmra.mrb[196].mxu1 %v12871_v28 }
 0x88e   : > { %9870 = vmatprep.mubr.bf16.mxu1 %v12868_v18 }
 0x895   : > { %9871 = vmatmul.mubr.bf16.gmra.mrb[200].mxu1 %v12891_v56 }
 0x896   : > { %9874 = vmatprep.mubr.bf16.mxu1 %v12889_v63 }
 0x89d   : > { %9875 = vmatmul.mubr.bf16.gmra.mrb[204].mxu1 %v12663_v59  ;;  %v13001_v59 = vld [vmem:[%s13220_s8] ss:$0 sm:$0xff] }
 0x89e   : > { %9938 = vmatprep.mubr.msk.bf16.mxu1 %vm11069_vm3, %v11068_v35 }
 0x940   : > { %v9852_v0 = vpop.f32.mrb[180].mxu1 }
 0x941   : > { %v7582_v1 = vadd.f32 %v9852_v0, %v13001_v59  ;;  %v7434_v3 = vpop.f32.mrb[181].mxu1 }
 0x942   : > { %v7580_v51 = vadd.f32 %v13001_v59, %v7434_v3  ;;  %v9853_v13 = vpop.f32.mrb[182].mxu1 }
 0x943   : > { %v7583_v15 = vadd.f32 %v9853_v13, %v13001_v59  ;;  %v7437_v16 = vpop.f32.mrb[183].mxu1  ;;  %v7610_v40 = vmax.f32 %v7582_v1, 0.0 }
 0x944   : > { %v7581_v8 = vadd.f32 %v13001_v59, %v7437_v16  ;;  %v7608_v37 = vmax.f32 %v7580_v51, 0.0 }
 0x945   : > { %v7611_v30 = vmax.f32 %v7583_v15, 0.0 }
 0x946   : > { %v7609_v52 = vmax.f32 %v7581_v8, 0.0 }
 0x947   : > { %v7637_v26 = vpack.c.bf16 %v7611_v30, %v7610_v40 }
 0x948   : > { %v7636_v55 = vpack.c.bf16 %v7609_v52, %v7608_v37  ;;  %v9856_v4 = vpop.f32.mrb[184].mxu1 }
 0x949   : > { %v7586_v6 = vadd.f32 %v9856_v4, %v13001_v59  ;;  %v7450_v9 = vpop.f32.mrb[185].mxu1 }
 0x94a   : > { %v7650_v39 = vmax.bf16 %v7637_v26, %v7636_v55  ;;  %v7584_v43 = vadd.f32 %v13001_v59, %v7450_v9  ;;  %v9857_v33 = vpop.f32.mrb[186].mxu1 }
 0x94b   : > { %v7587_v53 = vadd.f32 %v9857_v33, %v13001_v59  ;;  %v7453_v60 = vpop.f32.mrb[187].mxu1  ;;  %v7614_v18 = vmax.f32 %v7586_v6, 0.0 }
 0x94c   : > { %v7585_v5 = vadd.f32 %v13001_v59, %v7453_v60  ;;  %9895 = vmatmul.mubr.bf16.vlgmr.msra.gmra.mrb[196].mxu0 %v7650_v39  ;;  %9939 = vmatmul.mubr.bf16.vlgmr.msra.gmra.mrb[208].mxu1 %v7650_v39  ;;  %v7612_v21 = vmax.f32 %v7584_v43, 0.0 }
 0x94d   : > { %v7615_v46 = vmax.f32 %v7587_v53, 0.0  ;;  %9898 = vmatprep.mubr.msk.bf16.mxu0 %vm11069_vm3, %v11068_v35  ;;  %9942 = vmatprep.mubr.msk.bf16.mxu1 %vm11069_vm3, %v11068_v35 }
 0x94e   : > { %v7613_v28 = vmax.f32 %v7585_v5, 0.0  ;;  %9967 = vmatpush3.bf16.msra.mxu0 %v11012_v23 }
 0x94f   : > { %v7639_v57 = vpack.c.bf16 %v7615_v46, %v7614_v18  ;;  %9968 = vmatprep.subr.bf16.mxu0 %v11068_v35 }
 0x950   : > { %v7638_v45 = vpack.c.bf16 %v7613_v28, %v7612_v21  ;;  %v9860_v62 = vpop.f32.mrb[188].mxu1 }
 0x951   : > { %v7590_v38 = vadd.f32 %v9860_v62, %v13001_v59  ;;  %v7466_v49 = vpop.f32.mrb[189].mxu1 }
 0x952   : > { %v7588_v17 = vadd.f32 %v13001_v59, %v7466_v49  ;;  %v9861_v32 = vpop.f32.mrb[190].mxu1  ;;  %v7651_v61 = vmax.bf16 %v7639_v57, %v7638_v45  ;;  %9969 = vmatpush3.bf16.msra.mxu0 %v11013_v50 }
 0x953   : > { %v7591_v14 = vadd.f32 %v9861_v32, %v13001_v59  ;;  %v7469_v20 = vpop.f32.mrb[191].mxu1  ;;  %9970 = vmatprep.subr.bf16.mxu0 %v11068_v35  ;;  %v7618_v56 = vmax.f32 %v7590_v38, 0.0 }
 0x954   : > { %v7589_v63 = vadd.f32 %v13001_v59, %v7469_v20  ;;  %9899 = vmatmul.mubr.bf16.gmra.mrb[200].mxu0 %v7651_v61  ;;  %9943 = vmatmul.mubr.bf16.gmra.mrb[212].mxu1 %v7651_v61  ;;  %v7616_v22 = vmax.f32 %v7588_v17, 0.0 }
 0x955   : > { %v7619_v48 = vmax.f32 %v7591_v14, 0.0  ;;  %9902 = vmatprep.mubr.msk.bf16.mxu0 %vm11069_vm3, %v11068_v35  ;;  %9946 = vmatprep.mubr.msk.bf16.mxu1 %vm11069_vm3, %v11068_v35 }
 0x956   : > { %v7617_v12 = vmax.f32 %v7589_v63, 0.0  ;;  %9971 = vmatpush3.bf16.msra.mxu0 %v11014_v2 }
 0x957   : > { %v7641_v19 = vpack.c.bf16 %v7619_v48, %v7618_v56  ;;  %9972 = vmatprep.subr.bf16.mxu0 %v11068_v35 }
 0x958   : > { %v7640_v54 = vpack.c.bf16 %v7617_v12, %v7616_v22  ;;  %v9864_v34 = vpop.f32.mrb[192].mxu1 }
 0x959   : > { %v7594_v41 = vadd.f32 %v9864_v34, %v13001_v59  ;;  %v7482_v7 = vpop.f32.mrb[193].mxu1 }
 0x95a   : > { %v7592_v25 = vadd.f32 %v13001_v59, %v7482_v7  ;;  %v9865_v58 = vpop.f32.mrb[194].mxu1  ;;  %v7652_v29 = vmax.bf16 %v7641_v19, %v7640_v54  ;;  %9973 = vmatpush3.bf16.msra.mxu0 %v8019_v31 }
 0x95b   : > { %v7595_v24 = vadd.f32 %v9865_v58, %v13001_v59  ;;  %v7485_v42 = vpop.f32.mrb[195].mxu1  ;;  %9978 = vmatprep.subr.bf16.mxu0 %v11068_v35  ;;  %v7622_v27 = vmax.f32 %v7594_v41, 0.0 }
 0x95c   : > { %v7593_v47 = vadd.f32 %v13001_v59, %v7485_v42  ;;  %9903 = vmatmul.mubr.bf16.gmra.mrb[204].mxu0 %v7652_v29  ;;  %9947 = vmatmul.mubr.bf16.gmra.mrb[216].mxu1 %v7652_v29  ;;  %v7620_v10 = vmax.f32 %v7592_v25, 0.0 }
 0x95d   : > { %v7623_v11 = vmax.f32 %v7595_v24, 0.0  ;;  %9906 = vmatprep.mubr.msk.bf16.mxu0 %vm11069_vm3, %v11068_v35  ;;  %9950 = vmatprep.mubr.msk.bf16.mxu1 %vm11069_vm3, %v11068_v35 }
 0x95e   : > { %v7621_v36 = vmax.f32 %v7593_v47, 0.0  ;;  %v11016_v47 = vld [vmem:[%s13225_s13 + $0x1c] sm:$0xff]  }
 0x95f   : > { %v7643_v0 = vpack.c.bf16 %v7623_v11, %v7622_v27 }
 0x960   : > { %v7642_v1 = vpack.c.bf16 %v7621_v36, %v7620_v10  ;;  %v9868_v3 = vpop.f32.mrb[196].mxu1  ;;  %v11017_v36 = vld [vmem:[%s13225_s13 + $0x24] sm:$0xff]  }
 0x961   : > { %v7598_v51 = vadd.f32 %v9868_v3, %v13001_v59  ;;  %v7498_v13 = vpop.f32.mrb[197].mxu1 }
 0x962   : > { %v7596_v15 = vadd.f32 %v13001_v59, %v7498_v13  ;;  %v9869_v16 = vpop.f32.mrb[198].mxu1  ;;  %v7653_v8 = vmax.bf16 %v7643_v0, %v7642_v1 }
 0x963   : > { %v7599_v40 = vadd.f32 %v9869_v16, %v13001_v59  ;;  %v7501_v30 = vpop.f32.mrb[199].mxu1  ;;  %v7626_v52 = vmax.f32 %v7598_v51, 0.0 }
 0x964   : > { %v7597_v37 = vadd.f32 %v13001_v59, %v7501_v30  ;;  %9907 = vmatmul.mubr.bf16.gmra.mrb[208].mxu0 %v7653_v8  ;;  %9951 = vmatmul.mubr.bf16.gmra.mrb[220].mxu1 %v7653_v8  ;;  %v7624_v55 = vmax.f32 %v7596_v15, 0.0 }
 0x965   : > { %v7627_v26 = vmax.f32 %v7599_v40, 0.0  ;;  %9910 = vmatprep.mubr.msk.bf16.mxu0 %vm11069_vm3, %v11068_v35  ;;  %9954 = vmatprep.mubr.msk.bf16.mxu1 %vm11069_vm3, %v11068_v35  ;;  %v11018_v40 = vld [vmem:[%s13225_s13 + $0x2c] sm:$0xff]  }
 0x966   : > { %v7625_v4 = vmax.f32 %v7597_v37, 0.0  ;;  %v11019_v37 = vld [vmem:[%s13225_s13 + $0x34] ss:$0 sps:$4 sm:$0xff]  }
 0x967   : > { %v7645_v6 = vpack.c.bf16 %v7627_v26, %v7626_v52 }
 0x968   : > { %v7644_v9 = vpack.c.bf16 %v7625_v4, %v7624_v55  ;;  %v9872_v39 = vpop.f32.mrb[200].mxu1 }
 0x969   : > { %v7602_v43 = vadd.f32 %v9872_v39, %v13001_v59  ;;  %v7514_v33 = vpop.f32.mrb[201].mxu1 }
 0x96a   : > { %v7600_v23 = vadd.f32 %v13001_v59, %v7514_v33  ;;  %v9873_v53 = vpop.f32.mrb[202].mxu1  ;;  %v7654_v60 = vmax.bf16 %v7645_v6, %v7644_v9  ;;  %v8103_v9 = vsel %vm8017_vm4, %v11019_v37, 0 }
 0x96b   : > { %v7603_v5 = vadd.f32 %v9873_v53, %v13001_v59  ;;  %v7517_v18 = vpop.f32.mrb[203].mxu1  ;;  %v7630_v21 = vmax.f32 %v7602_v43, 0.0 }
 0x96c   : > { %v7601_v46 = vadd.f32 %v13001_v59, %v7517_v18  ;;  %9911 = vmatmul.mubr.bf16.gmra.mrb[212].mxu0 %v7654_v60  ;;  %9955 = vmatmul.mubr.bf16.gmra.mrb[224].mxu1 %v7654_v60  ;;  %v7628_v50 = vmax.f32 %v7600_v23, 0.0  ;;  %v11020_v60 = vld [vmem:[%s13225_s13 + $0x38] sm:$0xff]  }
 0x96d   : > { %v7631_v28 = vmax.f32 %v7603_v5, 0.0  ;;  %9914 = vmatprep.mubr.msk.bf16.mxu0 %vm11069_vm3, %v11068_v35  ;;  %9958 = vmatprep.mubr.msk.bf16.mxu1 %vm11069_vm3, %v11068_v35 }
 0x96e   : > { %v7629_v57 = vmax.f32 %v7601_v46, 0.0 }
 0x96f   : > { %v7647_v45 = vpack.c.bf16 %v7631_v28, %v7630_v21  ;;  %v11021_v21 = vld [vmem:[%s13225_s13 + $0x40] sm:$0xff]  }
 0x970   : > { %v7646_v62 = vpack.c.bf16 %v7629_v57, %v7628_v50  ;;  %v9876_v38 = vpop.f32.mrb[204].mxu1 }
 0x971   : > { %v7606_v49 = vadd.f32 %v9876_v38, %v13001_v59  ;;  %v7530_v17 = vpop.f32.mrb[205].mxu1 }
 0x972   : > { %v7604_v32 = vadd.f32 %v13001_v59, %v7530_v17  ;;  %v9877_v61 = vpop.f32.mrb[206].mxu1  ;;  %v7655_v2 = vmax.bf16 %v7647_v45, %v7646_v62 }
 0x973   : > { %v7607_v14 = vadd.f32 %v9877_v61, %v13001_v59  ;;  %v7533_v20 = vpop.f32.mrb[207].mxu1  ;;  %v7634_v63 = vmax.f32 %v7606_v49, 0.0 }
 0x974   : > { %v7605_v44 = vadd.f32 %v13001_v59, %v7533_v20  ;;  %9915 = vmatmul.mubr.bf16.gmra.mrb[216].mxu0 %v7655_v2  ;;  %9959 = vmatmul.mubr.bf16.gmra.mrb[228].mxu1 %v7655_v2  ;;  %v7632_v48 = vmax.f32 %v7604_v32, 0.0  ;;  %v11022_v32 = vld [vmem:[%s13225_s13 + $0x48] sm:$0xff]   ;;  %v11023_v2 = vld [vmem:[%s13225_s13 + $0x50] ss:$0 sps:$4 sm:$0xff]  }
 0x975   : > { %v7635_v56 = vmax.f32 %v7607_v14, 0.0  ;;  %9918 = vmatprep.mubr.msk.bf16.mxu0 %vm11069_vm3, %v11068_v35  ;;  %9962 = vmatprep.mubr.msk.bf16.mxu1 %vm11069_vm3, %v11068_v35 }
 0x976   : > { %v7633_v22 = vmax.f32 %v7605_v44, 0.0 }
 0x977   : > { %v7649_v12 = vpack.c.bf16 %v7635_v56, %v7634_v63 }
 0x978   : > { %v7648_v19 = vpack.c.bf16 %v7633_v22, %v7632_v48  ;;  %v8181_v48 = vsel %vm8017_vm4, %v11023_v2, 0 }
 0x97a   : > { %v7656_v31 = vmax.bf16 %v7649_v12, %v7648_v19 }
 0x97c   : > { %9919 = vmatmul.mubr.bf16.gmra.mrb[220].mxu0 %v7656_v31  ;;  %9963 = vmatmul.mubr.bf16.gmra.mrb[232].mxu1 %v7656_v31 }
 0x97d   : > { %9974 = vmatprep.mubr.msk.bf16.mxu0 %vm11069_vm3, %v11068_v35 }
 0xa1f   : > { %v7755_v59 = vpop.f32.mrb[196].mxu0  ;;  %v7908_v54 = vpop.f32.mrb[208].mxu1 }
 0xa20   : > { %v7963_v34 = vmax.f32 %v7755_v59, %v7908_v54  ;;  %v9896_v41 = vpop.f32.mrb[197].mxu0  ;;  %v9940_v7 = vpop.f32.mrb[209].mxu1  ;;  %v11024_v54 = vld [vmem:[%s13225_s13 + $0x54] sm:$0xff]  }
 0xa21   : > { %v7758_v25 = vpop.f32.mrb[198].mxu0  ;;  %v7911_v58 = vpop.f32.mrb[210].mxu1 }
 0xa22   : > { %v7964_v29 = vmax.f32 %v7758_v25, %v7911_v58  ;;  %v9897_v24 = vpop.f32.mrb[199].mxu0  ;;  %v9941_v42 = vpop.f32.mrb[211].mxu1  ;;  %v11025_v25 = vld [vmem:[%s13225_s13 + $0x5c] sm:$0xff]  }
 0xa24   : > { %v7977_v27 = vpack.c.bf16 %v7964_v29, %v7963_v34 }
 0xa26   : > { %9975 = vmatmul.mubr.msk.bf16.vlgmr.msra.gmra.mrb[224].mxu0 %vm8013_vm5, %v7977_v27 }
 0xa27   : > { %9979 = vmatpush3.bf16.msra.mxu0 %v11016_v47  ;;  %v7763_v11 = vpop.f32.mrb[200].mxu0  ;;  %v7916_v10 = vpop.f32.mrb[212].mxu1  ;;  %9986 = vmatprep.mubr.msk.bf16.mxu0 %vm11069_vm3, %v11068_v35 }
 0xa28   : > { %v7965_v0 = vmax.f32 %v7763_v11, %v7916_v10  ;;  %v9900_v1 = vpop.f32.mrb[201].mxu0  ;;  %v9944_v3 = vpop.f32.mrb[213].mxu1  ;;  %9980 = vmatprep.subr.bf16.mxu0 %v11068_v35 }
 0xa29   : > { %v7766_v51 = vpop.f32.mrb[202].mxu0  ;;  %v7919_v13 = vpop.f32.mrb[214].mxu1  ;;  %v11027_v1 = vld [vmem:[%s13225_s13 + $0x6c] ss:$0 sps:$4 sm:$0xff]  }
 0xa2a   : > { %v7966_v15 = vmax.f32 %v7766_v51, %v7919_v13  ;;  %v9901_v16 = vpop.f32.mrb[203].mxu0  ;;  %v9945_v8 = vpop.f32.mrb[215].mxu1 }
 0xa2b   : > { %9981 = vmatpush3.bf16.msra.mxu0 %v11017_v36  ;;  %v11026_v36 = vld [vmem:[%s13225_s13 + $0x64] sm:$0xff]   ;;  %v8259_v8 = vsel %vm8017_vm4, %v11027_v1, 0 }
 0xa2c   : > { %v7978_v30 = vpack.c.bf16 %v7966_v15, %v7965_v0  ;;  %9982 = vmatprep.subr.bf16.mxu0 %v11068_v35 }
 0xa2f   : > { %9983 = vmatpush3.bf16.msra.mxu0 %v11018_v40  ;;  %v7771_v52 = vpop.f32.mrb[204].mxu0  ;;  %v7924_v26 = vpop.f32.mrb[216].mxu1 }
 0xa30   : > { %v7967_v55 = vmax.f32 %v7771_v52, %v7924_v26  ;;  %v9904_v4 = vpop.f32.mrb[205].mxu0  ;;  %v9948_v6 = vpop.f32.mrb[217].mxu1  ;;  %9984 = vmatprep.subr.bf16.mxu0 %v11068_v35 }
 0xa31   : > { %v7774_v39 = vpop.f32.mrb[206].mxu0  ;;  %v7927_v43 = vpop.f32.mrb[218].mxu1  ;;  %v11029_v6 = vld [vmem:[%s13225_s13 + $0x78] sm:$0xff]  }
 0xa32   : > { %v7968_v33 = vmax.f32 %v7774_v39, %v7927_v43  ;;  %v9905_v23 = vpop.f32.mrb[207].mxu0  ;;  %v9949_v53 = vpop.f32.mrb[219].mxu1  ;;  %v11031_v39 = vld [vmem:[%s13225_s13 + $0x88] ss:$0 sps:$4 sm:$0xff]  }
 0xa33   : > { %9985 = vmatpush3.bf16.msra.mxu0 %v8103_v9  ;;  %v11030_v9 = vld [vmem:[%s13225_s13 + $0x80] sm:$0xff]   ;;  %v8337_v43 = vsel %vm8017_vm4, %v11031_v39, 0  ;;  %v11033_v23 = vld [vmem:[%s13225_s13 + $0x94] sm:$0xff]  }
 0xa34   : > { %v7979_v5 = vpack.c.bf16 %v7968_v33, %v7967_v55  ;;  %9990 = vmatprep.subr.bf16.mxu0 %v11068_v35  ;;  %v11028_v55 = vld [vmem:[%s13225_s13 + $0x70] sm:$0xff]   ;;  %v11034_v53 = vld [vmem:[%s13225_s13 + $0x9c] sm:$0xff]  }
 0xa35   : > { %v11032_v33 = vld [vmem:[%s13225_s13 + $0x8c] sm:$0xff]  }
 0xa36   : > { %9987 = vmatmul.mubr.msk.bf16.vlgmr.msra.gmra.mrb[224].mxu0 %vm8013_vm5, %v7978_v30 }
 0xa37   : > { %9991 = vmatpush3.bf16.msra.mxu0 %v11020_v60  ;;  %v7779_v18 = vpop.f32.mrb[208].mxu0  ;;  %v7932_v46 = vpop.f32.mrb[220].mxu1  ;;  %9998 = vmatprep.mubr.msk.bf16.mxu0 %vm11069_vm3, %v11068_v35  ;;  %v11035_v60 = vld [vmem:[%s13225_s13 + $0xa4] ss:$0 sps:$4 sm:$0xff]  }
 0xa38   : > { %v7969_v28 = vmax.f32 %v7779_v18, %v7932_v46  ;;  %v9908_v50 = vpop.f32.mrb[209].mxu0  ;;  %v9952_v57 = vpop.f32.mrb[221].mxu1  ;;  %9992 = vmatprep.subr.bf16.mxu0 %v11068_v35  ;;  %v11036_v18 = vld [vmem:[%s13225_s13 + $0xa8] sm:$0xff]   ;;  %v11037_v46 = vld [vmem:[%s13225_s13 + $0xb0] sm:$0xff]  }
 0xa39   : > { %v7782_v45 = vpop.f32.mrb[210].mxu0  ;;  %v7935_v62 = vpop.f32.mrb[222].mxu1  ;;  %v9341_v57 = vld [vmem:[%s13226_s14] ss:$0 sm:$0xff] }
 0xa3a   : > { %v7970_v38 = vmax.f32 %v7782_v45, %v7935_v62  ;;  %v9909_v49 = vpop.f32.mrb[211].mxu0  ;;  %v9953_v17 = vpop.f32.mrb[223].mxu1 }
 0xa3b   : > { %9993 = vmatpush3.bf16.msra.mxu0 %v11021_v21  ;;  %v11038_v21 = vld [vmem:[%s13225_s13 + $0xb8] sm:$0xff]  }
 0xa3c   : > { %v7980_v61 = vpack.c.bf16 %v7970_v38, %v7969_v28  ;;  %9994 = vmatprep.subr.bf16.mxu0 %v11068_v35  ;;  %v11039_v28 = vld [vmem:[%s13225_s13 + $0xc0] ss:$0 sps:$4 sm:$0xff]  }
 0xa3d   : > { %v8493_v50 = vsel %vm8017_vm4, %v11039_v28, 0 }
 0xa3f   : > { %9995 = vmatpush3.bf16.msra.mxu0 %v11022_v32  ;;  %v7787_v14 = vpop.f32.mrb[212].mxu0  ;;  %v7940_v20 = vpop.f32.mrb[224].mxu1 }
 0xa40   : > { %v7971_v44 = vmax.f32 %v7787_v14, %v7940_v20  ;;  %v9912_v63 = vpop.f32.mrb[213].mxu0  ;;  %v9956_v56 = vpop.f32.mrb[225].mxu1  ;;  %9996 = vmatprep.subr.bf16.mxu0 %v11068_v35 }
 0xa41   : > { %v7790_v22 = vpop.f32.mrb[214].mxu0  ;;  %v7943_v12 = vpop.f32.mrb[226].mxu1 }
 0xa42   : > { %v7972_v19 = vmax.f32 %v7790_v22, %v7943_v12  ;;  %v9913_v31 = vpop.f32.mrb[215].mxu0  ;;  %v9957_v59 = vpop.f32.mrb[227].mxu1 }
 0xa43   : > { %9997 = vmatpush3.bf16.msra.mxu0 %v8181_v48 }
 0xa44   : > { %v7981_v34 = vpack.c.bf16 %v7972_v19, %v7971_v44  ;;  %10002 = vmatprep.subr.bf16.mxu0 %v11068_v35 }
 0xa46   : > { %9999 = vmatmul.mubr.msk.bf16.vlgmr.msra.gmra.mrb[224].mxu0 %vm8013_vm5, %v7979_v5  ;;  %v8415_v5 = vsel %vm8017_vm4, %v11035_v60, 0 }
 0xa47   : > { %10003 = vmatpush3.bf16.msra.mxu0 %v11024_v54  ;;  %v7795_v41 = vpop.f32.mrb[216].mxu0  ;;  %v7948_v7 = vpop.f32.mrb[228].mxu1  ;;  %10010 = vmatprep.mubr.msk.bf16.mxu0 %vm11069_vm3, %v11068_v35 }
 0xa48   : > { %v7973_v58 = vmax.f32 %v7795_v41, %v7948_v7  ;;  %v9916_v29 = vpop.f32.mrb[217].mxu0  ;;  %v9960_v24 = vpop.f32.mrb[229].mxu1  ;;  %10004 = vmatprep.subr.bf16.mxu0 %v11068_v35 }
 0xa49   : > { %v7798_v42 = vpop.f32.mrb[218].mxu0  ;;  %v7951_v47 = vpop.f32.mrb[230].mxu1 }
 0xa4a   : > { %v7974_v27 = vmax.f32 %v7798_v42, %v7951_v47  ;;  %v9917_v11 = vpop.f32.mrb[219].mxu0  ;;  %v9961_v10 = vpop.f32.mrb[231].mxu1 }
 0xa4b   : > { %10005 = vmatpush3.bf16.msra.mxu0 %v11025_v25 }
 0xa4c   : > { %v7982_v0 = vpack.c.bf16 %v7974_v27, %v7973_v58  ;;  %10006 = vmatprep.subr.bf16.mxu0 %v11068_v35 }
 0xa4f   : > { %10007 = vmatpush3.bf16.msra.mxu0 %v11026_v36  ;;  %v7803_v3 = vpop.f32.mrb[220].mxu0  ;;  %v7956_v51 = vpop.f32.mrb[232].mxu1 }
 0xa50   : > { %v7975_v13 = vmax.f32 %v7803_v3, %v7956_v51  ;;  %v9920_v15 = vpop.f32.mrb[221].mxu0  ;;  %v9964_v16 = vpop.f32.mrb[233].mxu1  ;;  %10008 = vmatprep.subr.bf16.mxu0 %v11068_v35 }
 0xa51   : > { %v7806_v40 = vpop.f32.mrb[222].mxu0  ;;  %v7959_v30 = vpop.f32.mrb[234].mxu1 }
 0xa52   : > { %v7976_v37 = vmax.f32 %v7806_v40, %v7959_v30  ;;  %v9921_v52 = vpop.f32.mrb[223].mxu0  ;;  %v9965_v26 = vpop.f32.mrb[235].mxu1 }
 0xa53   : > { %10009 = vmatpush3.bf16.msra.mxu0 %v8259_v8 }
 0xa54   : > { %v7983_v4 = vpack.c.bf16 %v7976_v37, %v7975_v13  ;;  %10014 = vmatprep.subr.bf16.mxu0 %v11068_v35 }
 0xa56   : > { %10011 = vmatmul.mubr.msk.bf16.vlgmr.msra.gmra.mrb[224].mxu0 %vm8013_vm5, %v7980_v61 }
 0xa57   : > { %10015 = vmatpush3.bf16.msra.mxu0 %v11028_v55  ;;  %10022 = vmatprep.mubr.msk.bf16.mxu0 %vm11069_vm3, %v11068_v35 }
 0xa58   : > { %10016 = vmatprep.subr.bf16.mxu0 %v11068_v35 }
 0xa5b   : > { %10017 = vmatpush3.bf16.msra.mxu0 %v11029_v6 }
 0xa5c   : > { %10018 = vmatprep.subr.bf16.mxu0 %v11068_v35 }
 0xa5f   : > { %10019 = vmatpush3.bf16.msra.mxu0 %v11030_v9 }
 0xa60   : > { %10020 = vmatprep.subr.bf16.mxu0 %v11068_v35 }
 0xa63   : > { %10021 = vmatpush3.bf16.msra.mxu0 %v8337_v43 }
 0xa64   : > { %10026 = vmatprep.subr.bf16.mxu0 %v11068_v35 }
 0xa66   : > { %10023 = vmatmul.mubr.msk.bf16.vlgmr.msra.gmra.mrb[224].mxu0 %vm8013_vm5, %v7981_v34 }
 0xa67   : > { %10027 = vmatpush3.bf16.msra.mxu0 %v11032_v33  ;;  %10034 = vmatprep.mubr.msk.bf16.mxu0 %vm11069_vm3, %v11068_v35 }
 0xa68   : > { %10028 = vmatprep.subr.bf16.mxu0 %v11068_v35 }
 0xa6b   : > { %10029 = vmatpush3.bf16.msra.mxu0 %v11033_v23 }
 0xa6c   : > { %10030 = vmatprep.subr.bf16.mxu0 %v11068_v35 }
 0xa6f   : > { %10031 = vmatpush3.bf16.msra.mxu0 %v11034_v53 }
 0xa70   : > { %10032 = vmatprep.subr.bf16.mxu0 %v11068_v35 }
 0xa73   : > { %10033 = vmatpush3.bf16.msra.mxu0 %v8415_v5 }
 0xa74   : > { %10038 = vmatprep.subr.bf16.mxu0 %v11068_v35 }
 0xa76   : > { %10035 = vmatmul.mubr.msk.bf16.vlgmr.msra.gmra.mrb[224].mxu0 %vm8013_vm5, %v7982_v0 }
 0xa77   : > { %10039 = vmatpush3.bf16.msra.mxu0 %v11036_v18  ;;  %10046 = vmatprep.mubr.msk.bf16.mxu0 %vm11069_vm3, %v11068_v35 }
 0xa78   : > { %10040 = vmatprep.subr.bf16.mxu0 %v11068_v35 }
 0xa7b   : > { %10041 = vmatpush3.bf16.msra.mxu0 %v11037_v46 }
 0xa7c   : > { %10042 = vmatprep.subr.bf16.mxu0 %v11068_v35 }
 0xa7f   : > { %10043 = vmatpush3.bf16.msra.mxu0 %v11038_v21 }
 0xa80   : > { %10044 = vmatprep.subr.bf16.mxu0 %v11068_v35 }
 0xa83   : > { %10045 = vmatpush3.bf16.msra.mxu0 %v8493_v50 }
 0xa86   : > { %10047 = vmatmul.mubr.msk.bf16.vlgmr.msra.gmra.mrb[224].mxu0 %vm8013_vm5, %v7983_v4 }
 0xb59   : > { %v8529_v45 = vpop.f32.mrb[224].mxu0 }
 0xb5a   : > { %v10078_v35 = vadd.f32 %v9341_v57, %v8529_v45  ;;  %v10048_v62 = vpop.f32.mrb[225].mxu0 }
 0xb5b   : > { %v8532_v38 = vpop.f32.mrb[226].mxu0 }
 0xb5c   : > { %8538 = vst [vmem:[%s773_s27] sm:$0xff] %v10078_v35  ;;  %v10079_v49 = vadd.f32 %v9341_v57, %v8532_v38  ;;  %v10049_v17 = vpop.f32.mrb[227].mxu0 }
 0xb5e   : > { %8539 = vst [vmem:[%s773_s27 + $0x8] sm:$0xff] %v10079_v49 }
 0xb5f PF: > { %p22_p9 = scmp.ge.s32.totalorder %s11167_s22, 4   ;;  %s13228_s18 = smov %s11061_s19 }
 0xb60   : > { %s13229_s19 = smov %s11176_s25  ;;  %s13230_s20 = smov %s11167_s22 }
 0xb61   :  { %24 = sbr.rel (!%p22_p9) target bundleno = 2 (0x2), region = 181 }

</bundles_post_ra>
